<compile_context>
chip_gen: v5e
topology: v5e:2x2
jax: 0.10.0
libtpu: 0.0.40
codegen_flags: <defaults>
</compile_context>

<pallas_src>
import numpy as np
import jax
import jax.numpy as jnp
from jax.experimental import pallas as pl
from jax.experimental.pallas import tpu as pltpu


# ----------------------------------------------------------------------------------
# Fused forward kernel (one grid step = one block of B_TILE sequences)
# ----------------------------------------------------------------------------------
def autoencoder_kernel(x_ref, eps_ref, mask_ref, gru_ref, bias_ref,
                       wml_ref, wl2h_ref, wout_ref, y_ref):
    S, BT, E = x_ref.shape
    W3 = gru_ref.shape[1]          # 3 * K
    K = W3 // 3                    # 2 * hidden_dim  (carry lanes: [h_fwd | h_bwd])
    H = K // 2                     # hidden_dim
    F = eps_ref.shape[1]

    # One-time static lane masks.
    lane3 = jax.lax.broadcasted_iota(jnp.int32, (1, W3), 1)
    fwd_mask3 = (lane3 % K) < H            # fwd-direction lanes inside every gate group
    laneK = jax.lax.broadcasted_iota(jnp.int32, (1, K), 1)
    fwd_maskK = laneK < H

    # Packed weight / bias views (static row offsets, all multiples of 8 sublanes).
    e_wih = gru_ref[0:E, :]
    e_whh = gru_ref[E:E + K, :]
    d_wih = gru_ref[E + K:2 * E + K, :]
    d_whh = gru_ref[2 * E + K:2 * E + 2 * K, :]
    e_bias = bias_ref[0:1, :]
    e_bhhn = bias_ref[1:2, 0:K]
    d_bias = bias_ref[2:3, :]
    d_bhhn = bias_ref[3:4, 0:K]
    b_ml = bias_ref[4:5, 0:2 * F]
    b_l2h = bias_ref[5:6, 0:K]
    b_out = bias_ref[6:7, 0:E]
    unk = bias_ref[7:8, 0:E]

    def run_gru(x2, wih, whh, bias_rzn, bhh_n, h0):
        """Merged fwd+bwd GRU over B_TILE sequences.  x2: (S*BT, E) time-major.
        Carry h: (BT, K) = [h_fwd | h_bwd].  Step i advances fwd over time i and bwd
        over time S-1-i.  Returns final carry and per-step carries (registers)."""
        # Hoisted input-gate precompute: one matmul, one time-flip, one select.
        xg_all = jnp.dot(x2, wih, preferred_element_type=jnp.float32)          # (S*BT, 3K)
        xg_rev = jnp.concatenate(
            [xg_all[j * BT:(j + 1) * BT, :] for j in range(S - 1, -1, -1)], axis=0)
        xg = jnp.where(fwd_mask3, xg_all, xg_rev) + bias_rzn                   # (S*BT, 3K)
        h = h0
        hs = []
        for i in range(S):                                                     # static unroll
            xgt = xg[i * BT:(i + 1) * BT, :]
            hg = jnp.dot(h, whh, preferred_element_type=jnp.float32)           # (BT, 3K)
            rz = jax.nn.sigmoid(xgt[:, :2 * K] + hg[:, :2 * K])                # 1 sigmoid / step
            r = rz[:, :K]                                                      # lane-aligned
            z = rz[:, K:2 * K]                                                 # off the r->n chain
            n = jnp.tanh(xgt[:, 2 * K:] + r * (hg[:, 2 * K:] + bhh_n))
            h = (1.0 - z) * n + z * h
            hs.append(h)
        return h, hs

    x3 = x_ref[...]                                  # (S, BT, E), time-major
    x2 = x3.reshape(S * BT, E)

    # ---- Encoder GRU ----
    h_enc, _ = run_gru(x2, e_wih, e_whh, e_bias, e_bhhn,
                       jnp.zeros((BT, K), jnp.float32))

    # ---- fused hidden2mean|hidden2logv, reparameterize, latent2hidden ----
    ml = jnp.dot(h_enc, wml_ref[...], preferred_element_type=jnp.float32) + b_ml
    mean = ml[:, :F]
    logv = ml[:, F:2 * F]
    z_lat = eps_ref[...] * jnp.exp(0.1 * logv) + mean           # module uses exp(0.1*logv)
    h0_dec = jnp.dot(z_lat, wl2h_ref[...], preferred_element_type=jnp.float32) + b_l2h

    # ---- word dropout (mask==1 rows replaced by unk embedding) ----
    m2 = mask_ref[...].reshape(S * BT, 1)
    x_dec = x2 + m2 * (unk - x2)

    # ---- Decoder GRU ----
    _, hs = run_gru(x_dec, d_wih, d_whh, d_bias, d_bhhn, h0_dec)

    # ---- output projection: re-pair [h_fwd(t) | h_bwd(t)] with one lane select,
    #      then ONE dense (2H, E) matmul (== outputs2vocab(concat)). ----
    fwd_o = jnp.concatenate(hs, axis=0)              # block t = [h_f(t)     | h_b(S-1-t)]
    rev_o = jnp.concatenate(hs[::-1], axis=0)        # block t = [h_f(S-1-t) | h_b(t)    ]
    states = jnp.where(fwd_maskK, fwd_o, rev_o)      # block t = [h_f(t)     | h_b(t)    ]
    y2 = jnp.dot(states, wout_ref[...], preferred_element_type=jnp.float32) + b_out
    y_ref[...] = y2.reshape(S, BT, E)


# ----------------------------------------------------------------------------------
# pallas_call wrapper (grid over batch blocks; weights resident)
# ----------------------------------------------------------------------------------
def autoencoder_forward(packed, x, eps, drop_mask, *, batch_tile=8):
    S, B, E = x.shape
    F = eps.shape[1]
    BT = min(batch_tile, B)
    assert B % BT == 0

    gru_w = packed["gru_w"]
    biases = packed["biases"]
    w_ml = packed["w_ml"]
    w_l2h = packed["w_l2h"]
    w_out = packed["w_out"]

    def full(a):
        return pl.BlockSpec(a.shape, lambda b: (0,) * a.ndim)

    return pl.pallas_call(
        autoencoder_kernel,
        out_shape=jax.ShapeDtypeStruct((S, B, E), jnp.float32),
        grid=(B // BT,),
        in_specs=[
            pl.BlockSpec((S, BT, E), lambda b: (0, b, 0)),    # x      (time-major)
            pl.BlockSpec((BT, F), lambda b: (b, 0)),          # eps
            pl.BlockSpec((S, BT, 1), lambda b: (0, b, 0)),    # word-dropout mask
            full(gru_w), full(biases), full(w_ml), full(w_l2h), full(w_out),
        ],
        out_specs=pl.BlockSpec((S, BT, E), lambda b: (0, b, 0)),
        compiler_params=pltpu.CompilerParams(dimension_semantics=("parallel",)),
    )(x, eps, drop_mask, gru_w, biases, w_ml, w_l2h, w_out)


# ----------------------------------------------------------------------------------
# One-time parameter packing (gate-compact, direction-fused, pre-transposed layouts)
# ----------------------------------------------------------------------------------
def pack_params(raw, E, H, F):
    K = 2 * H
    W3 = 3 * K

    def place(mat, d):
        """mat: (rows, 3H), torch gate order (r, z, n).  Gate g columns -> lanes
        [g*K + d*H, g*K + (d+1)*H) of a zero (rows, 3K) array (d: 0=fwd, 1=bwd)."""
        mat = np.asarray(mat, np.float32)
        out = np.zeros((mat.shape[0], W3), np.float32)
        for g in range(3):
            out[:, g * K + d * H: g * K + (d + 1) * H] = mat[:, g * H:(g + 1) * H]
        return out

    def gru_pack(pf, pb):
        wih = place(pf["wih_T"], 0) + place(pb["wih_T"], 1)        # (E, 3K) combined
        whh = np.zeros((K, W3), np.float32)                        # block-diag per direction
        whh[:H] = place(pf["whh_T"], 0)
        whh[H:] = place(pb["whh_T"], 1)
        bih = place(pf["bih"], 0) + place(pb["bih"], 1)
        bhh = place(pf["bhh"], 0) + place(pb["bhh"], 1)
        bias_comb = bih.copy()
        bias_comb[:, :2 * K] += bhh[:, :2 * K]                     # fold r/z recurrent biases
        bhh_n = bhh[:, 2 * K:]                                     # (1, K), stays inside r*(.)
        return wih, whh, bias_comb, bhh_n

    e_wih, e_whh, e_bias, e_bhhn = gru_pack(raw["enc_gru_f"], raw["enc_gru_b"])
    d_wih, d_whh, d_bias, d_bhhn = gru_pack(raw["dec_gru_f"], raw["dec_gru_b"])

    gru_w = np.concatenate([e_wih, e_whh, d_wih, d_whh], axis=0)   # (2E + 2K, 3K)

    biases = np.zeros((8, W3), np.float32)
    biases[0] = e_bias[0]
    biases[1, :K] = e_bhhn[0]
    biases[2] = d_bias[0]
    biases[3, :K] = d_bhhn[0]
    biases[4, :2 * F] = np.concatenate([np.asarray(raw["hidden2mean_b"]),
                                        np.asarray(raw["hidden2logv_b"])])
    biases[5, :K] = np.asarray(raw["latent2hidden_b"])
    biases[6, :E] = np.asarray(raw["outputs2vocab_b"])
    biases[7, :E] = np.asarray(raw["unk_emb"])

    packed = {
        "gru_w": gru_w,
        "biases": biases,
        "w_ml": np.concatenate([np.asarray(raw["hidden2mean_w"]).T,
                                np.asarray(raw["hidden2logv_w"]).T], axis=1),  # (2H, 2F)
        "w_l2h": np.asarray(raw["latent2hidden_w"]).T,                         # (F, 2H)
        "w_out": np.asarray(raw["outputs2vocab_w"]).T,                         # (2H, E)
    }
    return {k: jnp.asarray(v, jnp.float32) for k, v in packed.items()}


# ----------------------------------------------------------------------------------
# Deterministic raw parameter init (shapes follow the nn.Module __init__)
# ----------------------------------------------------------------------------------
def init_raw_params(key, E, H, F):
    keys = iter(jax.random.split(key, 32))

    def u(shape, scale):
        return jax.random.uniform(next(keys), shape, jnp.float32, -scale, scale)

    s_gru = 1.0 / float(np.sqrt(H))
    s_lin = 1.0 / float(np.sqrt(2 * H))
    s_lat = 1.0 / float(np.sqrt(F))

    def gru_dir_params():
        return {
            "wih_T": u((3 * H, E), s_gru).T,   # stored (E, 3H): x @ W_ih^T
            "whh_T": u((3 * H, H), s_gru).T,   # stored (H, 3H): h @ W_hh^T
            "bih": u((1, 3 * H), s_gru),
            "bhh": u((1, 3 * H), s_gru),
        }

    return {
        "enc_gru_f": gru_dir_params(),
        "enc_gru_b": gru_dir_params(),
        "dec_gru_f": gru_dir_params(),
        "dec_gru_b": gru_dir_params(),
        "hidden2mean_w": u((F, 2 * H), s_lin),
        "hidden2mean_b": u((F,), s_lin),
        "hidden2logv_w": u((F, 2 * H), s_lin),
        "hidden2logv_b": u((F,), s_lin),
        "latent2hidden_w": u((2 * H, F), s_lat),
        "latent2hidden_b": u((2 * H,), s_lat),
        "outputs2vocab_w": u((E, 2 * H), s_lin),
        "outputs2vocab_b": u((E,), s_lin),
        "unk_emb": u((E,), 1.0),
    }


# ----------------------------------------------------------------------------------
# Pure NumPy float64 reference (mirrors torch semantics) for correctness checking
# ----------------------------------------------------------------------------------
def _reference_single(p, x, eps, mask):
    def sigmoid(v):
        return 1.0 / (1.0 + np.exp(-v))

    def gru_dir(xseq, d, h0, reverse):
        wih = d["wih_T"].T          # (3H, E)
        whh = d["whh_T"].T          # (3H, H)
        bih = d["bih"][0]
        bhh = d["bhh"][0]
        Hd = whh.shape[1]
        S_ = xseq.shape[0]
        outs = np.zeros((S_, Hd))
        h = h0.copy()
        order = range(S_ - 1, -1, -1) if reverse else range(S_)
        for t in order:
            gi = wih @ xseq[t] + bih
            gh = whh @ h + bhh
            r = sigmoid(gi[:Hd] + gh[:Hd])
            zg = sigmoid(gi[Hd:2 * Hd] + gh[Hd:2 * Hd])
            n = np.tanh(gi[2 * Hd:] + r * gh[2 * Hd:])
            h = (1.0 - zg) * n + zg * h
            outs[t] = h
        return outs, h

    H = p["enc_gru_f"]["whh_T"].shape[0]
    _, hf = gru_dir(x, p["enc_gru_f"], np.zeros(H), False)
    _, hb = gru_dir(x, p["enc_gru_b"], np.zeros(H), True)
    hn = np.concatenate([hf, hb])
    mean = p["hidden2mean_w"] @ hn + p["hidden2mean_b"]
    logv = p["hidden2logv_w"] @ hn + p["hidden2logv_b"]
    z = eps * np.exp(0.1 * logv) + mean
    hidden = p["latent2hidden_w"] @ z + p["latent2hidden_b"]
    h0 = hidden.reshape(2, H)
    x_dec = np.where(mask[:, None], p["unk_emb"][None, :], x)
    of, _ = gru_dir(x_dec, p["dec_gru_f"], h0[0], False)
    ob, _ = gru_dir(x_dec, p["dec_gru_b"], h0[1], True)
    out = np.concatenate([of, ob], axis=1)
    return out @ p["outputs2vocab_w"].T + p["outputs2vocab_b"]


def autoencoder_reference(raw, x, eps, mask):
    """x: (S, B, E); eps: (B, F); mask: (S, B) bool.  Returns (S, B, E)."""
    p = jax.tree_util.tree_map(lambda a: np.asarray(a, np.float64), raw)
    S, B, E = x.shape
    out = np.zeros((S, B, E))
    for b in range(B):
        out[:, b, :] = _reference_single(p,
                                         np.asarray(x[:, b, :], np.float64),
                                         np.asarray(eps[b], np.float64),
                                         np.asarray(mask[:, b]))
    return out


# ----------------------------------------------------------------------------------
if __name__ == "__main__":
    # embeddings_dim, hidden_dim, features_dim, seq_length, batch of independent seqs
    E, H, F, S, B = 16, 32, 8, 8, 16
    WORD_DROPOUT_RATE = 0.5

    key = jax.random.PRNGKey(0)
    k_param, k_x, k_eps, k_drop = jax.random.split(key, 4)

    raw = init_raw_params(k_param, E, H, F)
    packed = pack_params(raw, E, H, F)

    x = jax.random.normal(k_x, (S, B, E), jnp.float32)          # time-major batch of seqs
    # torch.randn / torch.rand randomness reproduced deterministically as inputs:
    eps = jax.random.normal(k_eps, (B, F), jnp.float32)
    prob = jax.random.uniform(k_drop, (S, B), jnp.float32)
    drop_mask = (prob < WORD_DROPOUT_RATE).astype(jnp.float32)[:, :, None]   # (S, B, 1)

    fwd = jax.jit(autoencoder_forward)
    y = jax.block_until_ready(fwd(packed, x, eps, drop_mask))

    y_ref = autoencoder_reference(raw, np.asarray(x), np.asarray(eps),
                                  np.asarray(prob) < WORD_DROPOUT_RATE)
    np.testing.assert_allclose(np.asarray(y, np.float64), y_ref, rtol=2e-3, atol=2e-3)

    print("KERNEL_OK")
</pallas_src>

<mosaic_0001>
module attributes {stable_mosaic.version = 11 : i64} {
  func.func @autoencoder_kernel(%arg0: i32, %arg1: memref<8x8x16xf32, #tpu.memory_space<vmem>>, %arg2: memref<8x8xf32, #tpu.memory_space<vmem>>, %arg3: memref<8x8x1xf32, #tpu.memory_space<vmem>>, %arg4: memref<160x192xf32, #tpu.memory_space<vmem>>, %arg5: memref<8x192xf32, #tpu.memory_space<vmem>>, %arg6: memref<64x16xf32, #tpu.memory_space<vmem>>, %arg7: memref<8x64xf32, #tpu.memory_space<vmem>>, %arg8: memref<64x16xf32, #tpu.memory_space<vmem>>, %arg9: memref<8x8x16xf32, #tpu.memory_space<vmem>>) attributes {dimension_semantics = [#tpu.dimension_semantics<parallel>], iteration_bounds = array<i64: 2>, scalar_prefetch = 0 : i64, scratch_operands = 0 : i64, tpu.core_type = #tpu.core_type<tc>, window_params = [{transform_indices = @transform_0, window_bounds = array<i64: 8, 8, 16>}, {transform_indices = @transform_1, window_bounds = array<i64: 8, 8>}, {transform_indices = @transform_2, window_bounds = array<i64: 8, 8, 1>}, {pipeline_mode = #tpu.pipeline_mode<synchronous>, transform_indices = @transform_3, window_bounds = array<i64: 160, 192>}, {pipeline_mode = #tpu.pipeline_mode<synchronous>, transform_indices = @transform_4, window_bounds = array<i64: 8, 192>}, {pipeline_mode = #tpu.pipeline_mode<synchronous>, transform_indices = @transform_5, window_bounds = array<i64: 64, 16>}, {pipeline_mode = #tpu.pipeline_mode<synchronous>, transform_indices = @transform_6, window_bounds = array<i64: 8, 64>}, {pipeline_mode = #tpu.pipeline_mode<synchronous>, transform_indices = @transform_7, window_bounds = array<i64: 64, 16>}, {transform_indices = @transform_8, window_bounds = array<i64: 8, 8, 16>}]} {
    %0 = tpu.iota {dimensions = array<i32: 1>} : vector<1x192xi32>
    %c64_i32 = arith.constant 64 : i32
    %c0_i32 = arith.constant 0 : i32
    %1 = arith.cmpi eq, %c64_i32, %c0_i32 : i32
    %c1_i32 = arith.constant 1 : i32
    %2 = arith.select %1, %c1_i32, %c64_i32 : i32
    %3 = vector.broadcast %2 : i32 to vector<1x192xi32>
    %4 = arith.remsi %0, %3 : vector<1x192xi32>
    %c0_i32_0 = arith.constant 0 : i32
    %5 = vector.broadcast %c0_i32_0 : i32 to vector<1x192xi32>
    %6 = arith.cmpi ne, %4, %5 : vector<1x192xi32>
    %c0_i32_1 = arith.constant 0 : i32
    %7 = vector.broadcast %c0_i32_1 : i32 to vector<1x192xi32>
    %8 = arith.cmpi slt, %4, %7 : vector<1x192xi32>
    %c0_i32_2 = arith.constant 0 : i32
    %9 = arith.cmpi slt, %2, %c0_i32_2 : i32
    %10 = vector.broadcast %9 : i1 to vector<1x192xi1>
    %11 = vector.broadcast %10 : vector<1x192xi1> to vector<1x192xi1>
    %12 = arith.xori %8, %11 : vector<1x192xi1>
    %13 = arith.andi %12, %6 : vector<1x192xi1>
    %14 = vector.broadcast %2 : i32 to vector<1x192xi32>
    %15 = arith.addi %4, %14 : vector<1x192xi32>
    %16 = arith.select %13, %15, %4 : vector<1x192xi1>, vector<1x192xi32>
    %c32_i32 = arith.constant 32 : i32
    %17 = vector.broadcast %c32_i32 : i32 to vector<1x192xi32>
    %18 = arith.cmpi slt, %16, %17 : vector<1x192xi32>
    %19 = tpu.iota {dimensions = array<i32: 1>} : vector<1x64xi32>
    %c32_i32_3 = arith.constant 32 : i32
    %20 = vector.broadcast %c32_i32_3 : i32 to vector<1x64xi32>
    %21 = arith.cmpi slt, %19, %20 : vector<1x64xi32>
    %c0 = arith.constant 0 : index
    %c0_4 = arith.constant 0 : index
    %22 = vector.load %arg4[%c0, %c0_4] : memref<160x192xf32, #tpu.memory_space<vmem>>, vector<16x192xf32>
    %c16 = arith.constant 16 : index
    %c0_5 = arith.constant 0 : index
    %23 = vector.load %arg4[%c16, %c0_5] : memref<160x192xf32, #tpu.memory_space<vmem>>, vector<64x192xf32>
    %c80 = arith.constant 80 : index
    %c0_6 = arith.constant 0 : index
    %24 = vector.load %arg4[%c80, %c0_6] : memref<160x192xf32, #tpu.memory_space<vmem>>, vector<16x192xf32>
    %c96 = arith.constant 96 : index
    %c0_7 = arith.constant 0 : index
    %25 = vector.load %arg4[%c96, %c0_7] : memref<160x192xf32, #tpu.memory_space<vmem>>, vector<64x192xf32>
    %c0_8 = arith.constant 0 : index
    %c0_9 = arith.constant 0 : index
    %26 = vector.load %arg5[%c0_8, %c0_9] : memref<8x192xf32, #tpu.memory_space<vmem>>, vector<1x192xf32>
    %c1 = arith.constant 1 : index
    %c0_10 = arith.constant 0 : index
    %27 = vector.load %arg5[%c1, %c0_10] : memref<8x192xf32, #tpu.memory_space<vmem>>, vector<1x64xf32>
    %c2 = arith.constant 2 : index
    %c0_11 = arith.constant 0 : index
    %28 = vector.load %arg5[%c2, %c0_11] : memref<8x192xf32, #tpu.memory_space<vmem>>, vector<1x192xf32>
    %c3 = arith.constant 3 : index
    %c0_12 = arith.constant 0 : index
    %29 = vector.load %arg5[%c3, %c0_12] : memref<8x192xf32, #tpu.memory_space<vmem>>, vector<1x64xf32>
    %c4 = arith.constant 4 : index
    %c0_13 = arith.constant 0 : index
    %30 = vector.load %arg5[%c4, %c0_13] : memref<8x192xf32, #tpu.memory_space<vmem>>, vector<1x16xf32>
    %c5 = arith.constant 5 : index
    %c0_14 = arith.constant 0 : index
    %31 = vector.load %arg5[%c5, %c0_14] : memref<8x192xf32, #tpu.memory_space<vmem>>, vector<1x64xf32>
    %c6 = arith.constant 6 : index
    %c0_15 = arith.constant 0 : index
    %32 = vector.load %arg5[%c6, %c0_15] : memref<8x192xf32, #tpu.memory_space<vmem>>, vector<1x16xf32>
    %c7 = arith.constant 7 : index
    %c0_16 = arith.constant 0 : index
    %33 = vector.load %arg5[%c7, %c0_16] : memref<8x192xf32, #tpu.memory_space<vmem>>, vector<1x16xf32>
    %c0_17 = arith.constant 0 : index
    %c0_18 = arith.constant 0 : index
    %c0_19 = arith.constant 0 : index
    %34 = vector.load %arg1[%c0_17, %c0_18, %c0_19] : memref<8x8x16xf32, #tpu.memory_space<vmem>>, vector<8x8x16xf32>
    %35 = vector.shape_cast %34 : vector<8x8x16xf32> to vector<64x16xf32>
    %cst = arith.constant 0.000000e+00 : f32
    %36 = vector.broadcast %cst : f32 to vector<8x64xf32>
    %cst_20 = arith.constant dense<0.000000e+00> : vector<64x192xf32>
    %37 = tpu.matmul %35, %22, %cst_20 {dimension_numbers = #tpu.dot_dimension_numbers<[1], [0], [0], [1], [0, 0, 1, 1], [], []>} : vector<64x16xf32>, vector<16x192xf32>, vector<64x192xf32> -> vector<64x192xf32>
    %38 = vector.extract_strided_slice %37 {offsets = [56, 0], sizes = [8, 192], strides = [1, 1]} : vector<64x192xf32> to vector<8x192xf32>
    %39 = vector.extract_strided_slice %37 {offsets = [48, 0], sizes = [8, 192], strides = [1, 1]} : vector<64x192xf32> to vector<8x192xf32>
    %40 = vector.extract_strided_slice %37 {offsets = [40, 0], sizes = [8, 192], strides = [1, 1]} : vector<64x192xf32> to vector<8x192xf32>
    %41 = vector.extract_strided_slice %37 {offsets = [32, 0], sizes = [8, 192], strides = [1, 1]} : vector<64x192xf32> to vector<8x192xf32>
    %42 = vector.extract_strided_slice %37 {offsets = [24, 0], sizes = [8, 192], strides = [1, 1]} : vector<64x192xf32> to vector<8x192xf32>
    %43 = vector.extract_strided_slice %37 {offsets = [16, 0], sizes = [8, 192], strides = [1, 1]} : vector<64x192xf32> to vector<8x192xf32>
    %44 = vector.extract_strided_slice %37 {offsets = [8, 0], sizes = [8, 192], strides = [1, 1]} : vector<64x192xf32> to vector<8x192xf32>
    %45 = vector.extract_strided_slice %37 {offsets = [0, 0], sizes = [8, 192], strides = [1, 1]} : vector<64x192xf32> to vector<8x192xf32>
    %46 = tpu.concatenate %38, %39, %40, %41, %42, %43, %44, %45 in 0 : vector<8x192xf32>, vector<8x192xf32>, vector<8x192xf32>, vector<8x192xf32>, vector<8x192xf32>, vector<8x192xf32>, vector<8x192xf32>, vector<8x192xf32> -> vector<64x192xf32>
    %47 = vector.shape_cast %18 : vector<1x192xi1> to vector<1x192xi1>
    %48 = vector.broadcast %47 : vector<1x192xi1> to vector<64x192xi1>
    %49 = arith.select %48, %37, %46 : vector<64x192xi1>, vector<64x192xf32>
    %50 = vector.broadcast %26 : vector<1x192xf32> to vector<64x192xf32>
    %51 = arith.addf %49, %50 : vector<64x192xf32>
    %52 = vector.extract_strided_slice %51 {offsets = [0, 0], sizes = [8, 192], strides = [1, 1]} : vector<64x192xf32> to vector<8x192xf32>
    %cst_21 = arith.constant dense<0.000000e+00> : vector<8x192xf32>
    %53 = tpu.matmul %36, %23, %cst_21 {dimension_numbers = #tpu.dot_dimension_numbers<[1], [0], [0], [1], [0, 0, 1, 1], [], []>} : vector<8x64xf32>, vector<64x192xf32>, vector<8x192xf32> -> vector<8x192xf32>
    %54 = vector.extract_strided_slice %52 {offsets = [0, 0], sizes = [8, 128], strides = [1, 1]} : vector<8x192xf32> to vector<8x128xf32>
    %55 = vector.extract_strided_slice %53 {offsets = [0, 0], sizes = [8, 128], strides = [1, 1]} : vector<8x192xf32> to vector<8x128xf32>
    %56 = arith.addf %54, %55 : vector<8x128xf32>
    %57 = arith.negf %56 : vector<8x128xf32>
    %58 = math.exp %57 : vector<8x128xf32>
    %cst_22 = arith.constant 1.000000e+00 : f32
    %59 = vector.broadcast %cst_22 : f32 to vector<8x128xf32>
    %60 = arith.addf %59, %58 : vector<8x128xf32>
    %61 = arith.divf %59, %60 : vector<8x128xf32>
    %62 = vector.extract_strided_slice %61 {offsets = [0, 0], sizes = [8, 64], strides = [1, 1]} : vector<8x128xf32> to vector<8x64xf32>
    %63 = vector.extract_strided_slice %61 {offsets = [0, 64], sizes = [8, 64], strides = [1, 1]} : vector<8x128xf32> to vector<8x64xf32>
    %64 = vector.extract_strided_slice %52 {offsets = [0, 128], sizes = [8, 64], strides = [1, 1]} : vector<8x192xf32> to vector<8x64xf32>
    %65 = vector.extract_strided_slice %53 {offsets = [0, 128], sizes = [8, 64], strides = [1, 1]} : vector<8x192xf32> to vector<8x64xf32>
    %66 = vector.broadcast %27 : vector<1x64xf32> to vector<8x64xf32>
    %67 = arith.addf %65, %66 : vector<8x64xf32>
    %68 = arith.mulf %62, %67 : vector<8x64xf32>
    %69 = arith.addf %64, %68 : vector<8x64xf32>
    %70 = math.tanh %69 : vector<8x64xf32>
    %cst_23 = arith.constant 1.000000e+00 : f32
    %71 = vector.broadcast %cst_23 : f32 to vector<8x64xf32>
    %72 = arith.subf %71, %63 : vector<8x64xf32>
    %73 = arith.mulf %72, %70 : vector<8x64xf32>
    %74 = arith.mulf %63, %36 : vector<8x64xf32>
    %75 = arith.addf %73, %74 : vector<8x64xf32>
    %76 = vector.extract_strided_slice %51 {offsets = [8, 0], sizes = [8, 192], strides = [1, 1]} : vector<64x192xf32> to vector<8x192xf32>
    %cst_24 = arith.constant dense<0.000000e+00> : vector<8x192xf32>
    %77 = tpu.matmul %75, %23, %cst_24 {dimension_numbers = #tpu.dot_dimension_numbers<[1], [0], [0], [1], [0, 0, 1, 1], [], []>} : vector<8x64xf32>, vector<64x192xf32>, vector<8x192xf32> -> vector<8x192xf32>
    %78 = vector.extract_strided_slice %76 {offsets = [0, 0], sizes = [8, 128], strides = [1, 1]} : vector<8x192xf32> to vector<8x128xf32>
    %79 = vector.extract_strided_slice %77 {offsets = [0, 0], sizes = [8, 128], strides = [1, 1]} : vector<8x192xf32> to vector<8x128xf32>
    %80 = arith.addf %78, %79 : vector<8x128xf32>
    %81 = arith.negf %80 : vector<8x128xf32>
    %82 = math.exp %81 : vector<8x128xf32>
    %cst_25 = arith.constant 1.000000e+00 : f32
    %83 = vector.broadcast %cst_25 : f32 to vector<8x128xf32>
    %84 = arith.addf %83, %82 : vector<8x128xf32>
    %85 = arith.divf %83, %84 : vector<8x128xf32>
    %86 = vector.extract_strided_slice %85 {offsets = [0, 0], sizes = [8, 64], strides = [1, 1]} : vector<8x128xf32> to vector<8x64xf32>
    %87 = vector.extract_strided_slice %85 {offsets = [0, 64], sizes = [8, 64], strides = [1, 1]} : vector<8x128xf32> to vector<8x64xf32>
    %88 = vector.extract_strided_slice %76 {offsets = [0, 128], sizes = [8, 64], strides = [1, 1]} : vector<8x192xf32> to vector<8x64xf32>
    %89 = vector.extract_strided_slice %77 {offsets = [0, 128], sizes = [8, 64], strides = [1, 1]} : vector<8x192xf32> to vector<8x64xf32>
    %90 = vector.broadcast %27 : vector<1x64xf32> to vector<8x64xf32>
    %91 = arith.addf %89, %90 : vector<8x64xf32>
    %92 = arith.mulf %86, %91 : vector<8x64xf32>
    %93 = arith.addf %88, %92 : vector<8x64xf32>
    %94 = math.tanh %93 : vector<8x64xf32>
    %cst_26 = arith.constant 1.000000e+00 : f32
    %95 = vector.broadcast %cst_26 : f32 to vector<8x64xf32>
    %96 = arith.subf %95, %87 : vector<8x64xf32>
    %97 = arith.mulf %96, %94 : vector<8x64xf32>
    %98 = arith.mulf %87, %75 : vector<8x64xf32>
    %99 = arith.addf %97, %98 : vector<8x64xf32>
    %100 = vector.extract_strided_slice %51 {offsets = [16, 0], sizes = [8, 192], strides = [1, 1]} : vector<64x192xf32> to vector<8x192xf32>
    %cst_27 = arith.constant dense<0.000000e+00> : vector<8x192xf32>
    %101 = tpu.matmul %99, %23, %cst_27 {dimension_numbers = #tpu.dot_dimension_numbers<[1], [0], [0], [1], [0, 0, 1, 1], [], []>} : vector<8x64xf32>, vector<64x192xf32>, vector<8x192xf32> -> vector<8x192xf32>
    %102 = vector.extract_strided_slice %100 {offsets = [0, 0], sizes = [8, 128], strides = [1, 1]} : vector<8x192xf32> to vector<8x128xf32>
    %103 = vector.extract_strided_slice %101 {offsets = [0, 0], sizes = [8, 128], strides = [1, 1]} : vector<8x192xf32> to vector<8x128xf32>
    %104 = arith.addf %102, %103 : vector<8x128xf32>
    %105 = arith.negf %104 : vector<8x128xf32>
    %106 = math.exp %105 : vector<8x128xf32>
    %cst_28 = arith.constant 1.000000e+00 : f32
    %107 = vector.broadcast %cst_28 : f32 to vector<8x128xf32>
    %108 = arith.addf %107, %106 : vector<8x128xf32>
    %109 = arith.divf %107, %108 : vector<8x128xf32>
    %110 = vector.extract_strided_slice %109 {offsets = [0, 0], sizes = [8, 64], strides = [1, 1]} : vector<8x128xf32> to vector<8x64xf32>
    %111 = vector.extract_strided_slice %109 {offsets = [0, 64], sizes = [8, 64], strides = [1, 1]} : vector<8x128xf32> to vector<8x64xf32>
    %112 = vector.extract_strided_slice %100 {offsets = [0, 128], sizes = [8, 64], strides = [1, 1]} : vector<8x192xf32> to vector<8x64xf32>
    %113 = vector.extract_strided_slice %101 {offsets = [0, 128], sizes = [8, 64], strides = [1, 1]} : vector<8x192xf32> to vector<8x64xf32>
    %114 = vector.broadcast %27 : vector<1x64xf32> to vector<8x64xf32>
    %115 = arith.addf %113, %114 : vector<8x64xf32>
    %116 = arith.mulf %110, %115 : vector<8x64xf32>
    %117 = arith.addf %112, %116 : vector<8x64xf32>
    %118 = math.tanh %117 : vector<8x64xf32>
    %cst_29 = arith.constant 1.000000e+00 : f32
    %119 = vector.broadcast %cst_29 : f32 to vector<8x64xf32>
    %120 = arith.subf %119, %111 : vector<8x64xf32>
    %121 = arith.mulf %120, %118 : vector<8x64xf32>
    %122 = arith.mulf %111, %99 : vector<8x64xf32>
    %123 = arith.addf %121, %122 : vector<8x64xf32>
    %124 = vector.extract_strided_slice %51 {offsets = [24, 0], sizes = [8, 192], strides = [1, 1]} : vector<64x192xf32> to vector<8x192xf32>
    %cst_30 = arith.constant dense<0.000000e+00> : vector<8x192xf32>
    %125 = tpu.matmul %123, %23, %cst_30 {dimension_numbers = #tpu.dot_dimension_numbers<[1], [0], [0], [1], [0, 0, 1, 1], [], []>} : vector<8x64xf32>, vector<64x192xf32>, vector<8x192xf32> -> vector<8x192xf32>
    %126 = vector.extract_strided_slice %124 {offsets = [0, 0], sizes = [8, 128], strides = [1, 1]} : vector<8x192xf32> to vector<8x128xf32>
    %127 = vector.extract_strided_slice %125 {offsets = [0, 0], sizes = [8, 128], strides = [1, 1]} : vector<8x192xf32> to vector<8x128xf32>
    %128 = arith.addf %126, %127 : vector<8x128xf32>
    %129 = arith.negf %128 : vector<8x128xf32>
    %130 = math.exp %129 : vector<8x128xf32>
    %cst_31 = arith.constant 1.000000e+00 : f32
    %131 = vector.broadcast %cst_31 : f32 to vector<8x128xf32>
    %132 = arith.addf %131, %130 : vector<8x128xf32>
    %133 = arith.divf %131, %132 : vector<8x128xf32>
    %134 = vector.extract_strided_slice %133 {offsets = [0, 0], sizes = [8, 64], strides = [1, 1]} : vector<8x128xf32> to vector<8x64xf32>
    %135 = vector.extract_strided_slice %133 {offsets = [0, 64], sizes = [8, 64], strides = [1, 1]} : vector<8x128xf32> to vector<8x64xf32>
    %136 = vector.extract_strided_slice %124 {offsets = [0, 128], sizes = [8, 64], strides = [1, 1]} : vector<8x192xf32> to vector<8x64xf32>
    %137 = vector.extract_strided_slice %125 {offsets = [0, 128], sizes = [8, 64], strides = [1, 1]} : vector<8x192xf32> to vector<8x64xf32>
    %138 = vector.broadcast %27 : vector<1x64xf32> to vector<8x64xf32>
    %139 = arith.addf %137, %138 : vector<8x64xf32>
    %140 = arith.mulf %134, %139 : vector<8x64xf32>
    %141 = arith.addf %136, %140 : vector<8x64xf32>
    %142 = math.tanh %141 : vector<8x64xf32>
    %cst_32 = arith.constant 1.000000e+00 : f32
    %143 = vector.broadcast %cst_32 : f32 to vector<8x64xf32>
    %144 = arith.subf %143, %135 : vector<8x64xf32>
    %145 = arith.mulf %144, %142 : vector<8x64xf32>
    %146 = arith.mulf %135, %123 : vector<8x64xf32>
    %147 = arith.addf %145, %146 : vector<8x64xf32>
    %148 = vector.extract_strided_slice %51 {offsets = [32, 0], sizes = [8, 192], strides = [1, 1]} : vector<64x192xf32> to vector<8x192xf32>
    %cst_33 = arith.constant dense<0.000000e+00> : vector<8x192xf32>
    %149 = tpu.matmul %147, %23, %cst_33 {dimension_numbers = #tpu.dot_dimension_numbers<[1], [0], [0], [1], [0, 0, 1, 1], [], []>} : vector<8x64xf32>, vector<64x192xf32>, vector<8x192xf32> -> vector<8x192xf32>
    %150 = vector.extract_strided_slice %148 {offsets = [0, 0], sizes = [8, 128], strides = [1, 1]} : vector<8x192xf32> to vector<8x128xf32>
    %151 = vector.extract_strided_slice %149 {offsets = [0, 0], sizes = [8, 128], strides = [1, 1]} : vector<8x192xf32> to vector<8x128xf32>
    %152 = arith.addf %150, %151 : vector<8x128xf32>
    %153 = arith.negf %152 : vector<8x128xf32>
    %154 = math.exp %153 : vector<8x128xf32>
    %cst_34 = arith.constant 1.000000e+00 : f32
    %155 = vector.broadcast %cst_34 : f32 to vector<8x128xf32>
    %156 = arith.addf %155, %154 : vector<8x128xf32>
    %157 = arith.divf %155, %156 : vector<8x128xf32>
    %158 = vector.extract_strided_slice %157 {offsets = [0, 0], sizes = [8, 64], strides = [1, 1]} : vector<8x128xf32> to vector<8x64xf32>
    %159 = vector.extract_strided_slice %157 {offsets = [0, 64], sizes = [8, 64], strides = [1, 1]} : vector<8x128xf32> to vector<8x64xf32>
    %160 = vector.extract_strided_slice %148 {offsets = [0, 128], sizes = [8, 64], strides = [1, 1]} : vector<8x192xf32> to vector<8x64xf32>
    %161 = vector.extract_strided_slice %149 {offsets = [0, 128], sizes = [8, 64], strides = [1, 1]} : vector<8x192xf32> to vector<8x64xf32>
    %162 = vector.broadcast %27 : vector<1x64xf32> to vector<8x64xf32>
    %163 = arith.addf %161, %162 : vector<8x64xf32>
    %164 = arith.mulf %158, %163 : vector<8x64xf32>
    %165 = arith.addf %160, %164 : vector<8x64xf32>
    %166 = math.tanh %165 : vector<8x64xf32>
    %cst_35 = arith.constant 1.000000e+00 : f32
    %167 = vector.broadcast %cst_35 : f32 to vector<8x64xf32>
    %168 = arith.subf %167, %159 : vector<8x64xf32>
    %169 = arith.mulf %168, %166 : vector<8x64xf32>
    %170 = arith.mulf %159, %147 : vector<8x64xf32>
    %171 = arith.addf %169, %170 : vector<8x64xf32>
    %172 = vector.extract_strided_slice %51 {offsets = [40, 0], sizes = [8, 192], strides = [1, 1]} : vector<64x192xf32> to vector<8x192xf32>
    %cst_36 = arith.constant dense<0.000000e+00> : vector<8x192xf32>
    %173 = tpu.matmul %171, %23, %cst_36 {dimension_numbers = #tpu.dot_dimension_numbers<[1], [0], [0], [1], [0, 0, 1, 1], [], []>} : vector<8x64xf32>, vector<64x192xf32>, vector<8x192xf32> -> vector<8x192xf32>
    %174 = vector.extract_strided_slice %172 {offsets = [0, 0], sizes = [8, 128], strides = [1, 1]} : vector<8x192xf32> to vector<8x128xf32>
    %175 = vector.extract_strided_slice %173 {offsets = [0, 0], sizes = [8, 128], strides = [1, 1]} : vector<8x192xf32> to vector<8x128xf32>
    %176 = arith.addf %174, %175 : vector<8x128xf32>
    %177 = arith.negf %176 : vector<8x128xf32>
    %178 = math.exp %177 : vector<8x128xf32>
    %cst_37 = arith.constant 1.000000e+00 : f32
    %179 = vector.broadcast %cst_37 : f32 to vector<8x128xf32>
    %180 = arith.addf %179, %178 : vector<8x128xf32>
    %181 = arith.divf %179, %180 : vector<8x128xf32>
    %182 = vector.extract_strided_slice %181 {offsets = [0, 0], sizes = [8, 64], strides = [1, 1]} : vector<8x128xf32> to vector<8x64xf32>
    %183 = vector.extract_strided_slice %181 {offsets = [0, 64], sizes = [8, 64], strides = [1, 1]} : vector<8x128xf32> to vector<8x64xf32>
    %184 = vector.extract_strided_slice %172 {offsets = [0, 128], sizes = [8, 64], strides = [1, 1]} : vector<8x192xf32> to vector<8x64xf32>
    %185 = vector.extract_strided_slice %173 {offsets = [0, 128], sizes = [8, 64], strides = [1, 1]} : vector<8x192xf32> to vector<8x64xf32>
    %186 = vector.broadcast %27 : vector<1x64xf32> to vector<8x64xf32>
    %187 = arith.addf %185, %186 : vector<8x64xf32>
    %188 = arith.mulf %182, %187 : vector<8x64xf32>
    %189 = arith.addf %184, %188 : vector<8x64xf32>
    %190 = math.tanh %189 : vector<8x64xf32>
    %cst_38 = arith.constant 1.000000e+00 : f32
    %191 = vector.broadcast %cst_38 : f32 to vector<8x64xf32>
    %192 = arith.subf %191, %183 : vector<8x64xf32>
    %193 = arith.mulf %192, %190 : vector<8x64xf32>
    %194 = arith.mulf %183, %171 : vector<8x64xf32>
    %195 = arith.addf %193, %194 : vector<8x64xf32>
    %196 = vector.extract_strided_slice %51 {offsets = [48, 0], sizes = [8, 192], strides = [1, 1]} : vector<64x192xf32> to vector<8x192xf32>
    %cst_39 = arith.constant dense<0.000000e+00> : vector<8x192xf32>
    %197 = tpu.matmul %195, %23, %cst_39 {dimension_numbers = #tpu.dot_dimension_numbers<[1], [0], [0], [1], [0, 0, 1, 1], [], []>} : vector<8x64xf32>, vector<64x192xf32>, vector<8x192xf32> -> vector<8x192xf32>
    %198 = vector.extract_strided_slice %196 {offsets = [0, 0], sizes = [8, 128], strides = [1, 1]} : vector<8x192xf32> to vector<8x128xf32>
    %199 = vector.extract_strided_slice %197 {offsets = [0, 0], sizes = [8, 128], strides = [1, 1]} : vector<8x192xf32> to vector<8x128xf32>
    %200 = arith.addf %198, %199 : vector<8x128xf32>
    %201 = arith.negf %200 : vector<8x128xf32>
    %202 = math.exp %201 : vector<8x128xf32>
    %cst_40 = arith.constant 1.000000e+00 : f32
    %203 = vector.broadcast %cst_40 : f32 to vector<8x128xf32>
    %204 = arith.addf %203, %202 : vector<8x128xf32>
    %205 = arith.divf %203, %204 : vector<8x128xf32>
    %206 = vector.extract_strided_slice %205 {offsets = [0, 0], sizes = [8, 64], strides = [1, 1]} : vector<8x128xf32> to vector<8x64xf32>
    %207 = vector.extract_strided_slice %205 {offsets = [0, 64], sizes = [8, 64], strides = [1, 1]} : vector<8x128xf32> to vector<8x64xf32>
    %208 = vector.extract_strided_slice %196 {offsets = [0, 128], sizes = [8, 64], strides = [1, 1]} : vector<8x192xf32> to vector<8x64xf32>
    %209 = vector.extract_strided_slice %197 {offsets = [0, 128], sizes = [8, 64], strides = [1, 1]} : vector<8x192xf32> to vector<8x64xf32>
    %210 = vector.broadcast %27 : vector<1x64xf32> to vector<8x64xf32>
    %211 = arith.addf %209, %210 : vector<8x64xf32>
    %212 = arith.mulf %206, %211 : vector<8x64xf32>
    %213 = arith.addf %208, %212 : vector<8x64xf32>
    %214 = math.tanh %213 : vector<8x64xf32>
    %cst_41 = arith.constant 1.000000e+00 : f32
    %215 = vector.broadcast %cst_41 : f32 to vector<8x64xf32>
    %216 = arith.subf %215, %207 : vector<8x64xf32>
    %217 = arith.mulf %216, %214 : vector<8x64xf32>
    %218 = arith.mulf %207, %195 : vector<8x64xf32>
    %219 = arith.addf %217, %218 : vector<8x64xf32>
    %220 = vector.extract_strided_slice %51 {offsets = [56, 0], sizes = [8, 192], strides = [1, 1]} : vector<64x192xf32> to vector<8x192xf32>
    %cst_42 = arith.constant dense<0.000000e+00> : vector<8x192xf32>
    %221 = tpu.matmul %219, %23, %cst_42 {dimension_numbers = #tpu.dot_dimension_numbers<[1], [0], [0], [1], [0, 0, 1, 1], [], []>} : vector<8x64xf32>, vector<64x192xf32>, vector<8x192xf32> -> vector<8x192xf32>
    %222 = vector.extract_strided_slice %220 {offsets = [0, 0], sizes = [8, 128], strides = [1, 1]} : vector<8x192xf32> to vector<8x128xf32>
    %223 = vector.extract_strided_slice %221 {offsets = [0, 0], sizes = [8, 128], strides = [1, 1]} : vector<8x192xf32> to vector<8x128xf32>
    %224 = arith.addf %222, %223 : vector<8x128xf32>
    %225 = arith.negf %224 : vector<8x128xf32>
    %226 = math.exp %225 : vector<8x128xf32>
    %cst_43 = arith.constant 1.000000e+00 : f32
    %227 = vector.broadcast %cst_43 : f32 to vector<8x128xf32>
    %228 = arith.addf %227, %226 : vector<8x128xf32>
    %229 = arith.divf %227, %228 : vector<8x128xf32>
    %230 = vector.extract_strided_slice %229 {offsets = [0, 0], sizes = [8, 64], strides = [1, 1]} : vector<8x128xf32> to vector<8x64xf32>
    %231 = vector.extract_strided_slice %229 {offsets = [0, 64], sizes = [8, 64], strides = [1, 1]} : vector<8x128xf32> to vector<8x64xf32>
    %232 = vector.extract_strided_slice %220 {offsets = [0, 128], sizes = [8, 64], strides = [1, 1]} : vector<8x192xf32> to vector<8x64xf32>
    %233 = vector.extract_strided_slice %221 {offsets = [0, 128], sizes = [8, 64], strides = [1, 1]} : vector<8x192xf32> to vector<8x64xf32>
    %234 = vector.broadcast %27 : vector<1x64xf32> to vector<8x64xf32>
    %235 = arith.addf %233, %234 : vector<8x64xf32>
    %236 = arith.mulf %230, %235 : vector<8x64xf32>
    %237 = arith.addf %232, %236 : vector<8x64xf32>
    %238 = math.tanh %237 : vector<8x64xf32>
    %cst_44 = arith.constant 1.000000e+00 : f32
    %239 = vector.broadcast %cst_44 : f32 to vector<8x64xf32>
    %240 = arith.subf %239, %231 : vector<8x64xf32>
    %241 = arith.mulf %240, %238 : vector<8x64xf32>
    %242 = arith.mulf %231, %219 : vector<8x64xf32>
    %243 = arith.addf %241, %242 : vector<8x64xf32>
    %c0_45 = arith.constant 0 : index
    %c0_46 = arith.constant 0 : index
    %244 = vector.load %arg6[%c0_45, %c0_46] : memref<64x16xf32, #tpu.memory_space<vmem>>, vector<64x16xf32>
    %cst_47 = arith.constant dense<0.000000e+00> : vector<8x16xf32>
    %245 = tpu.matmul %243, %244, %cst_47 {dimension_numbers = #tpu.dot_dimension_numbers<[1], [0], [0], [1], [0, 0, 1, 1], [], []>} : vector<8x64xf32>, vector<64x16xf32>, vector<8x16xf32> -> vector<8x16xf32>
    %246 = vector.broadcast %30 : vector<1x16xf32> to vector<8x16xf32>
    %247 = arith.addf %245, %246 : vector<8x16xf32>
    %248 = vector.extract_strided_slice %247 {offsets = [0, 0], sizes = [8, 8], strides = [1, 1]} : vector<8x16xf32> to vector<8x8xf32>
    %249 = vector.extract_strided_slice %247 {offsets = [0, 8], sizes = [8, 8], strides = [1, 1]} : vector<8x16xf32> to vector<8x8xf32>
    %c0_48 = arith.constant 0 : index
    %c0_49 = arith.constant 0 : index
    %250 = vector.load %arg2[%c0_48, %c0_49] : memref<8x8xf32, #tpu.memory_space<vmem>>, vector<8x8xf32>
    %cst_50 = arith.constant 1.000000e-01 : f32
    %251 = vector.broadcast %cst_50 : f32 to vector<8x8xf32>
    %252 = arith.mulf %251, %249 : vector<8x8xf32>
    %253 = math.exp %252 : vector<8x8xf32>
    %254 = arith.mulf %250, %253 : vector<8x8xf32>
    %255 = arith.addf %254, %248 : vector<8x8xf32>
    %c0_51 = arith.constant 0 : index
    %c0_52 = arith.constant 0 : index
    %256 = vector.load %arg7[%c0_51, %c0_52] : memref<8x64xf32, #tpu.memory_space<vmem>>, vector<8x64xf32>
    %cst_53 = arith.constant dense<0.000000e+00> : vector<8x64xf32>
    %257 = tpu.matmul %255, %256, %cst_53 {dimension_numbers = #tpu.dot_dimension_numbers<[1], [0], [0], [1], [0, 0, 1, 1], [], []>} : vector<8x8xf32>, vector<8x64xf32>, vector<8x64xf32> -> vector<8x64xf32>
    %258 = vector.broadcast %31 : vector<1x64xf32> to vector<8x64xf32>
    %259 = arith.addf %257, %258 : vector<8x64xf32>
    %c0_54 = arith.constant 0 : index
    %c0_55 = arith.constant 0 : index
    %c0_56 = arith.constant 0 : index
    %260 = vector.load %arg3[%c0_54, %c0_55, %c0_56] : memref<8x8x1xf32, #tpu.memory_space<vmem>>, vector<8x8x1xf32>
    %261 = vector.shape_cast %260 : vector<8x8x1xf32> to vector<64x1xf32>
    %262 = vector.broadcast %33 : vector<1x16xf32> to vector<64x16xf32>
    %263 = arith.subf %262, %35 : vector<64x16xf32>
    %264 = vector.broadcast %261 : vector<64x1xf32> to vector<64x16xf32>
    %265 = arith.mulf %264, %263 : vector<64x16xf32>
    %266 = arith.addf %35, %265 : vector<64x16xf32>
    %cst_57 = arith.constant dense<0.000000e+00> : vector<64x192xf32>
    %267 = tpu.matmul %266, %24, %cst_57 {dimension_numbers = #tpu.dot_dimension_numbers<[1], [0], [0], [1], [0, 0, 1, 1], [], []>} : vector<64x16xf32>, vector<16x192xf32>, vector<64x192xf32> -> vector<64x192xf32>
    %268 = vector.extract_strided_slice %267 {offsets = [56, 0], sizes = [8, 192], strides = [1, 1]} : vector<64x192xf32> to vector<8x192xf32>
    %269 = vector.extract_strided_slice %267 {offsets = [48, 0], sizes = [8, 192], strides = [1, 1]} : vector<64x192xf32> to vector<8x192xf32>
    %270 = vector.extract_strided_slice %267 {offsets = [40, 0], sizes = [8, 192], strides = [1, 1]} : vector<64x192xf32> to vector<8x192xf32>
    %271 = vector.extract_strided_slice %267 {offsets = [32, 0], sizes = [8, 192], strides = [1, 1]} : vector<64x192xf32> to vector<8x192xf32>
    %272 = vector.extract_strided_slice %267 {offsets = [24, 0], sizes = [8, 192], strides = [1, 1]} : vector<64x192xf32> to vector<8x192xf32>
    %273 = vector.extract_strided_slice %267 {offsets = [16, 0], sizes = [8, 192], strides = [1, 1]} : vector<64x192xf32> to vector<8x192xf32>
    %274 = vector.extract_strided_slice %267 {offsets = [8, 0], sizes = [8, 192], strides = [1, 1]} : vector<64x192xf32> to vector<8x192xf32>
    %275 = vector.extract_strided_slice %267 {offsets = [0, 0], sizes = [8, 192], strides = [1, 1]} : vector<64x192xf32> to vector<8x192xf32>
    %276 = tpu.concatenate %268, %269, %270, %271, %272, %273, %274, %275 in 0 : vector<8x192xf32>, vector<8x192xf32>, vector<8x192xf32>, vector<8x192xf32>, vector<8x192xf32>, vector<8x192xf32>, vector<8x192xf32>, vector<8x192xf32> -> vector<64x192xf32>
    %277 = vector.shape_cast %18 : vector<1x192xi1> to vector<1x192xi1>
    %278 = vector.broadcast %277 : vector<1x192xi1> to vector<64x192xi1>
    %279 = arith.select %278, %267, %276 : vector<64x192xi1>, vector<64x192xf32>
    %280 = vector.broadcast %28 : vector<1x192xf32> to vector<64x192xf32>
    %281 = arith.addf %279, %280 : vector<64x192xf32>
    %282 = vector.extract_strided_slice %281 {offsets = [0, 0], sizes = [8, 192], strides = [1, 1]} : vector<64x192xf32> to vector<8x192xf32>
    %cst_58 = arith.constant dense<0.000000e+00> : vector<8x192xf32>
    %283 = tpu.matmul %259, %25, %cst_58 {dimension_numbers = #tpu.dot_dimension_numbers<[1], [0], [0], [1], [0, 0, 1, 1], [], []>} : vector<8x64xf32>, vector<64x192xf32>, vector<8x192xf32> -> vector<8x192xf32>
    %284 = vector.extract_strided_slice %282 {offsets = [0, 0], sizes = [8, 128], strides = [1, 1]} : vector<8x192xf32> to vector<8x128xf32>
    %285 = vector.extract_strided_slice %283 {offsets = [0, 0], sizes = [8, 128], strides = [1, 1]} : vector<8x192xf32> to vector<8x128xf32>
    %286 = arith.addf %284, %285 : vector<8x128xf32>
    %287 = arith.negf %286 : vector<8x128xf32>
    %288 = math.exp %287 : vector<8x128xf32>
    %cst_59 = arith.constant 1.000000e+00 : f32
    %289 = vector.broadcast %cst_59 : f32 to vector<8x128xf32>
    %290 = arith.addf %289, %288 : vector<8x128xf32>
    %291 = arith.divf %289, %290 : vector<8x128xf32>
    %292 = vector.extract_strided_slice %291 {offsets = [0, 0], sizes = [8, 64], strides = [1, 1]} : vector<8x128xf32> to vector<8x64xf32>
    %293 = vector.extract_strided_slice %291 {offsets = [0, 64], sizes = [8, 64], strides = [1, 1]} : vector<8x128xf32> to vector<8x64xf32>
    %294 = vector.extract_strided_slice %282 {offsets = [0, 128], sizes = [8, 64], strides = [1, 1]} : vector<8x192xf32> to vector<8x64xf32>
    %295 = vector.extract_strided_slice %283 {offsets = [0, 128], sizes = [8, 64], strides = [1, 1]} : vector<8x192xf32> to vector<8x64xf32>
    %296 = vector.broadcast %29 : vector<1x64xf32> to vector<8x64xf32>
    %297 = arith.addf %295, %296 : vector<8x64xf32>
    %298 = arith.mulf %292, %297 : vector<8x64xf32>
    %299 = arith.addf %294, %298 : vector<8x64xf32>
    %300 = math.tanh %299 : vector<8x64xf32>
    %cst_60 = arith.constant 1.000000e+00 : f32
    %301 = vector.broadcast %cst_60 : f32 to vector<8x64xf32>
    %302 = arith.subf %301, %293 : vector<8x64xf32>
    %303 = arith.mulf %302, %300 : vector<8x64xf32>
    %304 = arith.mulf %293, %259 : vector<8x64xf32>
    %305 = arith.addf %303, %304 : vector<8x64xf32>
    %306 = vector.extract_strided_slice %281 {offsets = [8, 0], sizes = [8, 192], strides = [1, 1]} : vector<64x192xf32> to vector<8x192xf32>
    %cst_61 = arith.constant dense<0.000000e+00> : vector<8x192xf32>
    %307 = tpu.matmul %305, %25, %cst_61 {dimension_numbers = #tpu.dot_dimension_numbers<[1], [0], [0], [1], [0, 0, 1, 1], [], []>} : vector<8x64xf32>, vector<64x192xf32>, vector<8x192xf32> -> vector<8x192xf32>
    %308 = vector.extract_strided_slice %306 {offsets = [0, 0], sizes = [8, 128], strides = [1, 1]} : vector<8x192xf32> to vector<8x128xf32>
    %309 = vector.extract_strided_slice %307 {offsets = [0, 0], sizes = [8, 128], strides = [1, 1]} : vector<8x192xf32> to vector<8x128xf32>
    %310 = arith.addf %308, %309 : vector<8x128xf32>
    %311 = arith.negf %310 : vector<8x128xf32>
    %312 = math.exp %311 : vector<8x128xf32>
    %cst_62 = arith.constant 1.000000e+00 : f32
    %313 = vector.broadcast %cst_62 : f32 to vector<8x128xf32>
    %314 = arith.addf %313, %312 : vector<8x128xf32>
    %315 = arith.divf %313, %314 : vector<8x128xf32>
    %316 = vector.extract_strided_slice %315 {offsets = [0, 0], sizes = [8, 64], strides = [1, 1]} : vector<8x128xf32> to vector<8x64xf32>
    %317 = vector.extract_strided_slice %315 {offsets = [0, 64], sizes = [8, 64], strides = [1, 1]} : vector<8x128xf32> to vector<8x64xf32>
    %318 = vector.extract_strided_slice %306 {offsets = [0, 128], sizes = [8, 64], strides = [1, 1]} : vector<8x192xf32> to vector<8x64xf32>
    %319 = vector.extract_strided_slice %307 {offsets = [0, 128], sizes = [8, 64], strides = [1, 1]} : vector<8x192xf32> to vector<8x64xf32>
    %320 = vector.broadcast %29 : vector<1x64xf32> to vector<8x64xf32>
    %321 = arith.addf %319, %320 : vector<8x64xf32>
    %322 = arith.mulf %316, %321 : vector<8x64xf32>
    %323 = arith.addf %318, %322 : vector<8x64xf32>
    %324 = math.tanh %323 : vector<8x64xf32>
    %cst_63 = arith.constant 1.000000e+00 : f32
    %325 = vector.broadcast %cst_63 : f32 to vector<8x64xf32>
    %326 = arith.subf %325, %317 : vector<8x64xf32>
    %327 = arith.mulf %326, %324 : vector<8x64xf32>
    %328 = arith.mulf %317, %305 : vector<8x64xf32>
    %329 = arith.addf %327, %328 : vector<8x64xf32>
    %330 = vector.extract_strided_slice %281 {offsets = [16, 0], sizes = [8, 192], strides = [1, 1]} : vector<64x192xf32> to vector<8x192xf32>
    %cst_64 = arith.constant dense<0.000000e+00> : vector<8x192xf32>
    %331 = tpu.matmul %329, %25, %cst_64 {dimension_numbers = #tpu.dot_dimension_numbers<[1], [0], [0], [1], [0, 0, 1, 1], [], []>} : vector<8x64xf32>, vector<64x192xf32>, vector<8x192xf32> -> vector<8x192xf32>
    %332 = vector.extract_strided_slice %330 {offsets = [0, 0], sizes = [8, 128], strides = [1, 1]} : vector<8x192xf32> to vector<8x128xf32>
    %333 = vector.extract_strided_slice %331 {offsets = [0, 0], sizes = [8, 128], strides = [1, 1]} : vector<8x192xf32> to vector<8x128xf32>
    %334 = arith.addf %332, %333 : vector<8x128xf32>
    %335 = arith.negf %334 : vector<8x128xf32>
    %336 = math.exp %335 : vector<8x128xf32>
    %cst_65 = arith.constant 1.000000e+00 : f32
    %337 = vector.broadcast %cst_65 : f32 to vector<8x128xf32>
    %338 = arith.addf %337, %336 : vector<8x128xf32>
    %339 = arith.divf %337, %338 : vector<8x128xf32>
    %340 = vector.extract_strided_slice %339 {offsets = [0, 0], sizes = [8, 64], strides = [1, 1]} : vector<8x128xf32> to vector<8x64xf32>
    %341 = vector.extract_strided_slice %339 {offsets = [0, 64], sizes = [8, 64], strides = [1, 1]} : vector<8x128xf32> to vector<8x64xf32>
    %342 = vector.extract_strided_slice %330 {offsets = [0, 128], sizes = [8, 64], strides = [1, 1]} : vector<8x192xf32> to vector<8x64xf32>
    %343 = vector.extract_strided_slice %331 {offsets = [0, 128], sizes = [8, 64], strides = [1, 1]} : vector<8x192xf32> to vector<8x64xf32>
    %344 = vector.broadcast %29 : vector<1x64xf32> to vector<8x64xf32>
    %345 = arith.addf %343, %344 : vector<8x64xf32>
    %346 = arith.mulf %340, %345 : vector<8x64xf32>
    %347 = arith.addf %342, %346 : vector<8x64xf32>
    %348 = math.tanh %347 : vector<8x64xf32>
    %cst_66 = arith.constant 1.000000e+00 : f32
    %349 = vector.broadcast %cst_66 : f32 to vector<8x64xf32>
    %350 = arith.subf %349, %341 : vector<8x64xf32>
    %351 = arith.mulf %350, %348 : vector<8x64xf32>
    %352 = arith.mulf %341, %329 : vector<8x64xf32>
    %353 = arith.addf %351, %352 : vector<8x64xf32>
    %354 = vector.extract_strided_slice %281 {offsets = [24, 0], sizes = [8, 192], strides = [1, 1]} : vector<64x192xf32> to vector<8x192xf32>
    %cst_67 = arith.constant dense<0.000000e+00> : vector<8x192xf32>
    %355 = tpu.matmul %353, %25, %cst_67 {dimension_numbers = #tpu.dot_dimension_numbers<[1], [0], [0], [1], [0, 0, 1, 1], [], []>} : vector<8x64xf32>, vector<64x192xf32>, vector<8x192xf32> -> vector<8x192xf32>
    %356 = vector.extract_strided_slice %354 {offsets = [0, 0], sizes = [8, 128], strides = [1, 1]} : vector<8x192xf32> to vector<8x128xf32>
    %357 = vector.extract_strided_slice %355 {offsets = [0, 0], sizes = [8, 128], strides = [1, 1]} : vector<8x192xf32> to vector<8x128xf32>
    %358 = arith.addf %356, %357 : vector<8x128xf32>
    %359 = arith.negf %358 : vector<8x128xf32>
    %360 = math.exp %359 : vector<8x128xf32>
    %cst_68 = arith.constant 1.000000e+00 : f32
    %361 = vector.broadcast %cst_68 : f32 to vector<8x128xf32>
    %362 = arith.addf %361, %360 : vector<8x128xf32>
    %363 = arith.divf %361, %362 : vector<8x128xf32>
    %364 = vector.extract_strided_slice %363 {offsets = [0, 0], sizes = [8, 64], strides = [1, 1]} : vector<8x128xf32> to vector<8x64xf32>
    %365 = vector.extract_strided_slice %363 {offsets = [0, 64], sizes = [8, 64], strides = [1, 1]} : vector<8x128xf32> to vector<8x64xf32>
    %366 = vector.extract_strided_slice %354 {offsets = [0, 128], sizes = [8, 64], strides = [1, 1]} : vector<8x192xf32> to vector<8x64xf32>
    %367 = vector.extract_strided_slice %355 {offsets = [0, 128], sizes = [8, 64], strides = [1, 1]} : vector<8x192xf32> to vector<8x64xf32>
    %368 = vector.broadcast %29 : vector<1x64xf32> to vector<8x64xf32>
    %369 = arith.addf %367, %368 : vector<8x64xf32>
    %370 = arith.mulf %364, %369 : vector<8x64xf32>
    %371 = arith.addf %366, %370 : vector<8x64xf32>
    %372 = math.tanh %371 : vector<8x64xf32>
    %cst_69 = arith.constant 1.000000e+00 : f32
    %373 = vector.broadcast %cst_69 : f32 to vector<8x64xf32>
    %374 = arith.subf %373, %365 : vector<8x64xf32>
    %375 = arith.mulf %374, %372 : vector<8x64xf32>
    %376 = arith.mulf %365, %353 : vector<8x64xf32>
    %377 = arith.addf %375, %376 : vector<8x64xf32>
    %378 = vector.extract_strided_slice %281 {offsets = [32, 0], sizes = [8, 192], strides = [1, 1]} : vector<64x192xf32> to vector<8x192xf32>
    %cst_70 = arith.constant dense<0.000000e+00> : vector<8x192xf32>
    %379 = tpu.matmul %377, %25, %cst_70 {dimension_numbers = #tpu.dot_dimension_numbers<[1], [0], [0], [1], [0, 0, 1, 1], [], []>} : vector<8x64xf32>, vector<64x192xf32>, vector<8x192xf32> -> vector<8x192xf32>
    %380 = vector.extract_strided_slice %378 {offsets = [0, 0], sizes = [8, 128], strides = [1, 1]} : vector<8x192xf32> to vector<8x128xf32>
    %381 = vector.extract_strided_slice %379 {offsets = [0, 0], sizes = [8, 128], strides = [1, 1]} : vector<8x192xf32> to vector<8x128xf32>
    %382 = arith.addf %380, %381 : vector<8x128xf32>
    %383 = arith.negf %382 : vector<8x128xf32>
    %384 = math.exp %383 : vector<8x128xf32>
    %cst_71 = arith.constant 1.000000e+00 : f32
    %385 = vector.broadcast %cst_71 : f32 to vector<8x128xf32>
    %386 = arith.addf %385, %384 : vector<8x128xf32>
    %387 = arith.divf %385, %386 : vector<8x128xf32>
    %388 = vector.extract_strided_slice %387 {offsets = [0, 0], sizes = [8, 64], strides = [1, 1]} : vector<8x128xf32> to vector<8x64xf32>
    %389 = vector.extract_strided_slice %387 {offsets = [0, 64], sizes = [8, 64], strides = [1, 1]} : vector<8x128xf32> to vector<8x64xf32>
    %390 = vector.extract_strided_slice %378 {offsets = [0, 128], sizes = [8, 64], strides = [1, 1]} : vector<8x192xf32> to vector<8x64xf32>
    %391 = vector.extract_strided_slice %379 {offsets = [0, 128], sizes = [8, 64], strides = [1, 1]} : vector<8x192xf32> to vector<8x64xf32>
    %392 = vector.broadcast %29 : vector<1x64xf32> to vector<8x64xf32>
    %393 = arith.addf %391, %392 : vector<8x64xf32>
    %394 = arith.mulf %388, %393 : vector<8x64xf32>
    %395 = arith.addf %390, %394 : vector<8x64xf32>
    %396 = math.tanh %395 : vector<8x64xf32>
    %cst_72 = arith.constant 1.000000e+00 : f32
    %397 = vector.broadcast %cst_72 : f32 to vector<8x64xf32>
    %398 = arith.subf %397, %389 : vector<8x64xf32>
    %399 = arith.mulf %398, %396 : vector<8x64xf32>
    %400 = arith.mulf %389, %377 : vector<8x64xf32>
    %401 = arith.addf %399, %400 : vector<8x64xf32>
    %402 = vector.extract_strided_slice %281 {offsets = [40, 0], sizes = [8, 192], strides = [1, 1]} : vector<64x192xf32> to vector<8x192xf32>
    %cst_73 = arith.constant dense<0.000000e+00> : vector<8x192xf32>
    %403 = tpu.matmul %401, %25, %cst_73 {dimension_numbers = #tpu.dot_dimension_numbers<[1], [0], [0], [1], [0, 0, 1, 1], [], []>} : vector<8x64xf32>, vector<64x192xf32>, vector<8x192xf32> -> vector<8x192xf32>
    %404 = vector.extract_strided_slice %402 {offsets = [0, 0], sizes = [8, 128], strides = [1, 1]} : vector<8x192xf32> to vector<8x128xf32>
    %405 = vector.extract_strided_slice %403 {offsets = [0, 0], sizes = [8, 128], strides = [1, 1]} : vector<8x192xf32> to vector<8x128xf32>
    %406 = arith.addf %404, %405 : vector<8x128xf32>
    %407 = arith.negf %406 : vector<8x128xf32>
    %408 = math.exp %407 : vector<8x128xf32>
    %cst_74 = arith.constant 1.000000e+00 : f32
    %409 = vector.broadcast %cst_74 : f32 to vector<8x128xf32>
    %410 = arith.addf %409, %408 : vector<8x128xf32>
    %411 = arith.divf %409, %410 : vector<8x128xf32>
    %412 = vector.extract_strided_slice %411 {offsets = [0, 0], sizes = [8, 64], strides = [1, 1]} : vector<8x128xf32> to vector<8x64xf32>
    %413 = vector.extract_strided_slice %411 {offsets = [0, 64], sizes = [8, 64], strides = [1, 1]} : vector<8x128xf32> to vector<8x64xf32>
    %414 = vector.extract_strided_slice %402 {offsets = [0, 128], sizes = [8, 64], strides = [1, 1]} : vector<8x192xf32> to vector<8x64xf32>
    %415 = vector.extract_strided_slice %403 {offsets = [0, 128], sizes = [8, 64], strides = [1, 1]} : vector<8x192xf32> to vector<8x64xf32>
    %416 = vector.broadcast %29 : vector<1x64xf32> to vector<8x64xf32>
    %417 = arith.addf %415, %416 : vector<8x64xf32>
    %418 = arith.mulf %412, %417 : vector<8x64xf32>
    %419 = arith.addf %414, %418 : vector<8x64xf32>
    %420 = math.tanh %419 : vector<8x64xf32>
    %cst_75 = arith.constant 1.000000e+00 : f32
    %421 = vector.broadcast %cst_75 : f32 to vector<8x64xf32>
    %422 = arith.subf %421, %413 : vector<8x64xf32>
    %423 = arith.mulf %422, %420 : vector<8x64xf32>
    %424 = arith.mulf %413, %401 : vector<8x64xf32>
    %425 = arith.addf %423, %424 : vector<8x64xf32>
    %426 = vector.extract_strided_slice %281 {offsets = [48, 0], sizes = [8, 192], strides = [1, 1]} : vector<64x192xf32> to vector<8x192xf32>
    %cst_76 = arith.constant dense<0.000000e+00> : vector<8x192xf32>
    %427 = tpu.matmul %425, %25, %cst_76 {dimension_numbers = #tpu.dot_dimension_numbers<[1], [0], [0], [1], [0, 0, 1, 1], [], []>} : vector<8x64xf32>, vector<64x192xf32>, vector<8x192xf32> -> vector<8x192xf32>
    %428 = vector.extract_strided_slice %426 {offsets = [0, 0], sizes = [8, 128], strides = [1, 1]} : vector<8x192xf32> to vector<8x128xf32>
    %429 = vector.extract_strided_slice %427 {offsets = [0, 0], sizes = [8, 128], strides = [1, 1]} : vector<8x192xf32> to vector<8x128xf32>
    %430 = arith.addf %428, %429 : vector<8x128xf32>
    %431 = arith.negf %430 : vector<8x128xf32>
    %432 = math.exp %431 : vector<8x128xf32>
    %cst_77 = arith.constant 1.000000e+00 : f32
    %433 = vector.broadcast %cst_77 : f32 to vector<8x128xf32>
    %434 = arith.addf %433, %432 : vector<8x128xf32>
    %435 = arith.divf %433, %434 : vector<8x128xf32>
    %436 = vector.extract_strided_slice %435 {offsets = [0, 0], sizes = [8, 64], strides = [1, 1]} : vector<8x128xf32> to vector<8x64xf32>
    %437 = vector.extract_strided_slice %435 {offsets = [0, 64], sizes = [8, 64], strides = [1, 1]} : vector<8x128xf32> to vector<8x64xf32>
    %438 = vector.extract_strided_slice %426 {offsets = [0, 128], sizes = [8, 64], strides = [1, 1]} : vector<8x192xf32> to vector<8x64xf32>
    %439 = vector.extract_strided_slice %427 {offsets = [0, 128], sizes = [8, 64], strides = [1, 1]} : vector<8x192xf32> to vector<8x64xf32>
    %440 = vector.broadcast %29 : vector<1x64xf32> to vector<8x64xf32>
    %441 = arith.addf %439, %440 : vector<8x64xf32>
    %442 = arith.mulf %436, %441 : vector<8x64xf32>
    %443 = arith.addf %438, %442 : vector<8x64xf32>
    %444 = math.tanh %443 : vector<8x64xf32>
    %cst_78 = arith.constant 1.000000e+00 : f32
    %445 = vector.broadcast %cst_78 : f32 to vector<8x64xf32>
    %446 = arith.subf %445, %437 : vector<8x64xf32>
    %447 = arith.mulf %446, %444 : vector<8x64xf32>
    %448 = arith.mulf %437, %425 : vector<8x64xf32>
    %449 = arith.addf %447, %448 : vector<8x64xf32>
    %450 = vector.extract_strided_slice %281 {offsets = [56, 0], sizes = [8, 192], strides = [1, 1]} : vector<64x192xf32> to vector<8x192xf32>
    %cst_79 = arith.constant dense<0.000000e+00> : vector<8x192xf32>
    %451 = tpu.matmul %449, %25, %cst_79 {dimension_numbers = #tpu.dot_dimension_numbers<[1], [0], [0], [1], [0, 0, 1, 1], [], []>} : vector<8x64xf32>, vector<64x192xf32>, vector<8x192xf32> -> vector<8x192xf32>
    %452 = vector.extract_strided_slice %450 {offsets = [0, 0], sizes = [8, 128], strides = [1, 1]} : vector<8x192xf32> to vector<8x128xf32>
    %453 = vector.extract_strided_slice %451 {offsets = [0, 0], sizes = [8, 128], strides = [1, 1]} : vector<8x192xf32> to vector<8x128xf32>
    %454 = arith.addf %452, %453 : vector<8x128xf32>
    %455 = arith.negf %454 : vector<8x128xf32>
    %456 = math.exp %455 : vector<8x128xf32>
    %cst_80 = arith.constant 1.000000e+00 : f32
    %457 = vector.broadcast %cst_80 : f32 to vector<8x128xf32>
    %458 = arith.addf %457, %456 : vector<8x128xf32>
    %459 = arith.divf %457, %458 : vector<8x128xf32>
    %460 = vector.extract_strided_slice %459 {offsets = [0, 0], sizes = [8, 64], strides = [1, 1]} : vector<8x128xf32> to vector<8x64xf32>
    %461 = vector.extract_strided_slice %459 {offsets = [0, 64], sizes = [8, 64], strides = [1, 1]} : vector<8x128xf32> to vector<8x64xf32>
    %462 = vector.extract_strided_slice %450 {offsets = [0, 128], sizes = [8, 64], strides = [1, 1]} : vector<8x192xf32> to vector<8x64xf32>
    %463 = vector.extract_strided_slice %451 {offsets = [0, 128], sizes = [8, 64], strides = [1, 1]} : vector<8x192xf32> to vector<8x64xf32>
    %464 = vector.broadcast %29 : vector<1x64xf32> to vector<8x64xf32>
    %465 = arith.addf %463, %464 : vector<8x64xf32>
    %466 = arith.mulf %460, %465 : vector<8x64xf32>
    %467 = arith.addf %462, %466 : vector<8x64xf32>
    %468 = math.tanh %467 : vector<8x64xf32>
    %cst_81 = arith.constant 1.000000e+00 : f32
    %469 = vector.broadcast %cst_81 : f32 to vector<8x64xf32>
    %470 = arith.subf %469, %461 : vector<8x64xf32>
    %471 = arith.mulf %470, %468 : vector<8x64xf32>
    %472 = arith.mulf %461, %449 : vector<8x64xf32>
    %473 = arith.addf %471, %472 : vector<8x64xf32>
    %474 = tpu.concatenate %305, %329, %353, %377, %401, %425, %449, %473 in 0 : vector<8x64xf32>, vector<8x64xf32>, vector<8x64xf32>, vector<8x64xf32>, vector<8x64xf32>, vector<8x64xf32>, vector<8x64xf32>, vector<8x64xf32> -> vector<64x64xf32>
    %475 = tpu.concatenate %473, %449, %425, %401, %377, %353, %329, %305 in 0 : vector<8x64xf32>, vector<8x64xf32>, vector<8x64xf32>, vector<8x64xf32>, vector<8x64xf32>, vector<8x64xf32>, vector<8x64xf32>, vector<8x64xf32> -> vector<64x64xf32>
    %476 = vector.shape_cast %21 : vector<1x64xi1> to vector<1x64xi1>
    %477 = vector.broadcast %476 : vector<1x64xi1> to vector<64x64xi1>
    %478 = arith.select %477, %474, %475 : vector<64x64xi1>, vector<64x64xf32>
    %c0_82 = arith.constant 0 : index
    %c0_83 = arith.constant 0 : index
    %479 = vector.load %arg8[%c0_82, %c0_83] : memref<64x16xf32, #tpu.memory_space<vmem>>, vector<64x16xf32>
    %cst_84 = arith.constant dense<0.000000e+00> : vector<64x16xf32>
    %480 = tpu.matmul %478, %479, %cst_84 {dimension_numbers = #tpu.dot_dimension_numbers<[1], [0], [0], [1], [0, 0, 1, 1], [], []>} : vector<64x64xf32>, vector<64x16xf32>, vector<64x16xf32> -> vector<64x16xf32>
    %481 = vector.broadcast %32 : vector<1x16xf32> to vector<64x16xf32>
    %482 = arith.addf %480, %481 : vector<64x16xf32>
    %483 = vector.shape_cast %482 : vector<64x16xf32> to vector<8x8x16xf32>
    %c0_85 = arith.constant 0 : index
    %c0_86 = arith.constant 0 : index
    %c0_87 = arith.constant 0 : index
    %484 = vector.load %arg9[%c0_85, %c0_86, %c0_87] : memref<8x8x16xf32, #tpu.memory_space<vmem>>, vector<8x8x16xf32>
    tpu.vector_store %arg9[%c0_85, %c0_86, %c0_87], %483 {strides = array<i32>} : memref<8x8x16xf32, #tpu.memory_space<vmem>>, vector<8x8x16xf32>,
    return
  }
  func.func @transform_0(%arg0: i32) -> (i32, i32, i32) {
    %c0_i32 = arith.constant 0 : i32
    %c0_i32_0 = arith.constant 0 : i32
    %c0_i32_1 = arith.constant 0 : i32
    return %c0_i32, %arg0, %c0_i32_0 : i32, i32, i32
  }
  func.func @transform_1(%arg0: i32) -> (i32, i32) {
    %c0_i32 = arith.constant 0 : i32
    %c0_i32_0 = arith.constant 0 : i32
    return %arg0, %c0_i32 : i32, i32
  }
  func.func @transform_2(%arg0: i32) -> (i32, i32, i32) {
    %c0_i32 = arith.constant 0 : i32
    %c0_i32_0 = arith.constant 0 : i32
    %c0_i32_1 = arith.constant 0 : i32
    return %c0_i32, %arg0, %c0_i32_0 : i32, i32, i32
  }
  func.func @transform_3(%arg0: i32) -> (i32, i32) {
    %c0_i32 = arith.constant 0 : i32
    %c0_i32_0 = arith.constant 0 : i32
    %c0_i32_1 = arith.constant 0 : i32
    return %c0_i32, %c0_i32_0 : i32, i32
  }
  func.func @transform_4(%arg0: i32) -> (i32, i32) {
    %c0_i32 = arith.constant 0 : i32
    %c0_i32_0 = arith.constant 0 : i32
    %c0_i32_1 = arith.constant 0 : i32
    return %c0_i32, %c0_i32_0 : i32, i32
  }
  func.func @transform_5(%arg0: i32) -> (i32, i32) {
    %c0_i32 = arith.constant 0 : i32
    %c0_i32_0 = arith.constant 0 : i32
    %c0_i32_1 = arith.constant 0 : i32
    return %c0_i32, %c0_i32_0 : i32, i32
  }
  func.func @transform_6(%arg0: i32) -> (i32, i32) {
    %c0_i32 = arith.constant 0 : i32
    %c0_i32_0 = arith.constant 0 : i32
    %c0_i32_1 = arith.constant 0 : i32
    return %c0_i32, %c0_i32_0 : i32, i32
  }
  func.func @transform_7(%arg0: i32) -> (i32, i32) {
    %c0_i32 = arith.constant 0 : i32
    %c0_i32_0 = arith.constant 0 : i32
    %c0_i32_1 = arith.constant 0 : i32
    return %c0_i32, %c0_i32_0 : i32, i32
  }
  func.func @transform_8(%arg0: i32) -> (i32, i32, i32) {
    %c0_i32 = arith.constant 0 : i32
    %c0_i32_0 = arith.constant 0 : i32
    %c0_i32_1 = arith.constant 0 : i32
    return %c0_i32, %arg0, %c0_i32_0 : i32, i32, i32
  }
}

</mosaic_0001>

<bundles_post_ra>
// kernel: autoencoder_forward.1
= control target key start
LH: loop header
LB: loop body
LE: loop exit
PB: predicated region body
PF: predicated region fallthrough
CT: control target
= control target key end

     0   :  { %13 = vsyncpa [#allocation5], 0  ;;  %s3845_s0 = inlined_call_operand.vmem [shape: f32[8,16,16], index: 0, kind: input, shape index: {}]   ;;  %s3846_s1 = inlined_call_operand.vmem [shape: f32[16,8], index: 1, kind: input, shape index: {}]   ;;  %s3847_s2 = inlined_call_operand.vmem [shape: f32[8,16,1], index: 2, kind: input, shape index: {}]   ;;  %s3848_s3 = inlined_call_operand.hbm [shape: f32[160,192], index: 3, kind: input, shape index: {}]   ;;  %s3849_s4 = inlined_call_operand.vmem [shape: f32[8,192], index: 4, kind: input, shape index: {}]   ;;  %s3850_s5 = inlined_call_operand.vmem [shape: f32[64,16], index: 5, kind: input, shape index: {}]   ;;  %s3851_s6 = inlined_call_operand.vmem [shape: f32[8,64], index: 6, kind: input, shape index: {}]   ;;  %s3852_s7 = inlined_call_operand.vmem [shape: f32[64,16], index: 7, kind: input, shape index: {}]   ;;  %s3853_s8 = inlined_call_operand.hbm [shape: f32[8,16,16], index: 8, kind: output, shape index: {}]  }
   0x1   :  { %14 = vsyncpa [#allocation6], 0 }
   0x2   :  { %16 = vsyncpa [#allocation6 + $0x1], 0  ;;  %s2893_s27 = smov 0   ;;  %s2895_s28 = smov 0  }
   0x3   :  { %s2897_s29 = smov 0   ;;  %s2899_s30 = smov 0  }
   0x4 LB: > { %s2914_s9 = sadd.s32 4294967295, %s2836_s30   ;;  %s2461_s10 = sadd.s32 4294967294, %s2836_s30   ;;  %s2836_s30 = sphi %s2899_s30, %s3870_s30   ;;  %s2832_s29 = sphi %s2897_s29, %s3869_s29   ;;  %s2828_s28 = sphi %s2895_s28, %s3868_s28   ;;  %s2824_s27 = sphi %s2893_s27, %s3867_s27  }
   0x5   : > { %s2918_s11 = sadd.s32 1, %s2836_s30   ;;  %s29_s12 = sadd.s32 1, %s2832_s29 }
   0x6   : > { %s26_s13 = ssub.s32 %s2836_s30, %s2918_s11  ;;  %p36_p0 = scmp.ne.s32.totalorder %s2832_s29, %s2828_s28 }
   0x7   : > { %p27_p1 = scmp.eq.s32.totalorder %s26_s13, 0  ;;  %p37_p2 = scmp.eq.s32.totalorder %s2836_s30, 0 }
   0x8   : > { %p223_p3 = scmp.eq.s32.totalorder %s2914_s9, 1  ;;  %p228_p4 = scmp.ne.s32.totalorder %s2828_s28, %s2824_s27 }
   0x9   : > { %s2930_s14 = scalar_select %p27_p1, %s2832_s29, %s29_s12  }
   0xa   : > { %p2932_p5 = por %p37_p2, %p36_p0  ;;  %p2936_p6 = por %p223_p3, %p36_p0 }
   0xb   : > { %p229_p7 = scmp.eq.s32.totalorder %s2461_s10, 1  ;;  %p2462_p8 = scmp.ge.s32.totalorder %s2836_s30, 1 }
   0xc   : > { %p236_p9 = scmp.lt.s32.totalorder %s2836_s30, 3  ;;  %p2586_p11 = scmp.eq.s32.totalorder %s2914_s9, 0 }
   0xd   : > { %p2942_p10 = por %p229_p7, %p228_p4  ;;  %s247_s21 = sshll.u32 %s3848_s3, 4  ;;  %s248_s21 = int_to_ptr.hbm [resolvable:$true] %s247_s21 }
   0xe   : > { %p2947_p12 = pnand %p2462_p8, %p236_p9  ;;  %s2838_s22 = smov [#allocation4]  }
   0xf   : > { %s249_s23 = sshll.u32 %s2838_s22, 4  ;;  %s2839_s24 = smov 256   ;;  %s250_s23 = int_to_ptr.vmem [resolvable:$true] %s249_s23 }
  0x10   : > { %p2578_p13 = pneg %p2947_p12  ;;  %s2840_s25 = smov 16  }
  0x11   : > { %p2464_p1 = scmp.ge.s32.totalorder %s2836_s30, 2 }
  0x12   : > { %p2579_p0 = pnand %p2586_p11, %p2578_p13 }
  0x13   : > { %271 = sbr.rel (%p2464_p1) target bundleno = 48 (0x30), region = 36 }
  0x14   : > { %2581 = dma.hbm_to_vmem [thread:$0]  (!%p2579_p0), %s248_s21, 5120, %s250_s23, [#allocation5], %s2839_s24, %s2839_s24, %s2840_s25  }
  0x18   : > { %274 = sbr.rel (!%p2932_p5) target bundleno = 36 (0x24), region = 40  ;;  %s276_s26 = sand.u32 (%p2932_p5), 1, %s2832_s29  }
  0x19   : > { %s2466_s10 = sshll.u32 (%p2932_p5), %s2836_s30, 3  ;;  %s2465_s12 = sshll.u32 (%p2932_p5), %s276_s26, 6 }
  0x1a   : > { %s280_s20 = scalar_lea.vmem (%p2932_p5), %s3845_s0, %s2466_s10  ;;  %s278_s21 = scalar_lea.vmem (%p2932_p5), [#allocation2], %s2465_s12 }
  0x1b   : > { %v323_v0 = vld [vmem:[%s280_s20] sm:$0xff] (%p2932_p5)  ;;  %v325_v1 = vld [vmem:[%s280_s20 + $0x10] sm:$0xff] (%p2932_p5) }
  0x1c   : > { %v327_v2 = vld [vmem:[%s280_s20 + $0x20] sm:$0xff] (%p2932_p5)  ;;  %324 = vst [vmem:[%s278_s21] sm:$0xff] (%p2932_p5), %v323_v0  ;;  %v329_v3 = vld [vmem:[%s280_s20 + $0x30] sm:$0xff] (%p2932_p5) }
  0x1d   : > { %326 = vst [vmem:[%s278_s21 + $0x8] sm:$0xff] %v325_v1  ;;  %v331_v4 = vld [vmem:[%s280_s20 + $0x40] sm:$0xff]  ;;  %v333_v5 = vld [vmem:[%s280_s20 + $0x50] sm:$0xff] }
  0x1e   : > { %328 = vst [vmem:[%s278_s21 + $0x10] sm:$0xff] %v327_v2  ;;  %v335_v6 = vld [vmem:[%s280_s20 + $0x60] sm:$0xff]  ;;  %v337_v7 = vld [vmem:[%s280_s20 + $0x70] sm:$0xff] }
  0x1f   : > { %330 = vst [vmem:[%s278_s21 + $0x18] sm:$0xff] %v329_v3 }
  0x20   : > { %332 = vst [vmem:[%s278_s21 + $0x20] sm:$0xff] %v331_v4 }
  0x21   : > { %334 = vst [vmem:[%s278_s21 + $0x28] sm:$0xff] %v333_v5 }
  0x22   : > { %336 = vst [vmem:[%s278_s21 + $0x30] sm:$0xff] %v335_v6 }
  0x23   : > { %338 = vst [vmem:[%s278_s21 + $0x38] sm:$0xff] %v337_v7 }
  0x24 PF: > { %351 = sbr.rel (!%p2932_p5) target bundleno = 48 (0x30), region = 82  ;;  %s353_s22 = sand.u32 (%p2932_p5), 1, %s2832_s29  }
  0x25   : > { %s2468_s23 = sshll.u32 (%p2932_p5), %s2836_s30, 3  ;;  %s2467_s24 = sshll.u32 (%p2932_p5), %s353_s22, 6 }
  0x26   : > { %s357_s10 = scalar_lea.vmem (%p2932_p5), %s3847_s2, %s2468_s23  ;;  %s355_s12 = scalar_lea.vmem (%p2932_p5), [#allocation3], %s2467_s24 }
  0x27   : > { %v400_v8 = vld [vmem:[%s357_s10] sm:$0xff] (%p2932_p5)  ;;  %v402_v9 = vld [vmem:[%s357_s10 + $0x10] sm:$0xff] (%p2932_p5) }
  0x28   : > { %v404_v10 = vld [vmem:[%s357_s10 + $0x20] sm:$0xff] (%p2932_p5)  ;;  %401 = vst [vmem:[%s355_s12] sm:$0xff] (%p2932_p5), %v400_v8  ;;  %v406_v11 = vld [vmem:[%s357_s10 + $0x30] sm:$0xff] (%p2932_p5) }
  0x29   : > { %403 = vst [vmem:[%s355_s12 + $0x8] sm:$0xff] %v402_v9  ;;  %v408_v12 = vld [vmem:[%s357_s10 + $0x40] sm:$0xff]  ;;  %v410_v13 = vld [vmem:[%s357_s10 + $0x50] sm:$0xff] }
  0x2a   : > { %405 = vst [vmem:[%s355_s12 + $0x10] sm:$0xff] %v404_v10  ;;  %v412_v14 = vld [vmem:[%s357_s10 + $0x60] sm:$0xff]  ;;  %v414_v15 = vld [vmem:[%s357_s10 + $0x70] sm:$0xff] }
  0x2b   : > { %407 = vst [vmem:[%s355_s12 + $0x18] sm:$0xff] %v406_v11 }
  0x2c   : > { %409 = vst [vmem:[%s355_s12 + $0x20] sm:$0xff] %v408_v12 }
  0x2d   : > { %411 = vst [vmem:[%s355_s12 + $0x28] sm:$0xff] %v410_v13 }
  0x2e   : > { %413 = vst [vmem:[%s355_s12 + $0x30] sm:$0xff] %v412_v14 }
  0x2f   : > { %415 = vst [vmem:[%s355_s12 + $0x38] sm:$0xff] %v414_v15 }
  0x30 PF: > { %424 = sbr.rel (%p2947_p12) target bundleno = 6911 (0x1aff), region = 120  ;;  %s3854_s15 = sand.u32 (!%p2947_p12), 1, %s2828_s28  }
  0x31   : > { %s2980_s13 = sshll.u32 (!%p2947_p12), %s3854_s15, 6 }
  0x32   : > { %s2983_s19 = scalar_lea.vmem (!%p2947_p12), [#allocation2], %s2980_s13  ;;  %s2986_s20 = scalar_lea.vmem (!%p2947_p12), [#allocation3], %s2980_s13 }
  0x35   : > { %2815 = dma.done.wait (%p2586_p11), [#allocation5], 5120  }
  0x36   : > { %2817 = vsyncadd (%p2586_p11), [#allocation5], 4294962176  ;;  %v516_v16 = vld [vmem:[#allocation4 + $0x10] sm:$0xff]  ;;  %v517_v17 = vld [vmem:[#allocation4 + $0x18] sm:$0xff]  ;;  %vm571_vm0 = vcmask 130048   ;;  %v2841_v41 = vmov 0.0   ;;  %v484_v47 = vlaneseq }
  0x37   : > { %v514_v18 = vld [vmem:[#allocation4] sm:$0xff]  ;;  %610 = vmatpush.msra.mxu0 %v516_v16  ;;  %2568 = vmatpush.msra.mxu2 %v517_v17  ;;  %v515_v19 = vld [vmem:[#allocation4 + $0x8] sm:$0xff]  ;;  %v565_v21 = vld [vmem:[%s2983_s19 + $0x10] sm:$0xff]  ;;  %s3855_s24 = smov 64   ;;  %vm719_vm7 = vcmask 523264   ;;  %s3865_s15 = smov 64  }
  0x38   : > { %v563_v20 = vld [vmem:[%s2983_s19] sm:$0xff]  ;;  %651 = vmatpush.msra.mxu1 %v517_v17  ;;  %2569 = vmatpush.msra.mxu3 %v517_v17  ;;  %v2994_v22 = vld [vmem:[#allocation4 + $0x90] sm:$0xff]  ;;  %v564_v26 = vld [vmem:[%s2983_s19 + $0x8] sm:$0xff]  ;;  %v3136_v49 = vand.u32 127, %v484_v47  ;;  %s2844_s26 = smov 120   ;;  %p480_p2 = scmp.lt.s32.totalorder %s2914_s9, 1 }
  0x39   : > { %611 = vmatpush.msra.mxu0 %v514_v18  ;;  %2570 = vmatpush.msra.mxu2 %v515_v19  ;;  %v2998_v23 = vld [vmem:[#allocation4 + $0x80] sm:$0xff]  ;;  %v3001_v24 = vld [vmem:[#allocation4 + $0x70] sm:$0xff]  ;;  %v566_v27 = vld [vmem:[%s2983_s19 + $0x18] sm:$0xff]  ;;  %s479_s23 = scalar_lea.vmem [#allocation7], %s2980_s13  ;;  %s2565_s13 = sshll.u32 %s2914_s9, 3 }
  0x3a   : > { %2476 = vmatmul.msk.f32.vlgmr.msra.gmra.mxu0 %vm571_vm0, %v563_v20  ;;  %2486 = vmatmul.msk.f32.vlgmr.msra.gmra.mxu2 %vm571_vm0, %v565_v21  ;;  %v3006_v25 = vld [vmem:[#allocation4 + $0x60] sm:$0xff]  ;;  %v3012_v28 = vld [vmem:[#allocation4 + $0x50] sm:$0xff]  ;;  %v3040_v34 = vld [vmem:[%s2983_s19 + $0x38] sm:$0xff]  ;;  %v486_v51 = vadd.s32 128, %v3136_v49  ;;  %v491_v63 = vand.u32 63, %v3136_v49  ;;  %s2347_s10 = scalar_lea.hbm %s3853_s8, %s2565_s13  ;;  %s2348_s12 = sshll.u32 %s479_s23, 4  ;;  %s2349_s12 = int_to_ptr.vmem [resolvable:$true] %s2348_s12 }
  0x3b   : > { %731 = vmatpush.msrb.mxu2 %v2994_v22  ;;  %652 = vmatpush.msra.mxu1 %v515_v19  ;;  %v3018_v29 = vld [vmem:[#allocation4 + $0x40] sm:$0xff]  ;;  %v3021_v30 = vld [vmem:[%s2983_s19 + $0x30] sm:$0xff]  ;;  %v568_v35 = vld [vmem:[%s2983_s19 + $0x28] sm:$0xff] }
  0x3c   : > { %2484 = vmatmul.msk.f32.vlgmr.msra.gmra.mxu1 %vm571_vm0, %v563_v20  ;;  %2571 = vmatpush.msra.mxu3 %v515_v19  ;;  %v3026_v31 = vld [vmem:[#allocation4 + $0x30] sm:$0xff]  ;;  %v567_v32 = vld [vmem:[%s2983_s19 + $0x20] sm:$0xff]  ;;  %v3055_v36 = vld [vmem:[#allocation4 + $0x98] sm:$0xff]  ;;  %v498_v53 = vand.u32 63, %v486_v51  ;;  %vm3159_vm2 = vcmp.lt.s32.totalorder %v491_v63, 32 }
  0x3d   : > { %732 = vmatpush.msrb.mxu2 %v2998_v23  ;;  %1039 = vmatpush.msrb.mxu0 %v2994_v22  ;;  %v3037_v33 = vld [vmem:[#allocation4 + $0x20] sm:$0xff]  ;;  %v3057_v37 = vld [vmem:[#allocation4 + $0x88] sm:$0xff]  ;;  %v3061_v38 = vld [vmem:[#allocation4 + $0x78] sm:$0xff] }
  0x3e   : > { %2490 = vmatmul.msk.f32.vlgmr.msra.gmra.mxu3 %vm571_vm0, %v3021_v30  ;;  %1059 = vmatpush.msrb.mxu1 %v3055_v36  ;;  %v3067_v39 = vld [vmem:[#allocation4 + $0x68] sm:$0xff]  ;;  %v3073_v40 = vld [vmem:[#allocation4 + $0x58] sm:$0xff]  ;;  %vm3142_vm1 = vcmp.lt.s32.totalorder %v498_v53, 32  ;;  %v3597_v1 = vld [vmem:[%s3849_s4 + $0x3] ss:$0 sm:$0xff] }
  0x3f   : > { %733 = vmatpush.msrb.mxu2 %v3001_v24  ;;  %1040 = vmatpush.msrb.mxu0 %v2998_v23  ;;  %v3080_v42 = vld [vmem:[#allocation4 + $0x48] sm:$0xff]  ;;  %v3084_v43 = vld [vmem:[#allocation4 + $0x38] sm:$0xff] }
  0x40   : > { %751 = vmatpush.msrb.mxu3 %v3055_v36  ;;  %1060 = vmatpush.msrb.mxu1 %v3057_v37  ;;  %v3090_v44 = vld [vmem:[#allocation4 + $0x28] sm:$0xff]  ;;  %v2262_v55 = vld [vmem:[%s3852_s7 + $0x38] sm:$0xff] }
  0x41   : > { %734 = vmatpush.msrb.mxu2 %v3006_v25  ;;  %1041 = vmatpush.msrb.mxu0 %v3001_v24  ;;  %v554_v54 = vld [vmem:[%s3849_s4] ss:$8 sm:$0x3] }
  0x42   : > { %2477 = vmatmul.msk.f32.gmra.mxu0 %vm571_vm0, %v564_v26  ;;  %2487 = vmatmul.msk.f32.gmra.mxu2 %vm571_vm0, %v566_v27  ;;  %v3146_v57 = vperm.slane %v554_v54, 1  ;;  %v699_v2 = vperm.slane %v554_v54, 0 }
  0x43   : > { %735 = vmatpush.msrb.mxu2 %v3012_v28  ;;  %1042 = vmatpush.msrb.mxu0 %v3006_v25 }
  0x44   : > { %2485 = vmatmul.msk.f32.gmra.mxu1 %vm571_vm0, %v564_v26  ;;  %752 = vmatpush.msrb.mxu3 %v3057_v37 }
  0x45   : > { %736 = vmatpush.msrb.mxu2 %v3018_v29  ;;  %1043 = vmatpush.msrb.mxu0 %v3012_v28 }
  0x46   : > { %2491 = vmatmul.msk.f32.gmra.mxu3 %vm571_vm0, %v3040_v34  ;;  %1061 = vmatpush.msrb.mxu1 %v3061_v38 }
  0x47   : > { %737 = vmatpush.msrb.mxu2 %v3026_v31  ;;  %1044 = vmatpush.msrb.mxu0 %v3018_v29 }
  0x48   : > { %753 = vmatpush.msrb.mxu3 %v3061_v38  ;;  %1062 = vmatpush.msrb.mxu1 %v3067_v39 }
  0x49   : > { %738 = vmatpush.msrb.mxu2 %v3037_v33  ;;  %1045 = vmatpush.msrb.mxu0 %v3026_v31 }
  0x4a   : > { %2478 = vmatmul.msk.f32.gmra.mxu0 %vm571_vm0, %v565_v21  ;;  %2488 = vmatmul.msk.f32.gmra.mxu2 %vm571_vm0, %v567_v32 }
  0x4b   : > { %808 = vmatpush.msra.mxu2 %v2994_v22  ;;  %1046 = vmatpush.msrb.mxu0 %v3037_v33 }
  0x4c   : > { %754 = vmatpush.msrb.mxu3 %v3067_v39  ;;  %1063 = vmatpush.msrb.mxu1 %v3073_v40 }
  0x4d   : > { %809 = vmatpush.msra.mxu2 %v2998_v23  ;;  %1193 = vmatpush.msra.mxu0 %v2994_v22 }
  0x4e   : > { %755 = vmatpush.msrb.mxu3 %v3073_v40  ;;  %1064 = vmatpush.msrb.mxu1 %v3080_v42 }
  0x4f   : > { %810 = vmatpush.msra.mxu2 %v3001_v24  ;;  %1194 = vmatpush.msra.mxu0 %v2998_v23 }
  0x50   : > { %756 = vmatpush.msrb.mxu3 %v3080_v42  ;;  %1065 = vmatpush.msrb.mxu1 %v3084_v43 }
  0x51   : > { %811 = vmatpush.msra.mxu2 %v3006_v25  ;;  %1195 = vmatpush.msra.mxu0 %v3001_v24 }
  0x52   : > { %2479 = vmatmul.msk.f32.gmra.mxu0 %vm571_vm0, %v566_v27  ;;  %2489 = vmatmul.msk.f32.gmra.mxu2 %vm571_vm0, %v568_v35 }
  0x53   : > { %812 = vmatpush.msra.mxu2 %v3012_v28  ;;  %1196 = vmatpush.msra.mxu0 %v3006_v25 }
  0x54   : > { %757 = vmatpush.msrb.mxu3 %v3084_v43  ;;  %1066 = vmatpush.msrb.mxu1 %v3090_v44 }
  0x55   : > { %813 = vmatpush.msra.mxu2 %v3018_v29  ;;  %1197 = vmatpush.msra.mxu0 %v3012_v28 }
  0x56   : > { %758 = vmatpush.msrb.mxu3 %v3090_v44  ;;  %1213 = vmatpush.msra.mxu1 %v3055_v36 }
  0x57   : > { %814 = vmatpush.msra.mxu2 %v3026_v31  ;;  %1198 = vmatpush.msra.mxu0 %v3018_v29 }
  0x58   : > { %759 = vmatmul.f32.vlgmr.msrb.gmra.mxu3 %v2841_v41  ;;  %1214 = vmatpush.msra.mxu1 %v3057_v37 }
  0x59   : > { %815 = vmatpush.msra.mxu2 %v3037_v33  ;;  %1199 = vmatpush.msra.mxu0 %v3026_v31 }
  0x5a   : > { %2480 = vmatmul.msk.f32.gmra.mxu0 %vm571_vm0, %v567_v32  ;;  %739 = vmatmul.f32.vlgmr.msrb.gmra.mxu2 %v2841_v41 }
  0x5b   : > { %885 = vmatpush.msrb.mxu2 %v2994_v22  ;;  %1200 = vmatpush.msra.mxu0 %v3037_v33 }
  0x5c   : > { %828 = vmatpush.msra.mxu3 %v3055_v36  ;;  %1215 = vmatpush.msra.mxu1 %v3061_v38 }
  0x5d   : > { %886 = vmatpush.msrb.mxu2 %v2998_v23 }
  0x5e   : > { %829 = vmatpush.msra.mxu3 %v3057_v37  ;;  %1216 = vmatpush.msra.mxu1 %v3067_v39 }
  0x5f   : > { %887 = vmatpush.msrb.mxu2 %v3001_v24 }
  0x60   : > { %830 = vmatpush.msra.mxu3 %v3061_v38  ;;  %1217 = vmatpush.msra.mxu1 %v3073_v40 }
  0x61   : > { %888 = vmatpush.msrb.mxu2 %v3006_v25 }
  0x62   : > { %2481 = vmatmul.msk.f32.gmra.mxu0 %vm571_vm0, %v568_v35  ;;  %831 = vmatpush.msra.mxu3 %v3067_v39 }
  0x63   : > { %889 = vmatpush.msrb.mxu2 %v3012_v28  ;;  %1218 = vmatpush.msra.mxu1 %v3080_v42 }
  0x64   : > { %832 = vmatpush.msra.mxu3 %v3073_v40 }
  0x65   : > { %890 = vmatpush.msrb.mxu2 %v3018_v29  ;;  %1219 = vmatpush.msra.mxu1 %v3084_v43 }
  0x66   : > { %833 = vmatpush.msra.mxu3 %v3080_v42 }
  0x67   : > { %891 = vmatpush.msrb.mxu2 %v3026_v31  ;;  %1220 = vmatpush.msra.mxu1 %v3090_v44 }
  0x68   : > { %834 = vmatpush.msra.mxu3 %v3084_v43 }
  0x69   : > { %892 = vmatpush.msrb.mxu2 %v3037_v33 }
  0x6a   : > { %2482 = vmatmul.msk.f32.gmra.mxu0 %vm571_vm0, %v3021_v30  ;;  %835 = vmatpush.msra.mxu3 %v3090_v44 }
  0x6c   : > { %905 = vmatpush.msrb.mxu3 %v3055_v36 }
  0x6e   : > { %906 = vmatpush.msrb.mxu3 %v3057_v37 }
  0x70   : > { %907 = vmatpush.msrb.mxu3 %v3061_v38 }
  0x72   : > { %2483 = vmatmul.msk.f32.gmra.mxu0 %vm571_vm0, %v3040_v34  ;;  %908 = vmatpush.msrb.mxu3 %v3067_v39 }
  0x74   : > { %909 = vmatpush.msrb.mxu3 %v3073_v40 }
  0x76   : > { %910 = vmatpush.msrb.mxu3 %v3080_v42 }
  0x78   : > { %911 = vmatpush.msrb.mxu3 %v3084_v43 }
  0x7a   : > { %912 = vmatpush.msrb.mxu3 %v3090_v44 }
  0xb7   : > { %v613_v45 = vpop.f32.mrf.mxu0 }
  0xb9   : > { %v654_v5 = vpop.f32.mrf.mxu1 }
  0xbd   : > { %v660_v46 = vpop.f32.mrf.mxu2 }
  0xbf   : > { %v616_v48 = vpop.f32.mrf.mxu0 }
  0xc1   : > { %v657_v13 = vpop.f32.mrf.mxu1  ;;  %v672_v14 = vpop.f32.mrf.mxu3 }
  0xc2   : > { %v685_v16 = vsel %vm3142_vm1, %v657_v13, %v672_v14  ;;  %v695_v17 = vsel %vm3142_vm1, %v672_v14, %v657_v13 }
  0xc3   : > { %v3190_v20 = vadd.f32 %v3146_v57, %v685_v16  ;;  %v3193_v21 = vadd.f32 %v3146_v57, %v695_v17 }
  0xc5   : > { %v663_v50 = vpop.f32.mrf.mxu2 }
  0xc7   : > { %v619_v52 = vpop.f32.mrf.mxu0 }
  0xc9   : > { %v675_v30 = vpop.f32.mrf.mxu3 }
  0xca   : > { %v697_v34 = vsel %vm3142_vm1, %v675_v30, %v654_v5 }
  0xcd   : > { %v666_v56 = vpop.f32.mrf.mxu2 }
  0xce   : > { %v689_v58 = vsel %vm3142_vm1, %v663_v50, %v666_v56  ;;  %v691_v59 = vsel %vm3142_vm1, %v666_v56, %v663_v50 }
  0xcf   : > { %v3153_v60 = vadd.f32 %v3146_v57, %v689_v58  ;;  %v3156_v61 = vadd.f32 %v3146_v57, %v691_v59  ;;  %v622_v62 = vpop.f32.mrf.mxu0 }
  0xd5   : > { %v669_v0 = vpop.f32.mrf.mxu2 }
  0xd6   : > { %v687_v3 = vsel %vm3142_vm1, %v660_v46, %v669_v0  ;;  %v693_v4 = vsel %vm3142_vm1, %v669_v0, %v660_v46  ;;  %v3206_v46 = vadd.f32 %v3146_v57, %v697_v34 }
  0xd7   : > { %v3168_v6 = vadd.f32 %v3146_v57, %v687_v3  ;;  %v3171_v7 = vadd.f32 %v3146_v57, %v693_v4  ;;  %v625_v8 = vpop.f32.mrf.mxu0 }
  0xd8   : > { %v688_v9 = vsel %vm3159_vm2, %v622_v62, %v625_v8  ;;  %v690_v10 = vsel %vm3159_vm2, %v625_v8, %v622_v62  ;;  %v3221_v8 = vld [vmem:[%s3849_s4 + $0x1] ss:$0 sm:$0xff] }
  0xd9   : > { %v3177_v11 = vadd.f32 %v699_v2, %v688_v9  ;;  %v3179_v12 = vadd.f32 %v699_v2, %v690_v10 }
  0xdb   : > { %v760_v9 = vpop.f32.mrf.mxu3 }
  0xdc   : > { %v783_v14 = vadd.f32 %v760_v9, %v3221_v8 }
  0xdd   : > { %v740_v54 = vpop.f32.mrf.mxu2 }
  0xdf   : > { %v628_v15 = vpop.f32.mrf.mxu0 }
  0xe0   : > { %v686_v18 = vsel %vm3159_vm2, %v619_v52, %v628_v15  ;;  %v692_v19 = vsel %vm3159_vm2, %v628_v15, %v619_v52  ;;  %v683_v15 = vsel %vm3142_vm1, %v654_v5, %v675_v30 }
  0xe1   : > { %v3195_v26 = vadd.f32 %v699_v2, %v686_v18  ;;  %v3197_v27 = vadd.f32 %v699_v2, %v692_v19  ;;  %v704_v19 = vadd.f32 %v3146_v57, %v683_v15 }
  0xe7   : > { %v631_v32 = vpop.f32.mrf.mxu0 }
  0xe8   : > { %v684_v35 = vsel %vm3159_vm2, %v616_v48, %v631_v32  ;;  %v694_v41 = vsel %vm3159_vm2, %v631_v32, %v616_v48 }
  0xe9   : > { %v3208_v47 = vadd.f32 %v699_v2, %v684_v35  ;;  %v3210_v50 = vadd.f32 %v699_v2, %v694_v41 }
  0xef   : > { %v634_v51 = vpop.f32.mrf.mxu0 }
  0xf0   : > { %v682_v52 = vsel %vm3159_vm2, %v613_v45, %v634_v51  ;;  %v696_v53 = vsel %vm3159_vm2, %v634_v51, %v613_v45 }
  0xf1   : > { %v703_v56 = vadd.f32 %v699_v2, %v682_v52  ;;  %v3216_v58 = vadd.f32 %v699_v2, %v696_v53 }
  0xf3   : > { %v763_v59 = vadd.f32 %v740_v54, %v703_v56 }
  0xf5   : > { %v2492_v48 = vmul.f32 -1.442695, %v763_v59 }
  0xf7   : > { %2634 = vpow2.f32 %v2492_v48 }
  0xfd   : > { %v2635_v62 = vpop.eup %2634 }
  0xfe   : > { %v767_v63 = vadd.f32 1.0, %v2635_v62 }
 0x100   : > { %2636 = vrcp.f32 %v767_v63  ;;  %v779_v45 = vand.u32 2147483648, %v767_v63  ;;  %v777_v2 = vand.u32 2147483647, %v767_v63  ;;  %vm773_vm4 = vweird.f32 %v767_v63 }
 0x102   : > { %v780_v16 = vor.u32 1.1754944e-38, %v779_v45  ;;  %vm778_vm6 = vcmp.eq.f32.partialorder %v777_v2, 8.507059e+37 }
 0x106   : > { %v2637_v0 = vpop.eup %2636 }
 0x107   : > { %v769_v3 = vmul.f32 %v2637_v0, %v767_v63  ;;  %vm774_vm3 = vweird.f32 %v2637_v0 }
 0x108   : > { %vm775_vm5 = vmor %vm773_vm4, %vm774_vm3 }
 0x109   : > { %v770_v4 = vsub.f32 1.0, %v769_v3 }
 0x10b   : > { %v771_v10 = vmul.f32 %v2637_v0, %v770_v4 }
 0x10d   : > { %v772_v13 = vadd.f32 %v2637_v0, %v771_v10 }
 0x10f   : > { %v776_v17 = vsel %vm775_vm5, %v2637_v0, %v772_v13 }
 0x110   : > { %v781_v18 = vsel %vm778_vm6, %v780_v16, %v776_v17 }
 0x111   : > { %v784_v32 = vmul.f32 %v783_v14, %v781_v18  ;;  %v787_v41 = vsub.f32 1.0, %v781_v18  ;;  %v793_v52 = vmul.f32 0.0, %v781_v18 }
 0x113   : > { %v785_v34 = vadd.f32 %v784_v32, %v704_v19 }
 0x115   : > { %2638 = vtanh.f32 %v785_v34 }
 0x11b   : > { %v2639_v35 = vpop.eup %2638 }
 0x11c   : > { %789 = vrot.lane.b32.xlu0 %v2639_v35, %s3855_s24 }
 0x18e   : > { %v790_v51 = vpop.permute.xlu0 %789 }
 0x18f   : > { %v792_v53 = vmul.f32 %v790_v51, %v787_v41 }
 0x191   : > { %v794_v54 = vadd.f32 %v793_v52, %v792_v53 }
 0x193   : > { %796 = vrot.lane.b32.xlu0 %v794_v54, %s3855_s24 }
 0x205   : > { %v797_v5 = vpop.permute.xlu0 %796 }
 0x206   : > { %2493 = vmatmul.msk.f32.vlgmr.msra.gmra.mxu2 %vm719_vm7, %v797_v5  ;;  %2494 = vmatmul.msk.f32.vlgmr.msra.gmra.mxu3 %vm719_vm7, %v797_v5 }
 0x207   : > { %962 = vmatpush.msra.mxu2 %v2994_v22  ;;  %982 = vmatpush.msra.mxu3 %v3055_v36 }
 0x209   : > { %963 = vmatpush.msra.mxu2 %v2998_v23  ;;  %983 = vmatpush.msra.mxu3 %v3057_v37 }
 0x20b   : > { %964 = vmatpush.msra.mxu2 %v3001_v24  ;;  %984 = vmatpush.msra.mxu3 %v3061_v38 }
 0x20d   : > { %965 = vmatpush.msra.mxu2 %v3006_v25  ;;  %985 = vmatpush.msra.mxu3 %v3067_v39 }
 0x20f   : > { %966 = vmatpush.msra.mxu2 %v3012_v28  ;;  %986 = vmatpush.msra.mxu3 %v3073_v40 }
 0x211   : > { %967 = vmatpush.msra.mxu2 %v3018_v29  ;;  %987 = vmatpush.msra.mxu3 %v3080_v42 }
 0x213   : > { %968 = vmatpush.msra.mxu2 %v3026_v31  ;;  %988 = vmatpush.msra.mxu3 %v3084_v43 }
 0x215   : > { %969 = vmatpush.msra.mxu2 %v3037_v33  ;;  %989 = vmatpush.msra.mxu3 %v3090_v44 }
 0x289   : > { %v817_v57 = vpop.f32.mrf.mxu2  ;;  %v837_v45 = vpop.f32.mrf.mxu3 }
 0x28a   : > { %v840_v30 = vadd.f32 %v817_v57, %v3208_v47  ;;  %v860_v47 = vadd.f32 %v837_v45, %v3221_v8 }
 0x28c   : > { %v2495_v56 = vmul.f32 -1.442695, %v840_v30 }
 0x28e   : > { %2640 = vpow2.f32 %v2495_v56 }
 0x294   : > { %v2641_v59 = vpop.eup %2640 }
 0x295   : > { %v844_v48 = vadd.f32 1.0, %v2641_v59 }
 0x297   : > { %2642 = vrcp.f32 %v844_v48  ;;  %v856_v3 = vand.u32 2147483648, %v844_v48  ;;  %v854_v9 = vand.u32 2147483647, %v844_v48  ;;  %vm850_vm9 = vweird.f32 %v844_v48 }
 0x299   : > { %v857_v2 = vor.u32 1.1754944e-38, %v856_v3  ;;  %vm855_vm11 = vcmp.eq.f32.partialorder %v854_v9, 8.507059e+37 }
 0x29d   : > { %v2643_v62 = vpop.eup %2642 }
 0x29e   : > { %v846_v63 = vmul.f32 %v2643_v62, %v844_v48  ;;  %vm851_vm8 = vweird.f32 %v2643_v62 }
 0x29f   : > { %vm852_vm10 = vmor %vm850_vm9, %vm851_vm8 }
 0x2a0   : > { %v847_v0 = vsub.f32 1.0, %v846_v63 }
 0x2a2   : > { %v848_v4 = vmul.f32 %v2643_v62, %v847_v0 }
 0x2a4   : > { %v849_v10 = vadd.f32 %v2643_v62, %v848_v4 }
 0x2a6   : > { %v853_v13 = vsel %vm852_vm10, %v2643_v62, %v849_v10 }
 0x2a7   : > { %v858_v14 = vsel %vm855_vm11, %v857_v2, %v853_v13 }
 0x2a8   : > { %v861_v15 = vmul.f32 %v860_v47, %v858_v14  ;;  %v864_v18 = vsub.f32 1.0, %v858_v14  ;;  %v870_v32 = vmul.f32 %v858_v14, %v794_v54 }
 0x2aa   : > { %v862_v16 = vadd.f32 %v861_v15, %v3190_v20 }
 0x2ac   : > { %2644 = vtanh.f32 %v862_v16 }
 0x2b2   : > { %v2645_v17 = vpop.eup %2644 }
 0x2b3   : > { %866 = vrot.lane.b32.xlu1 %v2645_v17, %s3855_s24 }
 0x325   : > { %v867_v19 = vpop.permute.xlu1 %866 }
 0x326   : > { %v869_v34 = vmul.f32 %v867_v19, %v864_v18 }
 0x328   : > { %v871_v35 = vadd.f32 %v870_v32, %v869_v34 }
 0x32a   : > { %873 = vrot.lane.b32.xlu1 %v871_v35, %s3855_s24 }
 0x39c   : > { %v874_v41 = vpop.permute.xlu1 %873 }
 0x39d   : > { %2496 = vmatmul.msk.f32.vlgmr.msrb.gmra.mxu2 %vm719_vm7, %v874_v41  ;;  %2497 = vmatmul.msk.f32.vlgmr.msrb.gmra.mxu3 %vm719_vm7, %v874_v41 }
 0x39e   : > { %1116 = vmatpush.msrb.mxu2 %v2994_v22  ;;  %1136 = vmatpush.msrb.mxu3 %v3055_v36 }
 0x3a0   : > { %1117 = vmatpush.msrb.mxu2 %v2998_v23  ;;  %1137 = vmatpush.msrb.mxu3 %v3057_v37 }
 0x3a2   : > { %1118 = vmatpush.msrb.mxu2 %v3001_v24  ;;  %1138 = vmatpush.msrb.mxu3 %v3061_v38 }
 0x3a4   : > { %1119 = vmatpush.msrb.mxu2 %v3006_v25  ;;  %1139 = vmatpush.msrb.mxu3 %v3067_v39 }
 0x3a6   : > { %1120 = vmatpush.msrb.mxu2 %v3012_v28  ;;  %1140 = vmatpush.msrb.mxu3 %v3073_v40 }
 0x3a8   : > { %1121 = vmatpush.msrb.mxu2 %v3018_v29  ;;  %1141 = vmatpush.msrb.mxu3 %v3080_v42 }
 0x3aa   : > { %1122 = vmatpush.msrb.mxu2 %v3026_v31  ;;  %1142 = vmatpush.msrb.mxu3 %v3084_v43 }
 0x3ac   : > { %1123 = vmatpush.msrb.mxu2 %v3037_v33  ;;  %1143 = vmatpush.msrb.mxu3 %v3090_v44 }
 0x420   : > { %v894_v20 = vpop.f32.mrf.mxu2  ;;  %v914_v62 = vpop.f32.mrf.mxu3 }
 0x421   : > { %v917_v51 = vadd.f32 %v894_v20, %v3195_v26  ;;  %v937_v26 = vadd.f32 %v914_v62, %v3221_v8 }
 0x423   : > { %v2498_v52 = vmul.f32 -1.442695, %v917_v51 }
 0x425   : > { %2646 = vpow2.f32 %v2498_v52 }
 0x42b   : > { %v2647_v53 = vpop.eup %2646 }
 0x42c   : > { %v921_v54 = vadd.f32 1.0, %v2647_v53 }
 0x42e   : > { %2648 = vrcp.f32 %v921_v54  ;;  %v933_v56 = vand.u32 2147483648, %v921_v54  ;;  %v931_v48 = vand.u32 2147483647, %v921_v54  ;;  %vm927_vm13 = vweird.f32 %v921_v54 }
 0x430   : > { %v934_v0 = vor.u32 1.1754944e-38, %v933_v56  ;;  %vm932_vm15 = vcmp.eq.f32.partialorder %v931_v48, 8.507059e+37 }
 0x434   : > { %v2649_v5 = vpop.eup %2648 }
 0x435   : > { %v923_v57 = vmul.f32 %v2649_v5, %v921_v54  ;;  %vm928_vm12 = vweird.f32 %v2649_v5 }
 0x436   : > { %vm929_vm14 = vmor %vm927_vm13, %vm928_vm12 }
 0x437   : > { %v924_v30 = vsub.f32 1.0, %v923_v57 }
 0x439   : > { %v925_v59 = vmul.f32 %v2649_v5, %v924_v30 }
 0x43b   : > { %v926_v63 = vadd.f32 %v2649_v5, %v925_v59 }
 0x43d   : > { %v930_v3 = vsel %vm929_vm14, %v2649_v5, %v926_v63 }
 0x43e   : > { %v935_v4 = vsel %vm932_vm15, %v934_v0, %v930_v3 }
 0x43f   : > { %v938_v9 = vmul.f32 %v937_v26, %v935_v4  ;;  %v941_v2 = vsub.f32 1.0, %v935_v4  ;;  %v947_v47 = vmul.f32 %v935_v4, %v871_v35 }
 0x441   : > { %v939_v45 = vadd.f32 %v938_v9, %v3168_v6 }
 0x443   : > { %2650 = vtanh.f32 %v939_v45 }
 0x449   : > { %v2651_v10 = vpop.eup %2650 }
 0x44a   : > { %943 = vrot.lane.b32.xlu2 %v2651_v10, %s3855_s24 }
 0x4a4   : > { %v944_v13 = vpop.permute.xlu2 %943 }
 0x4a5   : > { %v946_v14 = vmul.f32 %v944_v13, %v941_v2 }
 0x4a7   : > { %v948_v15 = vadd.f32 %v947_v47, %v946_v14 }
 0x4a9   : > { %950 = vrot.lane.b32.xlu2 %v948_v15, %s3855_s24 }
 0x503   : > { %v951_v16 = vpop.permute.xlu2 %950 }
 0x504   : > { %2499 = vmatmul.msk.f32.vlgmr.msra.gmra.mxu2 %vm719_vm7, %v951_v16  ;;  %2500 = vmatmul.msk.f32.vlgmr.msra.gmra.mxu3 %vm719_vm7, %v951_v16 }
 0x505   : > { %1270 = vmatpush.msra.mxu2 %v2994_v22  ;;  %1290 = vmatpush.msra.mxu3 %v3055_v36 }
 0x507   : > { %1271 = vmatpush.msra.mxu2 %v2998_v23  ;;  %1291 = vmatpush.msra.mxu3 %v3057_v37 }
 0x509   : > { %1272 = vmatpush.msra.mxu2 %v3001_v24  ;;  %1292 = vmatpush.msra.mxu3 %v3061_v38 }
 0x50b   : > { %1273 = vmatpush.msra.mxu2 %v3006_v25  ;;  %1293 = vmatpush.msra.mxu3 %v3067_v39 }
 0x50d   : > { %1274 = vmatpush.msra.mxu2 %v3012_v28  ;;  %1294 = vmatpush.msra.mxu3 %v3073_v40 }
 0x50f   : > { %1275 = vmatpush.msra.mxu2 %v3018_v29  ;;  %1295 = vmatpush.msra.mxu3 %v3080_v42 }
 0x511   : > { %1276 = vmatpush.msra.mxu2 %v3026_v31  ;;  %1296 = vmatpush.msra.mxu3 %v3084_v43 }
 0x513   : > { %1277 = vmatpush.msra.mxu2 %v3037_v33  ;;  %1297 = vmatpush.msra.mxu3 %v3090_v44 }
 0x587   : > { %v971_v22 = vpop.f32.mrf.mxu2  ;;  %v991_v40 = vpop.f32.mrf.mxu3 }
 0x588   : > { %v994_v23 = vadd.f32 %v971_v22, %v3177_v11  ;;  %v1014_v44 = vadd.f32 %v991_v40, %v3221_v8 }
 0x58a   : > { %v2501_v24 = vmul.f32 -1.442695, %v994_v23 }
 0x58c   : > { %2652 = vpow2.f32 %v2501_v24 }
 0x592   : > { %v2653_v25 = vpop.eup %2652 }
 0x593   : > { %v998_v28 = vadd.f32 1.0, %v2653_v25 }
 0x595   : > { %2654 = vrcp.f32 %v998_v28  ;;  %v1010_v38 = vand.u32 2147483648, %v998_v28  ;;  %v1008_v31 = vand.u32 2147483647, %v998_v28  ;;  %vm1004_vm4 = vweird.f32 %v998_v28 }
 0x597   : > { %v1011_v33 = vor.u32 1.1754944e-38, %v1010_v38  ;;  %vm1009_vm6 = vcmp.eq.f32.partialorder %v1008_v31, 8.507059e+37 }
 0x59b   : > { %v2655_v36 = vpop.eup %2654 }
 0x59c   : > { %v1000_v29 = vmul.f32 %v2655_v36, %v998_v28  ;;  %vm1005_vm3 = vweird.f32 %v2655_v36 }
 0x59d   : > { %vm1006_vm5 = vmor %vm1004_vm4, %vm1005_vm3 }
 0x59e   : > { %v1001_v37 = vsub.f32 1.0, %v1000_v29 }
 0x5a0   : > { %v1002_v39 = vmul.f32 %v2655_v36, %v1001_v37 }
 0x5a2   : > { %v1003_v42 = vadd.f32 %v2655_v36, %v1002_v39 }
 0x5a4   : > { %v1007_v43 = vsel %vm1006_vm5, %v2655_v36, %v1003_v42 }
 0x5a5   : > { %v1012_v6 = vsel %vm1009_vm6, %v1011_v33, %v1007_v43 }
 0x5a6   : > { %v1015_v11 = vmul.f32 %v1014_v44, %v1012_v6  ;;  %v1018_v19 = vsub.f32 1.0, %v1012_v6  ;;  %v1024_v34 = vmul.f32 %v1012_v6, %v948_v15 }
 0x5a8   : > { %v1016_v17 = vadd.f32 %v1015_v11, %v3153_v60 }
 0x5aa   : > { %2656 = vtanh.f32 %v1016_v17 }
 0x5b0   : > { %v2657_v18 = vpop.eup %2656 }
 0x5b1   : > { %1020 = vrot.lane.b32.xlu0 %v2657_v18, %s3855_s24 }
 0x623   : > { %v1021_v32 = vpop.permute.xlu0 %1020 }
 0x624   : > { %v1023_v35 = vmul.f32 %v1021_v32, %v1018_v19 }
 0x626   : > { %v1025_v41 = vadd.f32 %v1024_v34, %v1023_v35 }
 0x628   : > { %1027 = vrot.lane.b32.xlu1 %v1025_v41, %s3855_s24 }
 0x69a   : > { %v1028_v20 = vpop.permute.xlu1 %1027 }
 0x69b   : > { %2502 = vmatmul.msk.f32.vlgmr.msrb.gmra.mxu0 %vm719_vm7, %v1028_v20  ;;  %2503 = vmatmul.msk.f32.vlgmr.msrb.gmra.mxu1 %vm719_vm7, %v1028_v20 }
 0x718   : > { %v1048_v51 = vpop.f32.mrf.mxu0  ;;  %v1068_v62 = vpop.f32.mrf.mxu1 }
 0x719   : > { %v1071_v52 = vadd.f32 %v1048_v51, %v3179_v12  ;;  %v1091_v12 = vadd.f32 %v1068_v62, %v3221_v8 }
 0x71b   : > { %v2504_v60 = vmul.f32 -1.442695, %v1071_v52 }
 0x71d   : > { %2658 = vpow2.f32 %v2504_v60 }
 0x723   : > { %v2659_v53 = vpop.eup %2658 }
 0x724   : > { %v1075_v54 = vadd.f32 1.0, %v2659_v53 }
 0x726   : > { %2660 = vrcp.f32 %v1075_v54  ;;  %v1087_v56 = vand.u32 2147483648, %v1075_v54  ;;  %v1085_v48 = vand.u32 2147483647, %v1075_v54  ;;  %vm1081_vm9 = vweird.f32 %v1075_v54 }
 0x728   : > { %v1088_v0 = vor.u32 1.1754944e-38, %v1087_v56  ;;  %vm1086_vm11 = vcmp.eq.f32.partialorder %v1085_v48, 8.507059e+37 }
 0x72c   : > { %v2661_v5 = vpop.eup %2660 }
 0x72d   : > { %v1077_v57 = vmul.f32 %v2661_v5, %v1075_v54  ;;  %vm1082_vm8 = vweird.f32 %v2661_v5 }
 0x72e   : > { %vm1083_vm10 = vmor %vm1081_vm9, %vm1082_vm8 }
 0x72f   : > { %v1078_v30 = vsub.f32 1.0, %v1077_v57 }
 0x731   : > { %v1079_v59 = vmul.f32 %v2661_v5, %v1078_v30 }
 0x733   : > { %v1080_v63 = vadd.f32 %v2661_v5, %v1079_v59 }
 0x735   : > { %v1084_v3 = vsel %vm1083_vm10, %v2661_v5, %v1080_v63 }
 0x736   : > { %v1089_v26 = vsel %vm1086_vm11, %v1088_v0, %v1084_v3 }
 0x737   : > { %v1092_v4 = vmul.f32 %v1091_v12, %v1089_v26  ;;  %v1095_v10 = vsub.f32 1.0, %v1089_v26  ;;  %v1101_v13 = vmul.f32 %v1089_v26, %v1025_v41 }
 0x739   : > { %v1093_v9 = vadd.f32 %v1092_v4, %v3156_v61 }
 0x73b   : > { %2662 = vtanh.f32 %v1093_v9 }
 0x741   : > { %v2663_v45 = vpop.eup %2662 }
 0x742   : > { %1097 = vrot.lane.b32.xlu2 %v2663_v45, %s3855_s24 }
 0x79c   : > { %v1098_v2 = vpop.permute.xlu2 %1097 }
 0x79d   : > { %v1100_v47 = vmul.f32 %v1098_v2, %v1095_v10 }
 0x79f   : > { %v1102_v14 = vadd.f32 %v1101_v13, %v1100_v47 }
 0x7a1   : > { %1104 = vrot.lane.b32.xlu0 %v1102_v14, %s3855_s24 }
 0x813   : > { %v1105_v15 = vpop.permute.xlu0 %1104 }
 0x814   : > { %2505 = vmatmul.msk.f32.vlgmr.msrb.gmra.mxu2 %vm719_vm7, %v1105_v15  ;;  %2506 = vmatmul.msk.f32.vlgmr.msrb.gmra.mxu3 %vm719_vm7, %v1105_v15 }
 0x897   : > { %v1125_v16 = vpop.f32.mrf.mxu2  ;;  %v1145_v39 = vpop.f32.mrf.mxu3 }
 0x898   : > { %v1148_v22 = vadd.f32 %v1125_v16, %v3197_v27  ;;  %v1168_v27 = vadd.f32 %v1145_v39, %v3221_v8 }
 0x89a   : > { %v2507_v61 = vmul.f32 -1.442695, %v1148_v22 }
 0x89c   : > { %2664 = vpow2.f32 %v2507_v61 }
 0x8a2   : > { %v2665_v23 = vpop.eup %2664 }
 0x8a3   : > { %v1152_v24 = vadd.f32 1.0, %v2665_v23 }
 0x8a5   : > { %2666 = vrcp.f32 %v1152_v24  ;;  %v1164_v29 = vand.u32 2147483648, %v1152_v24  ;;  %v1162_v38 = vand.u32 2147483647, %v1152_v24  ;;  %vm1158_vm13 = vweird.f32 %v1152_v24 }
 0x8a7   : > { %v1165_v40 = vor.u32 1.1754944e-38, %v1164_v29  ;;  %vm1163_vm15 = vcmp.eq.f32.partialorder %v1162_v38, 8.507059e+37 }
 0x8ab   : > { %v2667_v25 = vpop.eup %2666 }
 0x8ac   : > { %v1154_v28 = vmul.f32 %v2667_v25, %v1152_v24  ;;  %vm1159_vm12 = vweird.f32 %v2667_v25 }
 0x8ad   : > { %vm1160_vm14 = vmor %vm1158_vm13, %vm1159_vm12  ;;  %vm1378_vm12 = vcmask 64512  }
 0x8ae   : > { %v1155_v36 = vsub.f32 1.0, %v1154_v28 }
 0x8b0   : > { %v1156_v37 = vmul.f32 %v2667_v25, %v1155_v36 }
 0x8b2   : > { %v1157_v31 = vadd.f32 %v2667_v25, %v1156_v37 }
 0x8b4   : > { %v1161_v42 = vsel %vm1160_vm14, %v2667_v25, %v1157_v31 }
 0x8b5   : > { %v1166_v33 = vsel %vm1163_vm15, %v1165_v40, %v1161_v42  ;;  %v1341_v40 = vld [vmem:[%s3850_s5 + $0x38] sm:$0xff]  ;;  %v1340_v42 = vld [vmem:[%s3850_s5 + $0x30] sm:$0xff] }
 0x8b6   : > { %v1169_v43 = vmul.f32 %v1168_v27, %v1166_v33  ;;  %v1172_v11 = vsub.f32 1.0, %v1166_v33  ;;  %v1178_v18 = vmul.f32 %v1166_v33, %v1102_v14  ;;  %1355 = vmatpush.msrb.mxu0 %v1341_v40  ;;  %v1337_v27 = vld [vmem:[%s3850_s5 + $0x18] sm:$0xff]  ;;  %v1336_v33 = vld [vmem:[%s3850_s5 + $0x10] sm:$0xff] }
 0x8b8   : > { %v1170_v44 = vadd.f32 %v1169_v43, %v3171_v7  ;;  %1356 = vmatpush.msrb.mxu0 %v1340_v42  ;;  %v1335_v43 = vld [vmem:[%s3850_s5 + $0x8] sm:$0xff] }
 0x8ba   : > { %2668 = vtanh.f32 %v1170_v44  ;;  %v1334_v44 = vld [vmem:[%s3850_s5] sm:$0xff] }
 0x8c0   : > { %v2669_v6 = vpop.eup %2668 }
 0x8c1   : > { %1174 = vrot.lane.b32.xlu1 %v2669_v6, %s3855_s24 }
 0x933   : > { %v1175_v17 = vpop.permute.xlu1 %1174 }
 0x934   : > { %v1177_v19 = vmul.f32 %v1175_v17, %v1172_v11 }
 0x936   : > { %v1179_v32 = vadd.f32 %v1178_v18, %v1177_v19 }
 0x938   : > { %1181 = vrot.lane.b32.xlu2 %v1179_v32, %s3855_s24 }
 0x992   : > { %v1182_v34 = vpop.permute.xlu2 %1181 }
 0x993   : > { %2508 = vmatmul.msk.f32.vlgmr.msra.gmra.mxu0 %vm719_vm7, %v1182_v34  ;;  %2509 = vmatmul.msk.f32.vlgmr.msra.gmra.mxu1 %vm719_vm7, %v1182_v34  ;;  %v1403_v34 = vld [vmem:[%s2986_s20 + $0x8] sm:$0xff] }
 0xa10   : > { %v1202_v35 = vpop.f32.mrf.mxu0  ;;  %v1222_v30 = vpop.f32.mrf.mxu1 }
 0xa11   : > { %v1225_v41 = vadd.f32 %v1202_v35, %v3210_v50  ;;  %v1245_v50 = vadd.f32 %v1222_v30, %v3221_v8  ;;  %v2843_v35 = vmov 0  }
 0xa12   : > { %2632 = vset.pattern.permute.xlu0 %v2843_v35  ;;  %2633 = vset.pattern.permute.xlu1 %v2843_v35 }
 0xa13   : > { %v2510_v7 = vmul.f32 -1.442695, %v1225_v41  ;;  %2631 = vset.pattern.permute.xlu2 %v2843_v35  ;;  %v1402_v41 = vld [vmem:[%s2986_s20] sm:$0xff]  ;;  %v3407_v35 = vld [vmem:[#allocation4 + $0x128] sm:$0xff] }
 0xa15   : > { %2670 = vpow2.f32 %v2510_v7  ;;  %v559_v7 = vld [vmem:[%s3849_s4 + $0x4] ss:$0 sm:$0xff] }
 0xa1b   : > { %v2671_v20 = vpop.eup %2670 }
 0xa1c   : > { %v1229_v51 = vadd.f32 1.0, %v2671_v20  ;;  %v1405_v20 = vld [vmem:[%s2986_s20 + $0x18] sm:$0xff] }
 0xa1e   : > { %2672 = vrcp.f32 %v1229_v51  ;;  %v1241_v54 = vand.u32 2147483648, %v1229_v51  ;;  %v1239_v57 = vand.u32 2147483647, %v1229_v51  ;;  %vm1235_vm4 = vweird.f32 %v1229_v51 }
 0xa20   : > { %v1242_v59 = vor.u32 1.1754944e-38, %v1241_v54  ;;  %vm1240_vm6 = vcmp.eq.f32.partialorder %v1239_v57, 8.507059e+37  ;;  %v1377_v57 = vld [vmem:[%s3851_s6] sm:$0xff] }
 0xa21   : > { %1397 = vmatpush.msrb.mxu1 %v1377_v57  ;;  %v3429_v57 = vld [vmem:[#allocation4 + $0xf8] sm:$0xff] }
 0xa24   : > { %v2673_v52 = vpop.eup %2672 }
 0xa25   : > { %v1231_v60 = vmul.f32 %v2673_v52, %v1229_v51  ;;  %vm1236_vm3 = vweird.f32 %v2673_v52  ;;  %v1408_v51 = vld [vmem:[%s2986_s20 + $0x30] sm:$0xff] }
 0xa26   : > { %vm1237_vm5 = vmor %vm1235_vm4, %vm1236_vm3 }
 0xa27   : > { %v1232_v53 = vsub.f32 1.0, %v1231_v60 }
 0xa29   : > { %v1233_v5 = vmul.f32 %v2673_v52, %v1232_v53 }
 0xa2b   : > { %v1234_v56 = vadd.f32 %v2673_v52, %v1233_v5  ;;  %v1407_v5 = vld [vmem:[%s2986_s20 + $0x28] sm:$0xff] }
 0xa2d   : > { %v1238_v48 = vsel %vm1237_vm5, %v2673_v52, %v1234_v56  ;;  %v1404_v56 = vld [vmem:[%s2986_s20 + $0x10] sm:$0xff] }
 0xa2e   : > { %v1243_v62 = vsel %vm1240_vm6, %v1242_v59, %v1238_v48  ;;  %v1406_v59 = vld [vmem:[%s2986_s20 + $0x20] sm:$0xff]  ;;  %v1409_v48 = vld [vmem:[%s2986_s20 + $0x38] sm:$0xff]  ;;  %s481_s20 = scalar_select %p480_p2, %s2914_s9, 1 }
 0xa2f   : > { %v1246_v63 = vmul.f32 %v1245_v50, %v1243_v62  ;;  %v1249_v12 = vsub.f32 1.0, %v1243_v62  ;;  %v1255_v4 = vmul.f32 %v1243_v62, %v1179_v32  ;;  %v3368_v50 = vld [vmem:[%s3849_s4 + $0x7] ss:$0 sm:$0xff] }
 0xa30   : > { %s2474_s18 = sshll.u32 %s481_s20, 3  ;;  %s2350_s20 = sshll.u32 %s2347_s10, 4  ;;  %s2351_s20 = int_to_ptr.hbm [resolvable:$true] %s2350_s20 }
 0xa31   : > { %v1247_v0 = vadd.f32 %v1246_v63, %v3193_v21  ;;  %v536_v63 = vld [vmem:[#allocation4 + $0xb0] sm:$0xff]  ;;  %s483_s22 = scalar_lea.vmem %s3846_s1, %s2474_s18  ;;  %s3866_s18 = sand.u32 1, %s2828_s28  }
 0xa32   : > { %1512 = vmatpush.msra.mxu1 %v536_v63  ;;  %v3461_v63 = vld [vmem:[#allocation4 + $0xc0] sm:$0xff]  ;;  %s2337_s21 = scalar_lea.sflag [#allocation6], %s3866_s18  ;;  %s2784_s9 = sshra.s32 %s2351_s20, 4  ;;  %s2785_s9 = int_to_ptr.hbm [resolvable:$true] %s2784_s9 }
 0xa33   : > { %2674 = vtanh.f32 %v1247_v0  ;;  %v537_v0 = vld [vmem:[#allocation4 + $0xb8] sm:$0xff]  ;;  %p2791_p7 = scmp.lt.s32.totalorder %s2785_s9, %s3853_s8 }
 0xa34   : > { %1553 = vmatpush.msrb.mxu2 %v537_v0  ;;  %v3463_v0 = vld [vmem:[#allocation4 + $0xc8] sm:$0xff] }
 0xa39   : > { %v2675_v3 = vpop.eup %2674 }
 0xa3a   : > { %1251 = vrot.lane.b32.xlu0 %v2675_v3, %s3855_s24  ;;  %v2732_v3 = vld [vmem:[%s2983_s19] sm:$0xff] }
 0xaac   : > { %v1252_v26 = vpop.permute.xlu0 %1251 }
 0xaad   : > { %v1254_v9 = vmul.f32 %v1252_v26, %v1249_v12  ;;  %v1410_v12 = vsub.f32 %v3368_v50, %v2732_v3  ;;  %v534_v26 = vld [vmem:[#allocation4 + $0xa0] sm:$0xff] }
 0xaae   : > { %1513 = vmatpush.msra.mxu1 %v534_v26 }
 0xaaf   : > { %v1256_v45 = vadd.f32 %v1255_v4, %v1254_v9  ;;  %v535_v4 = vld [vmem:[#allocation4 + $0xa8] sm:$0xff] }
 0xab0   : > { %1554 = vmatpush.msrb.mxu2 %v535_v4 }
 0xab1   : > { %1258 = vrot.lane.b32.xlu1 %v1256_v45, %s3855_s24 }
 0xb23   : > { %v1259_v10 = vpop.permute.xlu1 %1258 }
 0xb24   : > { %2511 = vmatmul.msk.f32.vlgmr.msra.gmra.mxu2 %vm719_vm7, %v1259_v10  ;;  %2512 = vmatmul.msk.f32.vlgmr.msra.gmra.mxu3 %vm719_vm7, %v1259_v10  ;;  %v2733_v10 = vld [vmem:[%s2983_s19 + $0x8] sm:$0xff] }
 0xba7   : > { %v1279_v2 = vpop.f32.mrf.mxu2  ;;  %v1299_v25 = vpop.f32.mrf.mxu3 }
 0xba8   : > { %v1302_v13 = vadd.f32 %v1279_v2, %v3216_v58  ;;  %v1322_v58 = vadd.f32 %v1299_v25, %v3221_v8  ;;  %v1339_v8 = vld [vmem:[%s3850_s5 + $0x28] sm:$0xff]  ;;  %v1411_v2 = vsub.f32 %v3368_v50, %v2733_v10 }
 0xba9   : > { %1357 = vmatpush.msrb.mxu0 %v1339_v8 }
 0xbaa   : > { %v2513_v21 = vmul.f32 -1.442695, %v1302_v13 }
 0xbac   : > { %2676 = vpow2.f32 %v2513_v21 }
 0xbb2   : > { %v2677_v47 = vpop.eup %2676 }
 0xbb3   : > { %v1306_v14 = vadd.f32 1.0, %v2677_v47 }
 0xbb5   : > { %2678 = vrcp.f32 %v1306_v14  ;;  %v1318_v61 = vand.u32 2147483648, %v1306_v14  ;;  %v1316_v24 = vand.u32 2147483647, %v1306_v14  ;;  %vm1312_vm9 = vweird.f32 %v1306_v14 }
 0xbb7   : > { %v1319_v36 = vor.u32 1.1754944e-38, %v1318_v61  ;;  %vm1317_vm11 = vcmp.eq.f32.partialorder %v1316_v24, 8.507059e+37  ;;  %v2734_v61 = vld [vmem:[%s2983_s19 + $0x10] sm:$0xff] }
 0xbbb   : > { %v2679_v15 = vpop.eup %2678 }
 0xbbc   : > { %v1308_v16 = vmul.f32 %v2679_v15, %v1306_v14  ;;  %vm1313_vm8 = vweird.f32 %v2679_v15  ;;  %v1367_v14 = vld [vmem:[%s483_s22] sm:$0xff] }
 0xbbd   : > { %vm1314_vm10 = vmor %vm1312_vm9, %vm1313_vm8 }
 0xbbe   : > { %v1309_v22 = vsub.f32 1.0, %v1308_v16 }
 0xbc0   : > { %v1310_v23 = vmul.f32 %v2679_v15, %v1309_v22 }
 0xbc2   : > { %v1311_v28 = vadd.f32 %v2679_v15, %v1310_v23  ;;  %v1412_v23 = vsub.f32 %v3368_v50, %v2734_v61 }
 0xbc4   : > { %v1315_v29 = vsel %vm1314_vm10, %v2679_v15, %v1311_v28  ;;  %v2735_v28 = vld [vmem:[%s2983_s19 + $0x18] sm:$0xff] }
 0xbc5   : > { %v1320_v37 = vsel %vm1317_vm11, %v1319_v36, %v1315_v29  ;;  %v1413_v36 = vsub.f32 %v3368_v50, %v2735_v28 }
 0xbc6   : > { %v1323_v38 = vmul.f32 %v1322_v58, %v1320_v37  ;;  %v1326_v6 = vsub.f32 1.0, %v1320_v37  ;;  %v1332_v17 = vmul.f32 %v1320_v37, %v1256_v45 }
 0xbc8   : > { %v1324_v39 = vadd.f32 %v1323_v38, %v3206_v46  ;;  %v1338_v46 = vld [vmem:[%s3850_s5 + $0x20] sm:$0xff] }
 0xbc9   : > { %1358 = vmatpush.msrb.mxu0 %v1338_v46  ;;  %v2737_v46 = vld [vmem:[%s2983_s19 + $0x28] sm:$0xff] }
 0xbca   : > { %2680 = vtanh.f32 %v1324_v39  ;;  %v2736_v39 = vld [vmem:[%s2983_s19 + $0x20] sm:$0xff] }
 0xbcb   : > { %1359 = vmatpush.msrb.mxu0 %v1337_v27  ;;  %v1415_v27 = vsub.f32 %v3368_v50, %v2737_v46 }
 0xbcd   : > { %1360 = vmatpush.msrb.mxu0 %v1336_v33 }
 0xbcf   : > { %1361 = vmatpush.msrb.mxu0 %v1335_v43 }
 0xbd0   : > { %v2681_v31 = vpop.eup %2680 }
 0xbd1   : > { %1328 = vrot.lane.b32.xlu2 %v2681_v31, %s3855_s24  ;;  %1362 = vmatpush.msrb.mxu0 %v1334_v44  ;;  %v1414_v31 = vsub.f32 %v3368_v50, %v2736_v39  ;;  %s2786_s24 = scalar_lea.hbm %s2785_s9, 64 }
 0xbd2   : > { %p2787_p3 = scmp.ne.s32.totalorder %s2785_s9, %s2786_s24 }
 0xbd4   : > { %p2788_p4 = pnand %p2787_p3, %p2936_p6 }
 0xbd6   : > { %p2789_p5 = pneg %p2788_p4 }
 0xbd9   : > { %1420 = vperm.xlu2 %2631, %v1402_v41   ;;  %v3409_v41 = vld [vmem:[#allocation4 + $0x110] sm:$0xff] }
 0xbe1   : > { %1435 = vperm.xlu2 %2631, %v1405_v20  }
 0xbe9   : > { %1445 = vperm.xlu2 %2631, %v1407_v5   ;;  %v3427_v5 = vld [vmem:[#allocation4 + $0xf0] sm:$0xff] }
 0xc2b   : > { %v1329_v11 = vpop.permute.xlu2 %1328 }
 0xc2c   : > { %v1331_v18 = vmul.f32 %v1329_v11, %v1326_v6  ;;  %v2738_v6 = vld [vmem:[%s2983_s19 + $0x30] sm:$0xff] }
 0xc2d   : > { %v1416_v11 = vsub.f32 %v3368_v50, %v2738_v6 }
 0xc2e   : > { %v1333_v19 = vadd.f32 %v1332_v17, %v1331_v18 }
 0xc30   : > { %1343 = vrot.lane.b32.xlu0 %v1333_v19, %s3865_s15  ;;  %v3399_v19 = vld [vmem:[#allocation4 + $0x130] sm:$0xff] }
 0xc31   : > { %1628 = vmatpush.msrb.mxu3 %v3399_v19 }
 0xc33   : > { %v1421_v62 = vpop.permute.xlu2 %1420 }
 0xc34   : > { %v1458_v9 = vmul.f32 %v1421_v62, %v1410_v12  ;;  %v3457_v62 = vld [vmem:[#allocation4 + $0xd8] sm:$0xff]  ;;  %v560_v12 = vld [vmem:[%s3849_s4 + $0x5] ss:$0 sm:$0xff] }
 0xc36   : > { %v1466_v45 = vadd.f32 %v2732_v3, %v1458_v9 }
 0xc38   : > { %1425 = vperm.xlu0 %2632, %v1403_v34   ;;  %2524 = vmatmul.msk.f32.vlgmr.msrb.gmra.mxu2 %vm571_vm0, %v1466_v45  ;;  %v3403_v34 = vld [vmem:[#allocation4 + $0x120] sm:$0xff] }
 0xc39   : > { %1629 = vmatpush.msrb.mxu3 %v3403_v34 }
 0xc3b   : > { %v1436_v29 = vpop.permute.xlu2 %1435  ;;  %1630 = vmatpush.msrb.mxu3 %v3409_v41 }
 0xc3c   : > { %v1461_v37 = vmul.f32 %v1436_v29, %v1413_v36 }
 0xc3e   : > { %v1469_v38 = vadd.f32 %v2735_v28, %v1461_v37 }
 0xc40   : > { %1450 = vperm.xlu0 %2632, %v1408_v51   ;;  %v2739_v51 = vld [vmem:[%s2983_s19 + $0x38] sm:$0xff]  ;;  %s2790_s19 = scalar_lea.hbm %s3853_s8, 128 }
 0xc41   : > { %p2792_p8 = scmp.lt.s32.totalorder %s2790_s19, %s2786_s24 }
 0xc43   : > { %v1446_v33 = vpop.permute.xlu2 %1445  ;;  %p2793_p9 = por %p2792_p8, %p2791_p7 }
 0xc44   : > { %v1463_v43 = vmul.f32 %v1446_v33, %v1415_v27 }
 0xc45   : > { %p2794_p11 = pnand %p2793_p9, %p2789_p5 }
 0xc46   : > { %v1471_v44 = vadd.f32 %v2737_v46, %v1463_v43 }
 0xca2   : > { %v1344_v32 = vpop.permute.xlu0 %1343 }
 0xca3   : > { %2514 = vmatmul.msk.f32.vlgmr.msrb.gmra.mxu0 %vm719_vm7, %v1344_v32  ;;  %v3401_v32 = vld [vmem:[#allocation4 + $0x138] sm:$0xff] }
 0xca4   : > { %1648 = vmatpush.msra.mxu0 %v3401_v32  ;;  %1959 = vmatpush.msra.mxu2 %v3401_v32 }
 0xca6   : > { %1649 = vmatpush.msra.mxu0 %v3407_v35  ;;  %1960 = vmatpush.msra.mxu2 %v3407_v35 }
 0xcaa   : > { %v1426_v13 = vpop.permute.xlu0 %1425 }
 0xcab   : > { %v1459_v21 = vmul.f32 %v1426_v13, %v1411_v2 }
 0xcad   : > { %v1467_v47 = vadd.f32 %v2733_v10, %v1459_v21 }
 0xcaf   : > { %2525 = vmatmul.msk.f32.gmra.mxu2 %vm571_vm0, %v1467_v47 }
 0xcb2   : > { %v1451_v17 = vpop.permute.xlu0 %1450 }
 0xcb3   : > { %v1464_v18 = vmul.f32 %v1451_v17, %v1416_v11 }
 0xcb5   : > { %v1472_v20 = vadd.f32 %v2738_v6, %v1464_v18 }
 0xcbb   : > { %v3503_v3 = vpop.f32.mrf.mxu2 }
 0xd20   : > { %v1364_v52 = vpop.f32.mrf.mxu0 }
 0xd21   : > { %v1365_v60 = vadd.f32 %v1364_v52, %v559_v7  ;;  %v3411_v7 = vld [vmem:[#allocation4 + $0x118] sm:$0xff]  ;;  %v1417_v52 = vsub.f32 %v3368_v50, %v2739_v51  ;;  %v3455_v50 = vld [vmem:[#allocation4 + $0xd0] sm:$0xff] }
 0xd22   : > { %1650 = vmatpush.msra.mxu0 %v3411_v7  ;;  %1961 = vmatpush.msra.mxu2 %v3411_v7 }
 0xd23   : > { %v1368_v53 = vmul.f32 0.1, %v1365_v60 }
 0xd25   : > { %v1369_v54 = vmul.f32 1.442695, %v1368_v53  ;;  %v3421_v53 = vld [vmem:[#allocation4 + $0x108] sm:$0xff] }
 0xd26   : > { %1651 = vmatpush.msra.mxu0 %v3421_v53  ;;  %1962 = vmatpush.msra.mxu2 %v3421_v53 }
 0xd27   : > { %2682 = vpow2.f32 %v1369_v54 }
 0xd28   : > { %1652 = vmatpush.msra.mxu0 %v3429_v57  ;;  %1963 = vmatpush.msra.mxu2 %v3429_v57 }
 0xd2d   : > { %v2683_v30 = vpop.eup %2682 }
 0xd2e   : > { %1372 = vrot.lane.b32.xlu1 %v2683_v30, %s2844_s26 }
 0xd32   : > { %v1559_v9 = vpop.f32.mrf.mxu2 }
 0xd36   : > { %1430 = vperm.xlu1 %2633, %v1404_v56   ;;  %v3437_v56 = vld [vmem:[#allocation4 + $0xe0] sm:$0xff] }
 0xd3e   : > { %1440 = vperm.xlu1 %2633, %v1406_v59   ;;  %v3439_v59 = vld [vmem:[#allocation4 + $0xe8] sm:$0xff] }
 0xd3f   : > { %1653 = vmatpush.msra.mxu0 %v3439_v59  ;;  %1964 = vmatpush.msra.mxu2 %v3439_v59 }
 0xd41   : > { %1654 = vmatpush.msra.mxu0 %v3457_v62  ;;  %1965 = vmatpush.msra.mxu2 %v3457_v62 }
 0xd43   : > { %1655 = vmatpush.msra.mxu0 %v3463_v0  ;;  %1966 = vmatpush.msra.mxu2 %v3463_v0 }
 0xd45   : > { %1728 = vmatpush.msrb.mxu0 %v3401_v32  ;;  %2113 = vmatpush.msrb.mxu2 %v3401_v32 }
 0xd46   : > { %1455 = vperm.xlu1 %2633, %v1409_v48  }
 0xd47   : > { %1729 = vmatpush.msrb.mxu0 %v3407_v35  ;;  %2114 = vmatpush.msrb.mxu2 %v3407_v35 }
 0xd49   : > { %1730 = vmatpush.msrb.mxu0 %v3411_v7  ;;  %2115 = vmatpush.msrb.mxu2 %v3411_v7 }
 0xd4b   : > { %1731 = vmatpush.msrb.mxu0 %v3421_v53  ;;  %2116 = vmatpush.msrb.mxu2 %v3421_v53 }
 0xd4d   : > { %1732 = vmatpush.msrb.mxu0 %v3429_v57  ;;  %2117 = vmatpush.msrb.mxu2 %v3429_v57 }
 0xd4f   : > { %1733 = vmatpush.msrb.mxu0 %v3439_v59  ;;  %2118 = vmatpush.msrb.mxu2 %v3439_v59 }
 0xd51   : > { %1734 = vmatpush.msrb.mxu0 %v3457_v62  ;;  %2119 = vmatpush.msrb.mxu2 %v3457_v62 }
 0xd53   : > { %1735 = vmatpush.msrb.mxu0 %v3463_v0  ;;  %2120 = vmatpush.msrb.mxu2 %v3463_v0 }
 0xda0   : > { %v1373_v15 = vpop.permute.xlu1 %1372 }
 0xda1   : > { %v1375_v16 = vmul.f32 %v1373_v15, %v1367_v14 }
 0xda3   : > { %v1376_v22 = vadd.f32 %v1375_v16, %v1365_v60  ;;  %v3419_v60 = vld [vmem:[#allocation4 + $0x100] sm:$0xff] }
 0xda4   : > { %1631 = vmatpush.msrb.mxu3 %v3419_v60 }
 0xda5   : > { %2515 = vmatmul.msk.f32.vlgmr.msrb.gmra.mxu1 %vm1378_vm12, %v1376_v22 }
 0xda6   : > { %1939 = vmatpush.msrb.mxu1 %v3399_v19  ;;  %1632 = vmatpush.msrb.mxu3 %v3427_v5 }
 0xda8   : > { %v1431_v24 = vpop.permute.xlu1 %1430  ;;  %1940 = vmatpush.msrb.mxu1 %v3403_v34  ;;  %1633 = vmatpush.msrb.mxu3 %v3437_v56 }
 0xda9   : > { %v1460_v25 = vmul.f32 %v1431_v24, %v1412_v23 }
 0xdaa   : > { %1941 = vmatpush.msrb.mxu1 %v3409_v41  ;;  %1634 = vmatpush.msrb.mxu3 %v3455_v50 }
 0xdab   : > { %v1468_v58 = vadd.f32 %v2734_v61, %v1460_v25 }
 0xdac   : > { %1942 = vmatpush.msrb.mxu1 %v3419_v60  ;;  %1635 = vmatpush.msrb.mxu3 %v3461_v63 }
 0xdad   : > { %2516 = vmatmul.msk.f32.vlgmr.msra.gmra.mxu1 %vm571_vm0, %v1466_v45  ;;  %2526 = vmatmul.msk.f32.gmra.mxu2 %vm571_vm0, %v1468_v58 }
 0xdae   : > { %1943 = vmatpush.msrb.mxu1 %v3427_v5  ;;  %1708 = vmatpush.msra.mxu3 %v3399_v19 }
 0xdb0   : > { %v1441_v40 = vpop.permute.xlu1 %1440  ;;  %1944 = vmatpush.msrb.mxu1 %v3437_v56  ;;  %1709 = vmatpush.msra.mxu3 %v3403_v34 }
 0xdb1   : > { %v1462_v42 = vmul.f32 %v1441_v40, %v1414_v31 }
 0xdb2   : > { %1945 = vmatpush.msrb.mxu1 %v3455_v50  ;;  %1710 = vmatpush.msra.mxu3 %v3409_v41 }
 0xdb3   : > { %v1470_v8 = vadd.f32 %v2736_v39, %v1462_v42 }
 0xdb4   : > { %1946 = vmatpush.msrb.mxu1 %v3461_v63  ;;  %1711 = vmatpush.msra.mxu3 %v3419_v60 }
 0xdb5   : > { %2517 = vmatmul.msk.f32.gmra.mxu1 %vm571_vm0, %v1467_v47  ;;  %2527 = vmatmul.msk.f32.gmra.mxu2 %vm571_vm0, %v1469_v38  ;;  %v2475_v47 = vld [vmem:[%s3849_s4 + $0x2] ss:$8 sm:$0x3] }
 0xdb6   : > { %2093 = vmatpush.msra.mxu1 %v3399_v19  ;;  %1712 = vmatpush.msra.mxu3 %v3427_v5  ;;  %v3530_v14 = vperm.slane %v2475_v47, 1  ;;  %v1597_v31 = vperm.slane %v2475_v47, 0 }
 0xdb8   : > { %v1456_v54 = vpop.permute.xlu1 %1455  ;;  %2094 = vmatpush.msra.mxu1 %v3403_v34  ;;  %1713 = vmatpush.msra.mxu3 %v3437_v56 }
 0xdb9   : > { %v1465_v30 = vmul.f32 %v1456_v54, %v1417_v52 }
 0xdba   : > { %2095 = vmatpush.msra.mxu1 %v3409_v41  ;;  %1714 = vmatpush.msra.mxu3 %v3455_v50 }
 0xdbb   : > { %v1473_v48 = vadd.f32 %v2739_v51, %v1465_v30 }
 0xdbc   : > { %2096 = vmatpush.msra.mxu1 %v3419_v60  ;;  %1715 = vmatpush.msra.mxu3 %v3461_v63 }
 0xdbd   : > { %2518 = vmatmul.msk.f32.gmra.mxu1 %vm571_vm0, %v1468_v58  ;;  %2528 = vmatmul.msk.f32.gmra.mxu2 %vm571_vm0, %v1470_v8 }
 0xdbe   : > { %2097 = vmatpush.msra.mxu1 %v3427_v5 }
 0xdc0   : > { %2098 = vmatpush.msra.mxu1 %v3437_v56 }
 0xdc2   : > { %2099 = vmatpush.msra.mxu1 %v3455_v50 }
 0xdc4   : > { %2100 = vmatpush.msra.mxu1 %v3461_v63 }
 0xdc5   : > { %2519 = vmatmul.msk.f32.gmra.mxu1 %vm571_vm0, %v1469_v38  ;;  %2529 = vmatmul.msk.f32.gmra.mxu2 %vm571_vm0, %v1471_v44 }
 0xdcd   : > { %2520 = vmatmul.msk.f32.gmra.mxu1 %vm571_vm0, %v1470_v8  ;;  %2530 = vmatmul.msk.f32.gmra.mxu2 %vm571_vm0, %v1472_v20 }
 0xdd5   : > { %2521 = vmatmul.msk.f32.gmra.mxu1 %vm571_vm0, %v1471_v44  ;;  %2531 = vmatmul.msk.f32.gmra.mxu2 %vm571_vm0, %v1473_v48 }
 0xddd   : > { %2522 = vmatmul.msk.f32.gmra.mxu1 %vm571_vm0, %v1472_v20 }
 0xde5   : > { %2523 = vmatmul.msk.f32.gmra.mxu1 %vm571_vm0, %v1473_v48 }
 0xe22   : > { %v1399_v26 = vpop.f32.mrf.mxu1 }
 0xe23   : > { %v1400_v4 = vadd.f32 %v1399_v26, %v560_v12 }
 0xe25   : > { %1690 = vrot.lane.b32.xlu0 %v1400_v4, %s3865_s15  ;;  %2532 = vmatmul.msk.f32.vlgmr.msrb.gmra.mxu3 %vm719_vm7, %v1400_v4 }
 0xe26   : > { %2533 = vmatmul.msk.f32.vlgmr.msra.gmra.mxu0 %vm719_vm7, %v1400_v4  ;;  %1785 = vmatpush.msrb.mxu3 %v3399_v19 }
 0xe27   : > { %1805 = vmatpush.msra.mxu0 %v3401_v32 }
 0xe28   : > { %1786 = vmatpush.msrb.mxu3 %v3403_v34 }
 0xe29   : > { %1806 = vmatpush.msra.mxu0 %v3407_v35 }
 0xe2a   : > { %v1515_v45 = vpop.f32.mrf.mxu1  ;;  %1787 = vmatpush.msrb.mxu3 %v3409_v41 }
 0xe2b   : > { %1807 = vmatpush.msra.mxu0 %v3411_v7 }
 0xe2c   : > { %1788 = vmatpush.msrb.mxu3 %v3419_v60 }
 0xe2d   : > { %1808 = vmatpush.msra.mxu0 %v3421_v53 }
 0xe2e   : > { %1789 = vmatpush.msrb.mxu3 %v3427_v5 }
 0xe2f   : > { %1809 = vmatpush.msra.mxu0 %v3429_v57 }
 0xe30   : > { %v1562_v10 = vpop.f32.mrf.mxu2  ;;  %1790 = vmatpush.msrb.mxu3 %v3437_v56 }
 0xe31   : > { %1810 = vmatpush.msra.mxu0 %v3439_v59 }
 0xe32   : > { %v1518_v2 = vpop.f32.mrf.mxu1  ;;  %1791 = vmatpush.msrb.mxu3 %v3455_v50 }
 0xe33   : > { %1811 = vmatpush.msra.mxu0 %v3457_v62 }
 0xe34   : > { %1792 = vmatpush.msrb.mxu3 %v3461_v63 }
 0xe35   : > { %1812 = vmatpush.msra.mxu0 %v3463_v0 }
 0xe38   : > { %v1565_v13 = vpop.f32.mrf.mxu2 }
 0xe3a   : > { %v1521_v21 = vpop.f32.mrf.mxu1 }
 0xe40   : > { %v1568_v15 = vpop.f32.mrf.mxu2 }
 0xe41   : > { %v1587_v16 = vsel %vm3142_vm1, %v1565_v13, %v1568_v15  ;;  %v1589_v22 = vsel %vm3142_vm1, %v1568_v15, %v1565_v13 }
 0xe42   : > { %v1524_v61 = vpop.f32.mrf.mxu1  ;;  %v3537_v23 = vadd.f32 %v3530_v14, %v1587_v16  ;;  %v3540_v24 = vadd.f32 %v3530_v14, %v1589_v22 }
 0xe48   : > { %v1571_v25 = vpop.f32.mrf.mxu2 }
 0xe49   : > { %v1585_v28 = vsel %vm3142_vm1, %v1562_v10, %v1571_v25  ;;  %v1591_v36 = vsel %vm3142_vm1, %v1571_v25, %v1562_v10 }
 0xe4a   : > { %v1527_v29 = vpop.f32.mrf.mxu1  ;;  %v3547_v58 = vadd.f32 %v3530_v14, %v1585_v28  ;;  %v3550_v37 = vadd.f32 %v3530_v14, %v1591_v36 }
 0xe4b   : > { %v1586_v38 = vsel %vm3159_vm2, %v1524_v61, %v1527_v29  ;;  %v1588_v39 = vsel %vm3159_vm2, %v1527_v29, %v1524_v61 }
 0xe4c   : > { %v3556_v42 = vadd.f32 %v1597_v31, %v1586_v38  ;;  %v3558_v8 = vadd.f32 %v1597_v31, %v1588_v39 }
 0xe50   : > { %v1574_v40 = vpop.f32.mrf.mxu2 }
 0xe51   : > { %v1583_v46 = vsel %vm3142_vm1, %v1559_v9, %v1574_v40  ;;  %v1593_v27 = vsel %vm3142_vm1, %v1574_v40, %v1559_v9 }
 0xe52   : > { %v1530_v33 = vpop.f32.mrf.mxu1  ;;  %v3565_v43 = vadd.f32 %v3530_v14, %v1583_v46  ;;  %v3568_v44 = vadd.f32 %v3530_v14, %v1593_v27 }
 0xe53   : > { %v1584_v6 = vsel %vm3159_vm2, %v1521_v21, %v1530_v33  ;;  %v1590_v11 = vsel %vm3159_vm2, %v1530_v33, %v1521_v21 }
 0xe54   : > { %v3574_v17 = vadd.f32 %v1597_v31, %v1584_v6  ;;  %v3576_v18 = vadd.f32 %v1597_v31, %v1590_v11 }
 0xe58   : > { %v3592_v25 = vpop.f32.mrf.mxu2 }
 0xe59   : > { %v1581_v38 = vsel %vm3142_vm1, %v3503_v3, %v3592_v25 }
 0xe5a   : > { %v1533_v20 = vpop.f32.mrf.mxu1  ;;  %v1602_v27 = vadd.f32 %v3530_v14, %v1581_v38 }
 0xe5b   : > { %v1582_v51 = vsel %vm3159_vm2, %v1518_v2, %v1533_v20  ;;  %v1592_v52 = vsel %vm3159_vm2, %v1533_v20, %v1518_v2 }
 0xe5c   : > { %v3582_v54 = vadd.f32 %v1597_v31, %v1582_v51  ;;  %v3584_v30 = vadd.f32 %v1597_v31, %v1592_v52 }
 0xe62   : > { %v1536_v48 = vpop.f32.mrf.mxu1 }
 0xe63   : > { %v1594_v12 = vsel %vm3159_vm2, %v1536_v48, %v1515_v45  ;;  %v1580_v4 = vsel %vm3159_vm2, %v1515_v45, %v1536_v48 }
 0xe64   : > { %v3588_v26 = vadd.f32 %v1597_v31, %v1594_v12  ;;  %v1601_v9 = vadd.f32 %v1597_v31, %v1580_v4 }
 0xe97   : > { %v1691_v51 = vpop.permute.xlu0 %1690 }
 0xea3   : > { %v1657_v45 = vpop.f32.mrf.mxu0 }
 0xea4   : > { %v1680_v31 = vadd.f32 %v1657_v45, %v3597_v1 }
 0xea8   : > { %v1637_v10 = vpop.f32.mrf.mxu3 }
 0xea9   : > { %v1660_v13 = vadd.f32 %v1637_v10, %v1601_v9 }
 0xeab   : > { %v2534_v21 = vmul.f32 -1.442695, %v1660_v13 }
 0xead   : > { %2684 = vpow2.f32 %v2534_v21 }
 0xeb3   : > { %v2685_v47 = vpop.eup %2684 }
 0xeb4   : > { %v1664_v2 = vadd.f32 1.0, %v2685_v47 }
 0xeb6   : > { %2686 = vrcp.f32 %v1664_v2  ;;  %v1676_v61 = vand.u32 2147483648, %v1664_v2  ;;  %v1674_v36 = vand.u32 2147483647, %v1664_v2  ;;  %vm1670_vm2 = vweird.f32 %v1664_v2 }
 0xeb8   : > { %v1677_v39 = vor.u32 1.1754944e-38, %v1676_v61  ;;  %vm1675_vm15 = vcmp.eq.f32.partialorder %v1674_v36, 8.507059e+37 }
 0xebc   : > { %v2687_v15 = vpop.eup %2686 }
 0xebd   : > { %v1666_v16 = vmul.f32 %v2687_v15, %v1664_v2  ;;  %vm1671_vm13 = vweird.f32 %v2687_v15 }
 0xebe   : > { %vm1672_vm14 = vmor %vm1670_vm2, %vm1671_vm13 }
 0xebf   : > { %v1667_v22 = vsub.f32 1.0, %v1666_v16 }
 0xec1   : > { %v1668_v28 = vmul.f32 %v2687_v15, %v1667_v22 }
 0xec3   : > { %v1669_v29 = vadd.f32 %v2687_v15, %v1668_v28 }
 0xec5   : > { %v1673_v40 = vsel %vm1672_vm14, %v2687_v15, %v1669_v29 }
 0xec6   : > { %v1678_v46 = vsel %vm1675_vm15, %v1677_v39, %v1673_v40 }
 0xec7   : > { %v1681_v33 = vmul.f32 %v1680_v31, %v1678_v46  ;;  %v1684_v20 = vsub.f32 1.0, %v1678_v46  ;;  %v1693_v48 = vmul.f32 %v1691_v51, %v1678_v46 }
 0xec9   : > { %v1682_v6 = vadd.f32 %v1681_v33, %v1602_v27 }
 0xecb   : > { %2688 = vtanh.f32 %v1682_v6 }
 0xed1   : > { %v2689_v11 = vpop.eup %2688 }
 0xed2   : > { %1686 = vrot.lane.b32.xlu2 %v2689_v11, %s3865_s15 }
 0xf2c   : > { %v1687_v52 = vpop.permute.xlu2 %1686 }
 0xf2d   : > { %v1689_v12 = vmul.f32 %v1687_v52, %v1684_v20 }
 0xf2f   : > { %v1694_v4 = vadd.f32 %v1693_v48, %v1689_v12 }
 0xf31   : > { %1696 = vrot.lane.b32.xlu1 %v1694_v4, %s3865_s15 }
 0xfa3   : > { %v3607_v9 = vpop.permute.xlu1 %1696 }
 0xfa4   : > { %2535 = vmatmul.msk.f32.vlgmr.msra.gmra.mxu3 %vm719_vm7, %v3607_v9  ;;  %2536 = vmatmul.msk.f32.vlgmr.msrb.gmra.mxu0 %vm719_vm7, %v3607_v9 }
 0xfa5   : > { %1862 = vmatpush.msra.mxu3 %v3399_v19  ;;  %1882 = vmatpush.msrb.mxu0 %v3401_v32 }
 0xfa7   : > { %1863 = vmatpush.msra.mxu3 %v3403_v34  ;;  %1883 = vmatpush.msrb.mxu0 %v3407_v35 }
 0xfa9   : > { %1864 = vmatpush.msra.mxu3 %v3409_v41  ;;  %1884 = vmatpush.msrb.mxu0 %v3411_v7 }
 0xfab   : > { %1865 = vmatpush.msra.mxu3 %v3419_v60  ;;  %1885 = vmatpush.msrb.mxu0 %v3421_v53 }
 0xfad   : > { %1866 = vmatpush.msra.mxu3 %v3427_v5  ;;  %1886 = vmatpush.msrb.mxu0 %v3429_v57 }
 0xfaf   : > { %1867 = vmatpush.msra.mxu3 %v3437_v56  ;;  %1887 = vmatpush.msrb.mxu0 %v3439_v59 }
 0xfb1   : > { %1868 = vmatpush.msra.mxu3 %v3455_v50  ;;  %1888 = vmatpush.msrb.mxu0 %v3457_v62 }
 0xfb3   : > { %1869 = vmatpush.msra.mxu3 %v3461_v63  ;;  %1889 = vmatpush.msrb.mxu0 %v3463_v0 }
0x1021   : > { %v1737_v45 = vpop.f32.mrf.mxu0 }
0x1022   : > { %v1760_v39 = vadd.f32 %v1737_v45, %v3597_v1 }
0x1027   : > { %v1717_v10 = vpop.f32.mrf.mxu3 }
0x1028   : > { %v1740_v13 = vadd.f32 %v1717_v10, %v3582_v54 }
0x102a   : > { %v2537_v21 = vmul.f32 -1.442695, %v1740_v13 }
0x102c   : > { %2690 = vpow2.f32 %v2537_v21 }
0x1032   : > { %v2691_v47 = vpop.eup %2690 }
0x1033   : > { %v1744_v2 = vadd.f32 1.0, %v2691_v47 }
0x1035   : > { %2692 = vrcp.f32 %v1744_v2  ;;  %v1756_v61 = vand.u32 2147483648, %v1744_v2  ;;  %v1754_v36 = vand.u32 2147483647, %v1744_v2  ;;  %vm1750_vm4 = vweird.f32 %v1744_v2 }
0x1037   : > { %v1757_v38 = vor.u32 1.1754944e-38, %v1756_v61  ;;  %vm1755_vm6 = vcmp.eq.f32.partialorder %v1754_v36, 8.507059e+37 }
0x103b   : > { %v2693_v15 = vpop.eup %2692 }
0x103c   : > { %v1746_v16 = vmul.f32 %v2693_v15, %v1744_v2  ;;  %vm1751_vm3 = vweird.f32 %v2693_v15 }
0x103d   : > { %vm1752_vm5 = vmor %vm1750_vm4, %vm1751_vm3 }
0x103e   : > { %v1747_v22 = vsub.f32 1.0, %v1746_v16 }
0x1040   : > { %v1748_v28 = vmul.f32 %v2693_v15, %v1747_v22 }
0x1042   : > { %v1749_v29 = vadd.f32 %v2693_v15, %v1748_v28 }
0x1044   : > { %v1753_v54 = vsel %vm1752_vm5, %v2693_v15, %v1749_v29 }
0x1045   : > { %v1758_v31 = vsel %vm1755_vm6, %v1757_v38, %v1753_v54 }
0x1046   : > { %v1761_v40 = vmul.f32 %v1760_v39, %v1758_v31  ;;  %v1764_v33 = vsub.f32 1.0, %v1758_v31  ;;  %v1770_v11 = vmul.f32 %v1758_v31, %v1694_v4 }
0x1048   : > { %v1762_v46 = vadd.f32 %v1761_v40, %v3565_v43 }
0x104a   : > { %2694 = vtanh.f32 %v1762_v46 }
0x1050   : > { %v2695_v27 = vpop.eup %2694 }
0x1051   : > { %1766 = vrot.lane.b32.xlu2 %v2695_v27, %s3865_s15 }
0x10ab   : > { %v1767_v6 = vpop.permute.xlu2 %1766 }
0x10ac   : > { %v1769_v20 = vmul.f32 %v1767_v6, %v1764_v33 }
0x10ae   : > { %v1771_v51 = vadd.f32 %v1770_v11, %v1769_v20 }
0x10b0   : > { %1773 = vrot.lane.b32.xlu0 %v1771_v51, %s3865_s15 }
0x1122   : > { %v3634_v52 = vpop.permute.xlu0 %1773 }
0x1123   : > { %2538 = vmatmul.msk.f32.vlgmr.msrb.gmra.mxu3 %vm719_vm7, %v3634_v52  ;;  %2539 = vmatmul.msk.f32.vlgmr.msra.gmra.mxu0 %vm719_vm7, %v3634_v52 }
0x1124   : > { %2016 = vmatpush.msrb.mxu3 %v3399_v19  ;;  %2036 = vmatpush.msra.mxu0 %v3401_v32 }
0x1126   : > { %2017 = vmatpush.msrb.mxu3 %v3403_v34  ;;  %2037 = vmatpush.msra.mxu0 %v3407_v35 }
0x1128   : > { %2018 = vmatpush.msrb.mxu3 %v3409_v41  ;;  %2038 = vmatpush.msra.mxu0 %v3411_v7 }
0x112a   : > { %2019 = vmatpush.msrb.mxu3 %v3419_v60  ;;  %2039 = vmatpush.msra.mxu0 %v3421_v53 }
0x112c   : > { %2020 = vmatpush.msrb.mxu3 %v3427_v5  ;;  %2040 = vmatpush.msra.mxu0 %v3429_v57 }
0x112e   : > { %2021 = vmatpush.msrb.mxu3 %v3437_v56  ;;  %2041 = vmatpush.msra.mxu0 %v3439_v59 }
0x1130   : > { %2022 = vmatpush.msrb.mxu3 %v3455_v50  ;;  %2042 = vmatpush.msra.mxu0 %v3457_v62 }
0x1132   : > { %2023 = vmatpush.msrb.mxu3 %v3461_v63  ;;  %2043 = vmatpush.msra.mxu0 %v3463_v0 }
0x11a0   : > { %v1814_v22 = vpop.f32.mrf.mxu0 }
0x11a1   : > { %v1837_v36 = vadd.f32 %v1814_v22, %v3597_v1 }
0x11a6   : > { %v1794_v43 = vpop.f32.mrf.mxu3 }
0x11a7   : > { %v1817_v48 = vadd.f32 %v1794_v43, %v3574_v17 }
0x11a9   : > { %v2540_v12 = vmul.f32 -1.442695, %v1817_v48 }
0x11ab   : > { %2696 = vpow2.f32 %v2540_v12 }
0x11b1   : > { %v2697_v4 = vpop.eup %2696 }
0x11b2   : > { %v1821_v10 = vadd.f32 1.0, %v2697_v4 }
0x11b4   : > { %2698 = vrcp.f32 %v1821_v10  ;;  %v1833_v2 = vand.u32 2147483648, %v1821_v10  ;;  %v1831_v16 = vand.u32 2147483647, %v1821_v10  ;;  %vm1827_vm9 = vweird.f32 %v1821_v10 }
0x11b6   : > { %v1834_v28 = vor.u32 1.1754944e-38, %v1833_v2  ;;  %vm1832_vm11 = vcmp.eq.f32.partialorder %v1831_v16, 8.507059e+37 }
0x11ba   : > { %v2699_v13 = vpop.eup %2698 }
0x11bb   : > { %v1823_v21 = vmul.f32 %v2699_v13, %v1821_v10  ;;  %vm1828_vm8 = vweird.f32 %v2699_v13 }
0x11bc   : > { %vm1829_vm10 = vmor %vm1827_vm9, %vm1828_vm8 }
0x11bd   : > { %v1824_v47 = vsub.f32 1.0, %v1823_v21 }
0x11bf   : > { %v1825_v15 = vmul.f32 %v2699_v13, %v1824_v47 }
0x11c1   : > { %v1826_v61 = vadd.f32 %v2699_v13, %v1825_v15 }
0x11c3   : > { %v1830_v17 = vsel %vm1829_vm10, %v2699_v13, %v1826_v61 }
0x11c4   : > { %v1835_v45 = vsel %vm1832_vm11, %v1834_v28, %v1830_v17 }
0x11c5   : > { %v1838_v29 = vmul.f32 %v1837_v36, %v1835_v45  ;;  %v1841_v54 = vsub.f32 1.0, %v1835_v45  ;;  %v1847_v40 = vmul.f32 %v1835_v45, %v1771_v51 }
0x11c7   : > { %v1839_v38 = vadd.f32 %v1838_v29, %v3547_v58 }
0x11c9   : > { %2700 = vtanh.f32 %v1839_v38 }
0x11cf   : > { %v2701_v39 = vpop.eup %2700 }
0x11d0   : > { %1843 = vrot.lane.b32.xlu1 %v2701_v39, %s3865_s15 }
0x1242   : > { %v1844_v31 = vpop.permute.xlu1 %1843 }
0x1243   : > { %v1846_v46 = vmul.f32 %v1844_v31, %v1841_v54 }
0x1245   : > { %v1848_v27 = vadd.f32 %v1847_v40, %v1846_v46 }
0x1247   : > { %1850 = vrot.lane.b32.xlu2 %v1848_v27, %s3865_s15 }
0x12a1   : > { %v3661_v33 = vpop.permute.xlu2 %1850 }
0x12a2   : > { %2541 = vmatmul.msk.f32.vlgmr.msra.gmra.mxu3 %vm719_vm7, %v3661_v33  ;;  %2542 = vmatmul.msk.f32.vlgmr.msrb.gmra.mxu0 %vm719_vm7, %v3661_v33 }
0x12a3   : > { %2170 = vmatpush.msra.mxu3 %v3399_v19  ;;  %2190 = vmatpush.msrb.mxu0 %v3401_v32 }
0x12a5   : > { %2171 = vmatpush.msra.mxu3 %v3403_v34  ;;  %2191 = vmatpush.msrb.mxu0 %v3407_v35 }
0x12a7   : > { %2172 = vmatpush.msra.mxu3 %v3409_v41  ;;  %2192 = vmatpush.msrb.mxu0 %v3411_v7 }
0x12a9   : > { %2173 = vmatpush.msra.mxu3 %v3419_v60  ;;  %2193 = vmatpush.msrb.mxu0 %v3421_v53 }
0x12ab   : > { %2174 = vmatpush.msra.mxu3 %v3427_v5  ;;  %2194 = vmatpush.msrb.mxu0 %v3429_v57 }
0x12ad   : > { %2175 = vmatpush.msra.mxu3 %v3437_v56  ;;  %2195 = vmatpush.msrb.mxu0 %v3439_v59 }
0x12af   : > { %2176 = vmatpush.msra.mxu3 %v3455_v50  ;;  %2196 = vmatpush.msrb.mxu0 %v3457_v62 }
0x12b1   : > { %2177 = vmatpush.msra.mxu3 %v3461_v63  ;;  %2197 = vmatpush.msrb.mxu0 %v3463_v0 }
0x131f   : > { %v1891_v59 = vpop.f32.mrf.mxu0 }
0x1320   : > { %v1914_v63 = vadd.f32 %v1891_v59, %v3597_v1 }
0x1325   : > { %v1871_v19 = vpop.f32.mrf.mxu3 }
0x1326   : > { %v1894_v32 = vadd.f32 %v1871_v19, %v3556_v42 }
0x1328   : > { %v2543_v34 = vmul.f32 -1.442695, %v1894_v32 }
0x132a   : > { %2702 = vpow2.f32 %v2543_v34 }
0x1330   : > { %v2703_v35 = vpop.eup %2702 }
0x1331   : > { %v1898_v41 = vadd.f32 1.0, %v2703_v35 }
0x1333   : > { %2704 = vrcp.f32 %v1898_v41  ;;  %v1910_v5 = vand.u32 2147483648, %v1898_v41  ;;  %v1908_v56 = vand.u32 2147483647, %v1898_v41  ;;  %vm1904_vm13 = vweird.f32 %v1898_v41 }
0x1335   : > { %v1911_v62 = vor.u32 1.1754944e-38, %v1910_v5  ;;  %vm1909_vm14 = vcmp.eq.f32.partialorder %v1908_v56, 8.507059e+37 }
0x1339   : > { %v2705_v7 = vpop.eup %2704 }
0x133a   : > { %v1900_v60 = vmul.f32 %v2705_v7, %v1898_v41  ;;  %vm1905_vm12 = vweird.f32 %v2705_v7 }
0x133b   : > { %vm1906_vm2 = vmor %vm1904_vm13, %vm1905_vm12 }
0x133c   : > { %v1901_v53 = vsub.f32 1.0, %v1900_v60 }
0x133e   : > { %v1902_v57 = vmul.f32 %v2705_v7, %v1901_v53 }
0x1340   : > { %v1903_v50 = vadd.f32 %v2705_v7, %v1902_v57 }
0x1342   : > { %v1907_v0 = vsel %vm1906_vm2, %v2705_v7, %v1903_v50 }
0x1343   : > { %v1912_v58 = vsel %vm1909_vm14, %v1911_v62, %v1907_v0 }
0x1344   : > { %v1915_v42 = vmul.f32 %v1914_v63, %v1912_v58  ;;  %v1918_v20 = vsub.f32 1.0, %v1912_v58  ;;  %v1924_v43 = vmul.f32 %v1912_v58, %v1848_v27 }
0x1346   : > { %v1916_v6 = vadd.f32 %v1915_v42, %v3537_v23 }
0x1348   : > { %2706 = vtanh.f32 %v1916_v6 }
0x134e   : > { %v2707_v11 = vpop.eup %2706 }
0x134f   : > { %1920 = vrot.lane.b32.xlu0 %v2707_v11, %s3865_s15 }
0x13c1   : > { %v1921_v51 = vpop.permute.xlu0 %1920 }
0x13c2   : > { %v1923_v48 = vmul.f32 %v1921_v51, %v1918_v20 }
0x13c4   : > { %v1925_v12 = vadd.f32 %v1924_v43, %v1923_v48 }
0x13c6   : > { %1927 = vrot.lane.b32.xlu1 %v1925_v12, %s3865_s15 }
0x1438   : > { %v3688_v4 = vpop.permute.xlu1 %1927 }
0x1439   : > { %2544 = vmatmul.msk.f32.vlgmr.msrb.gmra.mxu1 %vm719_vm7, %v3688_v4  ;;  %2545 = vmatmul.msk.f32.vlgmr.msra.gmra.mxu2 %vm719_vm7, %v3688_v4 }
0x143a   : > { %2295 = vmatpush.msrb.mxu1 %v2262_v55 }
0x14b6   : > { %v1948_v23 = vpop.f32.mrf.mxu1 }
0x14b7   : > { %v1971_v10 = vadd.f32 %v1948_v23, %v3558_v8 }
0x14b9   : > { %v2546_v13 = vmul.f32 -1.442695, %v1971_v10 }
0x14bb   : > { %2708 = vpow2.f32 %v2546_v13 }
0x14bc   : > { %v1968_v36 = vpop.f32.mrf.mxu2 }
0x14bd   : > { %v1991_v8 = vadd.f32 %v1968_v36, %v3597_v1 }
0x14c1   : > { %v2709_v21 = vpop.eup %2708 }
0x14c2   : > { %v1975_v47 = vadd.f32 1.0, %v2709_v21 }
0x14c4   : > { %2710 = vrcp.f32 %v1975_v47  ;;  %v1987_v22 = vand.u32 2147483648, %v1975_v47  ;;  %v1985_v28 = vand.u32 2147483647, %v1975_v47  ;;  %vm1981_vm3 = vweird.f32 %v1975_v47 }
0x14c6   : > { %v1988_v45 = vor.u32 1.1754944e-38, %v1987_v22  ;;  %vm1986_vm5 = vcmp.eq.f32.partialorder %v1985_v28, 8.507059e+37 }
0x14ca   : > { %v2711_v2 = vpop.eup %2710 }
0x14cb   : > { %v1977_v15 = vmul.f32 %v2711_v2, %v1975_v47  ;;  %vm1982_vm15 = vweird.f32 %v2711_v2 }
0x14cc   : > { %vm1983_vm4 = vmor %vm1981_vm3, %vm1982_vm15 }
0x14cd   : > { %v1978_v16 = vsub.f32 1.0, %v1977_v15 }
0x14cf   : > { %v1979_v61 = vmul.f32 %v2711_v2, %v1978_v16 }
0x14d1   : > { %v1980_v17 = vadd.f32 %v2711_v2, %v1979_v61 }
0x14d3   : > { %v1984_v29 = vsel %vm1983_vm4, %v2711_v2, %v1980_v17 }
0x14d4   : > { %v1989_v38 = vsel %vm1986_vm5, %v1988_v45, %v1984_v29 }
0x14d5   : > { %v1992_v39 = vmul.f32 %v1991_v8, %v1989_v38  ;;  %v1995_v40 = vsub.f32 1.0, %v1989_v38  ;;  %v2001_v27 = vmul.f32 %v1989_v38, %v1925_v12 }
0x14d7   : > { %v1993_v54 = vadd.f32 %v1992_v39, %v3540_v24 }
0x14d9   : > { %2712 = vtanh.f32 %v1993_v54 }
0x14df   : > { %v2713_v31 = vpop.eup %2712 }
0x14e0   : > { %1997 = vrot.lane.b32.xlu2 %v2713_v31, %s3865_s15 }
0x153a   : > { %v1998_v46 = vpop.permute.xlu2 %1997 }
0x153b   : > { %v2000_v19 = vmul.f32 %v1998_v46, %v1995_v40 }
0x153d   : > { %v2002_v32 = vadd.f32 %v2001_v27, %v2000_v19 }
0x153f   : > { %2004 = vrot.lane.b32.xlu0 %v2002_v32, %s3865_s15 }
0x15b1   : > { %v3699_v34 = vpop.permute.xlu0 %2004 }
0x15b2   : > { %2547 = vmatmul.msk.f32.vlgmr.msrb.gmra.mxu3 %vm719_vm7, %v3699_v34  ;;  %2548 = vmatmul.msk.f32.vlgmr.msra.gmra.mxu0 %vm719_vm7, %v3699_v34 }
0x162f   : > { %v2045_v62 = vpop.f32.mrf.mxu0 }
0x1630   : > { %v2068_v58 = vadd.f32 %v2045_v62, %v3597_v1 }
0x1635   : > { %v2025_v24 = vpop.f32.mrf.mxu3 }
0x1636   : > { %v2048_v35 = vadd.f32 %v2025_v24, %v3576_v18 }
0x1638   : > { %v2549_v41 = vmul.f32 -1.442695, %v2048_v35 }
0x163a   : > { %2714 = vpow2.f32 %v2549_v41 }
0x1640   : > { %v2715_v7 = vpop.eup %2714 }
0x1641   : > { %v2052_v60 = vadd.f32 1.0, %v2715_v7 }
0x1643   : > { %2716 = vrcp.f32 %v2052_v60  ;;  %v2064_v56 = vand.u32 2147483648, %v2052_v60  ;;  %v2062_v50 = vand.u32 2147483647, %v2052_v60  ;;  %vm2058_vm8 = vweird.f32 %v2052_v60 }
0x1645   : > { %v2065_v0 = vor.u32 1.1754944e-38, %v2064_v56  ;;  %vm2063_vm10 = vcmp.eq.f32.partialorder %v2062_v50, 8.507059e+37 }
0x1649   : > { %v2717_v53 = vpop.eup %2716 }
0x164a   : > { %v2054_v5 = vmul.f32 %v2717_v53, %v2052_v60  ;;  %vm2059_vm6 = vweird.f32 %v2717_v53 }
0x164b   : > { %vm2060_vm9 = vmor %vm2058_vm8, %vm2059_vm6 }
0x164c   : > { %v2055_v57 = vsub.f32 1.0, %v2054_v5 }
0x164e   : > { %v2056_v59 = vmul.f32 %v2717_v53, %v2055_v57 }
0x1650   : > { %v2057_v63 = vadd.f32 %v2717_v53, %v2056_v59 }
0x1652   : > { %v2061_v18 = vsel %vm2060_vm9, %v2717_v53, %v2057_v63 }
0x1653   : > { %v2066_v42 = vsel %vm2063_vm10, %v2065_v0, %v2061_v18 }
0x1654   : > { %v2069_v6 = vmul.f32 %v2068_v58, %v2066_v42  ;;  %v2072_v51 = vsub.f32 1.0, %v2066_v42  ;;  %v2078_v48 = vmul.f32 %v2066_v42, %v2002_v32 }
0x1656   : > { %v2070_v11 = vadd.f32 %v2069_v6, %v3550_v37 }
0x1658   : > { %2718 = vtanh.f32 %v2070_v11 }
0x165e   : > { %v2719_v20 = vpop.eup %2718 }
0x165f   : > { %2074 = vrot.lane.b32.xlu1 %v2719_v20, %s3865_s15 }
0x16d1   : > { %v2075_v43 = vpop.permute.xlu1 %2074 }
0x16d2   : > { %v2077_v12 = vmul.f32 %v2075_v43, %v2072_v51  ;;  %v2257_v43 = vld [vmem:[%s3852_s7 + $0x10] sm:$0xff] }
0x16d4   : > { %v2079_v23 = vadd.f32 %v2078_v48, %v2077_v12  ;;  %v2256_v48 = vld [vmem:[%s3852_s7 + $0x8] sm:$0xff] }
0x16d6   : > { %2081 = vrot.lane.b32.xlu2 %v2079_v23, %s3865_s15 }
0x1730   : > { %v3710_v10 = vpop.permute.xlu2 %2081 }
0x1731   : > { %2550 = vmatmul.msk.f32.vlgmr.msra.gmra.mxu1 %vm719_vm7, %v3710_v10  ;;  %2551 = vmatmul.msk.f32.vlgmr.msrb.gmra.mxu2 %vm719_vm7, %v3710_v10 }
0x17ae   : > { %v2102_v37 = vpop.f32.mrf.mxu1 }
0x17af   : > { %v2125_v13 = vadd.f32 %v2102_v37, %v3584_v30 }
0x17b1   : > { %v2552_v21 = vmul.f32 -1.442695, %v2125_v13 }
0x17b3   : > { %2720 = vpow2.f32 %v2552_v21 }
0x17b4   : > { %v2122_v17 = vpop.f32.mrf.mxu2 }
0x17b5   : > { %v2145_v30 = vadd.f32 %v2122_v17, %v3597_v1 }
0x17b9   : > { %v2721_v47 = vpop.eup %2720 }
0x17ba   : > { %v2129_v2 = vadd.f32 1.0, %v2721_v47  ;;  %v2255_v47 = vld [vmem:[%s3852_s7] sm:$0xff] }
0x17bc   : > { %2722 = vrcp.f32 %v2129_v2  ;;  %v2141_v61 = vand.u32 2147483648, %v2129_v2  ;;  %v2139_v36 = vand.u32 2147483647, %v2129_v2  ;;  %vm2135_vm12 = vweird.f32 %v2129_v2 }
0x17be   : > { %v2142_v29 = vor.u32 1.1754944e-38, %v2141_v61  ;;  %vm2140_vm2 = vcmp.eq.f32.partialorder %v2139_v36, 8.507059e+37 }
0x17c2   : > { %v2723_v15 = vpop.eup %2722 }
0x17c3   : > { %v2131_v16 = vmul.f32 %v2723_v15, %v2129_v2  ;;  %vm2136_vm11 = vweird.f32 %v2723_v15 }
0x17c4   : > { %vm2137_vm13 = vmor %vm2135_vm12, %vm2136_vm11 }
0x17c5   : > { %v2132_v22 = vsub.f32 1.0, %v2131_v16 }
0x17c7   : > { %v2133_v28 = vmul.f32 %v2723_v15, %v2132_v22 }
0x17c9   : > { %v2134_v45 = vadd.f32 %v2723_v15, %v2133_v28 }
0x17cb   : > { %v2138_v8 = vsel %vm2137_vm13, %v2723_v15, %v2134_v45 }
0x17cc   : > { %v2143_v38 = vsel %vm2140_vm2, %v2142_v29, %v2138_v8 }
0x17cd   : > { %v2146_v39 = vmul.f32 %v2145_v30, %v2143_v38  ;;  %v2149_v40 = vsub.f32 1.0, %v2143_v38  ;;  %v2155_v27 = vmul.f32 %v2143_v38, %v2079_v23 }
0x17cf   : > { %v2147_v54 = vadd.f32 %v2146_v39, %v3568_v44 }
0x17d1   : > { %2724 = vtanh.f32 %v2147_v54 }
0x17d7   : > { %v2725_v31 = vpop.eup %2724 }
0x17d8   : > { %2151 = vrot.lane.b32.xlu0 %v2725_v31, %s3865_s15 }
0x184a   : > { %v2152_v46 = vpop.permute.xlu0 %2151 }
0x184b   : > { %v2154_v19 = vmul.f32 %v2152_v46, %v2149_v40 }
0x184d   : > { %v2156_v32 = vadd.f32 %v2155_v27, %v2154_v19 }
0x184f   : > { %2158 = vrot.lane.b32.xlu1 %v2156_v32, %s3865_s15 }
0x18c1   : > { %v3721_v24 = vpop.permute.xlu1 %2158 }
0x18c2   : > { %2553 = vmatmul.msk.f32.vlgmr.msra.gmra.mxu3 %vm719_vm7, %v3721_v24  ;;  %2554 = vmatmul.msk.f32.vlgmr.msrb.gmra.mxu0 %vm719_vm7, %v3721_v24 }
0x193f   : > { %v2199_v62 = vpop.f32.mrf.mxu0 }
0x1940   : > { %v2222_v58 = vadd.f32 %v2199_v62, %v3597_v1  ;;  %v2258_v1 = vld [vmem:[%s3852_s7 + $0x18] sm:$0xff] }
0x1945   : > { %v2179_v44 = vpop.f32.mrf.mxu3 }
0x1946   : > { %v2202_v35 = vadd.f32 %v2179_v44, %v3588_v26  ;;  %v1595_v26 = vsel %vm3142_vm1, %v3592_v25, %v3503_v3  ;;  %v2261_v3 = vld [vmem:[%s3852_s7 + $0x30] sm:$0xff]  ;;  %v2260_v25 = vld [vmem:[%s3852_s7 + $0x28] sm:$0xff]  ;;  %vm513_vm1 = vcmp.lt.s32.totalorder %v3136_v49, 32 }
0x1947   : > { %v1616_v6 = vadd.f32 %v3530_v14, %v1595_v26  ;;  %2296 = vmatpush.msrb.mxu1 %v2261_v3  ;;  %v2259_v14 = vld [vmem:[%s3852_s7 + $0x20] sm:$0xff]  ;;  %v2248_v16 = vsel %vm513_vm1, %v3634_v52, %v3721_v24  ;;  %v2249_v22 = vsel %vm513_vm1, %v3661_v33, %v3710_v10  ;;  %v2250_v61 = vsel %vm513_vm1, %v3688_v4, %v3699_v34 }
0x1948   : > { %v2555_v41 = vmul.f32 -1.442695, %v2202_v35  ;;  %v2251_v28 = vsel %vm513_vm1, %v3699_v34, %v3688_v4  ;;  %v2252_v36 = vsel %vm513_vm1, %v3710_v10, %v3661_v33  ;;  %v2253_v17 = vsel %vm513_vm1, %v3721_v24, %v3634_v52  ;;  %v561_v34 = vld [vmem:[%s3849_s4 + $0x6] ss:$0 sm:$0xff] }
0x1949   : > { %2297 = vmatpush.msrb.mxu1 %v2260_v25 }
0x194a   : > { %2726 = vpow2.f32 %v2555_v41 }
0x194b   : > { %2298 = vmatpush.msrb.mxu1 %v2259_v14 }
0x194d   : > { %2299 = vmatpush.msrb.mxu1 %v2258_v1 }
0x194f   : > { %2300 = vmatpush.msrb.mxu1 %v2257_v43 }
0x1950   : > { %v2727_v7 = vpop.eup %2726 }
0x1951   : > { %v2206_v60 = vadd.f32 1.0, %v2727_v7  ;;  %2301 = vmatpush.msrb.mxu1 %v2256_v48 }
0x1953   : > { %2728 = vrcp.f32 %v2206_v60  ;;  %v2218_v56 = vand.u32 2147483648, %v2206_v60  ;;  %v2216_v50 = vand.u32 2147483647, %v2206_v60  ;;  %vm2212_vm15 = vweird.f32 %v2206_v60  ;;  %2302 = vmatpush.msrb.mxu1 %v2255_v47 }
0x1955   : > { %v2219_v0 = vor.u32 1.1754944e-38, %v2218_v56  ;;  %vm2217_vm4 = vcmp.eq.f32.partialorder %v2216_v50, 8.507059e+37 }
0x1959   : > { %v2729_v53 = vpop.eup %2728 }
0x195a   : > { %v2208_v5 = vmul.f32 %v2729_v53, %v2206_v60  ;;  %vm2213_vm14 = vweird.f32 %v2729_v53 }
0x195b   : > { %vm2214_vm3 = vmor %vm2212_vm15, %vm2213_vm14 }
0x195c   : > { %v2209_v57 = vsub.f32 1.0, %v2208_v5 }
0x195e   : > { %v2210_v59 = vmul.f32 %v2729_v53, %v2209_v57 }
0x1960   : > { %v2211_v63 = vadd.f32 %v2729_v53, %v2210_v59 }
0x1962   : > { %v2215_v18 = vsel %vm2214_vm3, %v2729_v53, %v2211_v63 }
0x1963   : > { %v2220_v42 = vsel %vm2217_vm4, %v2219_v0, %v2215_v18 }
0x1964   : > { %v2223_v11 = vmul.f32 %v2222_v58, %v2220_v42  ;;  %v2226_v12 = vsub.f32 1.0, %v2220_v42  ;;  %v2232_v37 = vmul.f32 %v2220_v42, %v2156_v32 }
0x1966   : > { %v2224_v20 = vadd.f32 %v2223_v11, %v1616_v6 }
0x1968   : > { %2730 = vtanh.f32 %v2224_v20 }
0x196e   : > { %v2731_v51 = vpop.eup %2730 }
0x196f   : > { %2228 = vrot.lane.b32.xlu2 %v2731_v51, %s3865_s15 }
0x19c9   : > { %v2229_v23 = vpop.permute.xlu2 %2228 }
0x19ca   : > { %v2231_v13 = vmul.f32 %v2229_v23, %v2226_v12 }
0x19cc   : > { %v2233_v21 = vadd.f32 %v2232_v37, %v2231_v13 }
0x19ce   : > { %2237 = vrot.lane.b32.xlu0 %v2233_v21, %s3865_s15 }
0x1a40   : > { %v2238_v2 = vpop.permute.xlu0 %2237 }
0x1a41   : > { %v2247_v15 = vsel %vm513_vm1, %v3607_v9, %v2238_v2  ;;  %v2254_v4 = vsel %vm513_vm1, %v2238_v2, %v3607_v9 }
0x1a42   : > { %2556 = vmatmul.msk.f32.vlgmr.msrb.gmra.mxu1 %vm719_vm7, %v2247_v15 }
0x1a4a   : > { %2557 = vmatmul.msk.f32.gmra.mxu1 %vm719_vm7, %v2248_v16 }
0x1a52   : > { %2558 = vmatmul.msk.f32.gmra.mxu1 %vm719_vm7, %v2249_v22 }
0x1a5a   : > { %2559 = vmatmul.msk.f32.gmra.mxu1 %vm719_vm7, %v2250_v61 }
0x1a62   : > { %2560 = vmatmul.msk.f32.gmra.mxu1 %vm719_vm7, %v2251_v28 }
0x1a6a   : > { %2561 = vmatmul.msk.f32.gmra.mxu1 %vm719_vm7, %v2252_v36 }
0x1a72   : > { %2562 = vmatmul.msk.f32.gmra.mxu1 %vm719_vm7, %v2253_v17 }
0x1a7a   : > { %2563 = vmatmul.msk.f32.gmra.mxu1 %vm719_vm7, %v2254_v4 }
0x1abf   : > { %v2304_v33 = vpop.f32.mrf.mxu1 }
0x1ac0   : > { %v2305_v10 = vadd.f32 %v2304_v33, %v561_v34 }
0x1ac2   : > { %2328 = vst.msk [vmem:[%s479_s23] sm:$0xff] %vm571_vm0, %v2305_v10 }
0x1ac7   : > { %v2307_v45 = vpop.f32.mrf.mxu1 }
0x1ac8   : > { %v2308_v52 = vadd.f32 %v2307_v45, %v561_v34 }
0x1aca   : > { %2329 = vst.msk [vmem:[%s479_s23 + $0x8] sm:$0xff] %vm571_vm0, %v2308_v52 }
0x1acf   : > { %v2310_v29 = vpop.f32.mrf.mxu1 }
0x1ad0   : > { %v2311_v8 = vadd.f32 %v2310_v29, %v561_v34 }
0x1ad2   : > { %2330 = vst.msk [vmem:[%s479_s23 + $0x10] sm:$0xff] %vm571_vm0, %v2311_v8 }
0x1ad7   : > { %v2313_v49 = vpop.f32.mrf.mxu1 }
0x1ad8   : > { %v2314_v9 = vadd.f32 %v2313_v49, %v561_v34 }
0x1ada   : > { %2331 = vst.msk [vmem:[%s479_s23 + $0x18] sm:$0xff] %vm571_vm0, %v2314_v9 }
0x1adf   : > { %v2316_v30 = vpop.f32.mrf.mxu1 }
0x1ae0   : > { %v2317_v38 = vadd.f32 %v2316_v30, %v561_v34 }
0x1ae2   : > { %2332 = vst.msk [vmem:[%s479_s23 + $0x20] sm:$0xff] %vm571_vm0, %v2317_v38 }
0x1ae7   : > { %v2319_v39 = vpop.f32.mrf.mxu1 }
0x1ae8   : > { %v2320_v54 = vadd.f32 %v2319_v39, %v561_v34 }
0x1aea   : > { %2333 = vst.msk [vmem:[%s479_s23 + $0x28] sm:$0xff] %vm571_vm0, %v2320_v54 }
0x1aef   : > { %v2322_v31 = vpop.f32.mrf.mxu1 }
0x1af0   : > { %v2323_v40 = vadd.f32 %v2322_v31, %v561_v34 }
0x1af2   : > { %2334 = vst.msk [vmem:[%s479_s23 + $0x30] sm:$0xff] %vm571_vm0, %v2323_v40 }
0x1af7   : > { %v2325_v46 = vpop.f32.mrf.mxu1 }
0x1af8   : > { %v2326_v27 = vadd.f32 %v2325_v46, %v561_v34 }
0x1afa   : > { %2335 = vst.msk [vmem:[%s479_s23 + $0x38] sm:$0xff] %vm571_vm0, %v2326_v27 }
0x1afb   : > { %2797 = shalt.err (!%p2794_p11)
}
0x1afc   : > { %s2845_s23 = smov 128   ;;  %s2846_s26 = smov 256  }
0x1afd   : > { %s2847_s10 = smov 8  }
0x1afe   : > { %2576 = dma.vmem_to_hbm [thread:$0]  (%p2936_p6), %s2349_s12, 1024, %s2351_s20, %s2337_s21, %s2845_s23, %s2846_s26, %s2847_s10  }
0x1aff PF: > { %s2365_s18 = sand.u32 1, %s2824_s27   ;;  %p2583_p12 = pnand %p2464_p1, %p2942_p10 }
0x1b00   : > { %s2366_s9 = scalar_lea.sflag [#allocation6], %s2365_s18 }
0x1b01   : > { %p2584_p13 = pneg %p2583_p12 }
0x1b03   : > { %2819 = dma.done.wait (%p2584_p13), %s2366_s9, 1024  }
0x1b04   : > { %2821 = vsyncadd (%p2584_p13), %s2366_s9, 4294966272  ;;  %p19_p0 = scmp.ge.s32.totalorder %s2918_s11, 4   ;;  %s3867_s27 = smov %s2828_s28 }
0x1b05   : > { %s3868_s28 = smov %s2832_s29  ;;  %s3869_s29 = smov %s2930_s14 }
0x1b06   : > { %s3870_s30 = smov %s2918_s11  ;;  %21 = sbr.rel (!%p19_p0) target bundleno = 4 (0x4), region = 185 }
0x1b0b   :  { %2372 = vsyncpa [#allocation5], 1 }
0x1b0c   :  { %2374 = vsyncpa [#allocation5 + $0x1], 1 }
0x1b0d   :  { %2375 = vsyncpa [#allocation6], 1 }
0x1b0e   :  { %2377 = vsyncpa [#allocation6 + $0x1], 1 }

</bundles_post_ra>
